<compile_context>
chip_gen: v7x
topology: tpu7x:2x2x1
jax: 0.10.0
libtpu: 0.0.40
codegen_flags: <defaults>
</compile_context>

<pallas_src>
import functools

import numpy as np
import jax
import jax.numpy as jnp
from jax.experimental import pallas as pl
from jax.experimental.pallas import tpu as pltpu

LANE = 128  # TPU lane width: pad contraction / class dims to multiples of this


def _round_up(x, m):
    return (x + m - 1) // m * m


# ---------------------------------------------------------------------------
# Fused forward kernel: every layer of BaseModel in a single Pallas invocation.
# ---------------------------------------------------------------------------
def _fused_forward_kernel(p1_ref, w1_ref, b1_ref,      # conv1 (im2col patches)
                          s2_ref, w2_ref, b2_ref,      # conv2 (3x3 taps)
                          pool1_ref,                   # maxpool #1 (4 taps)
                          s3_ref, w3_ref, b3_ref,      # conv3 (3x3 taps)
                          pool2_ref,                   # maxpool #2 (4 taps)
                          wfc_ref, bfc_ref,            # fc (classes padded)
                          o_ref):
    f32 = jnp.float32

    # conv1 + ReLU: one full-size matmul on the zero-padded im2col patches.
    a1 = jnp.dot(p1_ref[...], w1_ref[...], preferred_element_type=f32)
    a1 = jnp.maximum(a1 + b1_ref[...], 0.0)                   # (M1, 32)

    # conv2 + ReLU: sum over the 9 kernel taps; each tap is a 0/1 row-gather
    # matmul (spatial shift) followed by a per-tap channel-mixing matmul.
    acc2 = jnp.zeros((s2_ref.shape[1], w2_ref.shape[2]), f32)
    for t in range(s2_ref.shape[0]):
        g = jnp.dot(s2_ref[t], a1, preferred_element_type=f32)        # (M2, 32)
        acc2 = acc2 + jnp.dot(g, w2_ref[t], preferred_element_type=f32)
    a2 = jnp.maximum(acc2 + b2_ref[...], 0.0)                 # (M2, 64)

    # 2x2 max-pool #1: elementwise max over the 4 window taps (row gathers).
    pooled = jnp.dot(pool1_ref[0], a2, preferred_element_type=f32)
    for t in range(1, pool1_ref.shape[0]):
        pooled = jnp.maximum(
            pooled, jnp.dot(pool1_ref[t], a2, preferred_element_type=f32))
    a2p = pooled                                              # (M2p, 64)

    # conv3 + ReLU (same tap decomposition).
    acc3 = jnp.zeros((s3_ref.shape[1], w3_ref.shape[2]), f32)
    for t in range(s3_ref.shape[0]):
        g = jnp.dot(s3_ref[t], a2p, preferred_element_type=f32)       # (M3, 64)
        acc3 = acc3 + jnp.dot(g, w3_ref[t], preferred_element_type=f32)
    a3 = jnp.maximum(acc3 + b3_ref[...], 0.0)                 # (M3, 128)

    # 2x2 max-pool #2 -> 1x1 spatial map; AdaptiveAvgPool2d((1,1)) on a 1x1
    # map is the identity, so `feat` is already the pooled (N, 128) feature.
    feat = jnp.dot(pool2_ref[0], a3, preferred_element_type=f32)
    for t in range(1, pool2_ref.shape[0]):
        feat = jnp.maximum(
            feat, jnp.dot(pool2_ref[t], a3, preferred_element_type=f32))
    # dropout1 / dropout2: identity in eval mode.

    # fc: classes padded to a full 128-lane (unmasked) output store.
    logits = jnp.dot(feat, wfc_ref[...], preferred_element_type=f32)
    o_ref[...] = (logits + bfc_ref[...]).astype(o_ref.dtype)


# ---------------------------------------------------------------------------
# Host-side constant builders (0/1 spatial selection matrices, numpy).
# ---------------------------------------------------------------------------
def _conv_tap_selectors(n, h_in, w_in, kh, kw):
    """S[t] (t = i*kw + j): S[t, (n,ho,wo), (n, ho+i, wo+j)] = 1.
    Rows/cols are spatial positions flattened as n*H*W + h*W + w."""
    h_out, w_out = h_in - kh + 1, w_in - kw + 1
    sel = np.zeros((kh * kw, n * h_out * w_out, n * h_in * w_in), np.float32)
    for i in range(kh):
        for j in range(kw):
            t = i * kw + j
            for b in range(n):
                for ho in range(h_out):
                    for wo in range(w_out):
                        r = (b * h_out + ho) * w_out + wo
                        c = (b * h_in + ho + i) * w_in + wo + j
                        sel[t, r, c] = 1.0
    return sel


def _pool_tap_selectors(n, h_in, w_in):
    """2x2 / stride-2 pool taps: P[d] maps (n,ph,pw) -> (n, 2ph+di, 2pw+dj)."""
    h_out, w_out = h_in // 2, w_in // 2
    sel = np.zeros((4, n * h_out * w_out, n * h_in * w_in), np.float32)
    for di in range(2):
        for dj in range(2):
            d = di * 2 + dj
            for b in range(n):
                for ph in range(h_out):
                    for pw in range(w_out):
                        r = (b * h_out + ph) * w_out + pw
                        c = (b * h_in + 2 * ph + di) * w_in + 2 * pw + dj
                        sel[d, r, c] = 1.0
    return sel


def _im2col(x_nhwc, kh, kw):
    """Valid, stride-1 im2col in XLA (only used on the tiny network input)."""
    n, h, w, c = x_nhwc.shape
    ho, wo = h - kh + 1, w - kw + 1
    cols = [x_nhwc[:, i:i + ho, j:j + wo, :]
            for i in range(kh) for j in range(kw)]
    patches = jnp.concatenate(cols, axis=-1)          # (n, ho, wo, kh*kw*c)
    return patches.reshape(n * ho * wo, kh * kw * c)


# ---------------------------------------------------------------------------
# Parameter construction (weights + shape-specialized selection constants).
# ---------------------------------------------------------------------------
def init_params(key, num_classes, batch, height, width):
    ks = jax.random.split(key, 8)

    def uni(k, shape, fan_in):
        s = 1.0 / np.sqrt(float(fan_in))
        return jax.random.uniform(k, shape, jnp.float32, minval=-s, maxval=s)

    w1 = uni(ks[0], (7, 7, 3, 32), 7 * 7 * 3)
    b1 = uni(ks[1], (32,), 7 * 7 * 3)
    w2 = uni(ks[2], (3, 3, 32, 64), 3 * 3 * 32)
    b2 = uni(ks[3], (64,), 3 * 3 * 32)
    w3 = uni(ks[4], (3, 3, 64, 128), 3 * 3 * 64)
    b3 = uni(ks[5], (128,), 3 * 3 * 64)
    wfc = uni(ks[6], (128, num_classes), 128)
    bfc = uni(ks[7], (num_classes,), 128)

    # conv1 weight as (K1 padded to 256) x 32 matrix matching the im2col order.
    k1 = 7 * 7 * 3
    k1p = _round_up(k1, LANE)
    w1m = jnp.zeros((k1p, 32), jnp.float32).at[:k1, :].set(w1.reshape(k1, 32))

    # fc weight/bias padded to a full 128-lane output (lane-dense final store).
    ncp = _round_up(num_classes, LANE)
    wfcp = jnp.zeros((128, ncp), jnp.float32).at[:, :num_classes].set(wfc)
    bfcp = jnp.zeros((1, ncp), jnp.float32).at[0, :num_classes].set(bfc)

    # Spatial sizes through the net (valid convs, stride 1, 2x2 pools).
    h1, v1 = height - 7 + 1, width - 7 + 1      # after conv1   (10x10)
    h2, v2 = h1 - 3 + 1, v1 - 3 + 1             # after conv2   ( 8x 8)
    h2p, v2p = h2 // 2, v2 // 2                 # after pool 1  ( 4x 4)
    h3, v3 = h2p - 3 + 1, v2p - 3 + 1           # after conv3   ( 2x 2)

    return {
        "w1": w1m, "b1": b1.reshape(1, 32),
        "s2": jnp.asarray(_conv_tap_selectors(batch, h1, v1, 3, 3)),
        "w2": w2.reshape(9, 32, 64), "b2": b2.reshape(1, 64),
        "pool1": jnp.asarray(_pool_tap_selectors(batch, h2, v2)),
        "s3": jnp.asarray(_conv_tap_selectors(batch, h2p, v2p, 3, 3)),
        "w3": w3.reshape(9, 64, 128), "b3": b3.reshape(1, 128),
        "pool2": jnp.asarray(_pool_tap_selectors(batch, h3, v3)),
        "wfc": wfcp, "bfc": bfcp,
    }


# ---------------------------------------------------------------------------
# Forward pass: XLA pre-processing of the raw input + one fused Pallas call.
# ---------------------------------------------------------------------------
@functools.partial(jax.jit, static_argnums=2)
def forward(params, x_nchw, num_classes):
    n = x_nchw.shape[0]
    x = jnp.transpose(x_nchw, (0, 2, 3, 1))             # NCHW -> NHWC
    p1 = _im2col(x, 7, 7)                               # (N*10*10, 147)
    k1p = params["w1"].shape[0]
    p1 = jnp.pad(p1, ((0, 0), (0, k1p - p1.shape[1])))  # pad K to 256 (aligned)

    ncp = params["wfc"].shape[1]
    vmem = pl.BlockSpec(memory_space=pltpu.MemorySpace.VMEM)
    out = pl.pallas_call(
        _fused_forward_kernel,
        out_shape=jax.ShapeDtypeStruct((n, ncp), jnp.float32),
        in_specs=[vmem] * 13,
        out_specs=vmem,
    )(p1, params["w1"], params["b1"],
      params["s2"], params["w2"], params["b2"], params["pool1"],
      params["s3"], params["w3"], params["b3"], params["pool2"],
      params["wfc"], params["bfc"])
    return out[:, :num_classes]


if __name__ == "__main__":
    num_classes = 10
    batch, height, width = 2, 16, 16
    key = jax.random.PRNGKey(0)
    k_x, k_p = jax.random.split(key)
    x = jax.random.normal(k_x, (batch, 3, height, width), jnp.float32)  # NCHW
    params = init_params(k_p, num_classes, batch, height, width)

    out = forward(params, x, num_classes)
    jax.block_until_ready(out)
    assert out.shape == (batch, num_classes), out.shape
    # TODO(synk): nn.Dropout layers are omitted (identity at inference time).
    print("KERNEL_OK")
</pallas_src>

<mosaic_0001>
module attributes {stable_mosaic.version = 11 : i64} {
  func.func @_fused_forward_kernel(%arg0: memref<200x256xf32, #tpu.memory_space<vmem>>, %arg1: memref<256x32xf32, #tpu.memory_space<vmem>>, %arg2: memref<1x32xf32, #tpu.memory_space<vmem>>, %arg3: memref<9x128x200xf32, #tpu.memory_space<vmem>>, %arg4: memref<9x32x64xf32, #tpu.memory_space<vmem>>, %arg5: memref<1x64xf32, #tpu.memory_space<vmem>>, %arg6: memref<4x32x128xf32, #tpu.memory_space<vmem>>, %arg7: memref<9x8x32xf32, #tpu.memory_space<vmem>>, %arg8: memref<9x64x128xf32, #tpu.memory_space<vmem>>, %arg9: memref<1x128xf32, #tpu.memory_space<vmem>>, %arg10: memref<4x2x8xf32, #tpu.memory_space<vmem>>, %arg11: memref<128x128xf32, #tpu.memory_space<vmem>>, %arg12: memref<1x128xf32, #tpu.memory_space<vmem>>, %arg13: memref<2x128xf32, #tpu.memory_space<vmem>>) attributes {dimension_semantics = [], scalar_prefetch = 0 : i64, scratch_operands = 0 : i64, tpu.core_type = #tpu.core_type<tc>} {
    %c0 = arith.constant 0 : index
    %c0_0 = arith.constant 0 : index
    %0 = vector.load %arg0[%c0, %c0_0] : memref<200x256xf32, #tpu.memory_space<vmem>>, vector<200x256xf32>
    %c0_1 = arith.constant 0 : index
    %c0_2 = arith.constant 0 : index
    %1 = vector.load %arg1[%c0_1, %c0_2] : memref<256x32xf32, #tpu.memory_space<vmem>>, vector<256x32xf32>
    %cst = arith.constant dense<0.000000e+00> : vector<200x32xf32>
    %2 = tpu.matmul %0, %1, %cst {dimension_numbers = #tpu.dot_dimension_numbers<[1], [0], [0], [1], [0, 0, 1, 1], [], []>} : vector<200x256xf32>, vector<256x32xf32>, vector<200x32xf32> -> vector<200x32xf32>
    %c0_3 = arith.constant 0 : index
    %c0_4 = arith.constant 0 : index
    %3 = vector.load %arg2[%c0_3, %c0_4] : memref<1x32xf32, #tpu.memory_space<vmem>>, vector<1x32xf32>
    %4 = vector.broadcast %3 : vector<1x32xf32> to vector<200x32xf32>
    %5 = arith.addf %2, %4 : vector<200x32xf32>
    %cst_5 = arith.constant 0.000000e+00 : f32
    %6 = vector.broadcast %cst_5 : f32 to vector<200x32xf32>
    %7 = arith.maximumf %5, %6 : vector<200x32xf32>
    %cst_6 = arith.constant 0.000000e+00 : f32
    %8 = vector.broadcast %cst_6 : f32 to vector<128x64xf32>
    %c0_7 = arith.constant 0 : index
    %c0_8 = arith.constant 0 : index
    %c0_9 = arith.constant 0 : index
    %9 = vector.load %arg3[%c0_7, %c0_8, %c0_9] : memref<9x128x200xf32, #tpu.memory_space<vmem>>, vector<1x128x200xf32>
    %10 = vector.shape_cast %9 : vector<1x128x200xf32> to vector<128x200xf32>
    %cst_10 = arith.constant dense<0.000000e+00> : vector<128x32xf32>
    %11 = tpu.matmul %10, %7, %cst_10 {dimension_numbers = #tpu.dot_dimension_numbers<[1], [0], [0], [1], [0, 0, 1, 1], [], []>} : vector<128x200xf32>, vector<200x32xf32>, vector<128x32xf32> -> vector<128x32xf32>
    %c0_11 = arith.constant 0 : index
    %c0_12 = arith.constant 0 : index
    %c0_13 = arith.constant 0 : index
    %12 = vector.load %arg4[%c0_11, %c0_12, %c0_13] : memref<9x32x64xf32, #tpu.memory_space<vmem>>, vector<1x32x64xf32>
    %13 = vector.shape_cast %12 : vector<1x32x64xf32> to vector<32x64xf32>
    %cst_14 = arith.constant dense<0.000000e+00> : vector<128x64xf32>
    %14 = tpu.matmul %11, %13, %cst_14 {dimension_numbers = #tpu.dot_dimension_numbers<[1], [0], [0], [1], [0, 0, 1, 1], [], []>} : vector<128x32xf32>, vector<32x64xf32>, vector<128x64xf32> -> vector<128x64xf32>
    %15 = arith.addf %8, %14 : vector<128x64xf32>
    %c1 = arith.constant 1 : index
    %c0_15 = arith.constant 0 : index
    %c0_16 = arith.constant 0 : index
    %16 = vector.load %arg3[%c1, %c0_15, %c0_16] : memref<9x128x200xf32, #tpu.memory_space<vmem>>, vector<1x128x200xf32>
    %17 = vector.shape_cast %16 : vector<1x128x200xf32> to vector<128x200xf32>
    %cst_17 = arith.constant dense<0.000000e+00> : vector<128x32xf32>
    %18 = tpu.matmul %17, %7, %cst_17 {dimension_numbers = #tpu.dot_dimension_numbers<[1], [0], [0], [1], [0, 0, 1, 1], [], []>} : vector<128x200xf32>, vector<200x32xf32>, vector<128x32xf32> -> vector<128x32xf32>
    %c1_18 = arith.constant 1 : index
    %c0_19 = arith.constant 0 : index
    %c0_20 = arith.constant 0 : index
    %19 = vector.load %arg4[%c1_18, %c0_19, %c0_20] : memref<9x32x64xf32, #tpu.memory_space<vmem>>, vector<1x32x64xf32>
    %20 = vector.shape_cast %19 : vector<1x32x64xf32> to vector<32x64xf32>
    %cst_21 = arith.constant dense<0.000000e+00> : vector<128x64xf32>
    %21 = tpu.matmul %18, %20, %cst_21 {dimension_numbers = #tpu.dot_dimension_numbers<[1], [0], [0], [1], [0, 0, 1, 1], [], []>} : vector<128x32xf32>, vector<32x64xf32>, vector<128x64xf32> -> vector<128x64xf32>
    %22 = arith.addf %15, %21 : vector<128x64xf32>
    %c2 = arith.constant 2 : index
    %c0_22 = arith.constant 0 : index
    %c0_23 = arith.constant 0 : index
    %23 = vector.load %arg3[%c2, %c0_22, %c0_23] : memref<9x128x200xf32, #tpu.memory_space<vmem>>, vector<1x128x200xf32>
    %24 = vector.shape_cast %23 : vector<1x128x200xf32> to vector<128x200xf32>
    %cst_24 = arith.constant dense<0.000000e+00> : vector<128x32xf32>
    %25 = tpu.matmul %24, %7, %cst_24 {dimension_numbers = #tpu.dot_dimension_numbers<[1], [0], [0], [1], [0, 0, 1, 1], [], []>} : vector<128x200xf32>, vector<200x32xf32>, vector<128x32xf32> -> vector<128x32xf32>
    %c2_25 = arith.constant 2 : index
    %c0_26 = arith.constant 0 : index
    %c0_27 = arith.constant 0 : index
    %26 = vector.load %arg4[%c2_25, %c0_26, %c0_27] : memref<9x32x64xf32, #tpu.memory_space<vmem>>, vector<1x32x64xf32>
    %27 = vector.shape_cast %26 : vector<1x32x64xf32> to vector<32x64xf32>
    %cst_28 = arith.constant dense<0.000000e+00> : vector<128x64xf32>
    %28 = tpu.matmul %25, %27, %cst_28 {dimension_numbers = #tpu.dot_dimension_numbers<[1], [0], [0], [1], [0, 0, 1, 1], [], []>} : vector<128x32xf32>, vector<32x64xf32>, vector<128x64xf32> -> vector<128x64xf32>
    %29 = arith.addf %22, %28 : vector<128x64xf32>
    %c3 = arith.constant 3 : index
    %c0_29 = arith.constant 0 : index
    %c0_30 = arith.constant 0 : index
    %30 = vector.load %arg3[%c3, %c0_29, %c0_30] : memref<9x128x200xf32, #tpu.memory_space<vmem>>, vector<1x128x200xf32>
    %31 = vector.shape_cast %30 : vector<1x128x200xf32> to vector<128x200xf32>
    %cst_31 = arith.constant dense<0.000000e+00> : vector<128x32xf32>
    %32 = tpu.matmul %31, %7, %cst_31 {dimension_numbers = #tpu.dot_dimension_numbers<[1], [0], [0], [1], [0, 0, 1, 1], [], []>} : vector<128x200xf32>, vector<200x32xf32>, vector<128x32xf32> -> vector<128x32xf32>
    %c3_32 = arith.constant 3 : index
    %c0_33 = arith.constant 0 : index
    %c0_34 = arith.constant 0 : index
    %33 = vector.load %arg4[%c3_32, %c0_33, %c0_34] : memref<9x32x64xf32, #tpu.memory_space<vmem>>, vector<1x32x64xf32>
    %34 = vector.shape_cast %33 : vector<1x32x64xf32> to vector<32x64xf32>
    %cst_35 = arith.constant dense<0.000000e+00> : vector<128x64xf32>
    %35 = tpu.matmul %32, %34, %cst_35 {dimension_numbers = #tpu.dot_dimension_numbers<[1], [0], [0], [1], [0, 0, 1, 1], [], []>} : vector<128x32xf32>, vector<32x64xf32>, vector<128x64xf32> -> vector<128x64xf32>
    %36 = arith.addf %29, %35 : vector<128x64xf32>
    %c4 = arith.constant 4 : index
    %c0_36 = arith.constant 0 : index
    %c0_37 = arith.constant 0 : index
    %37 = vector.load %arg3[%c4, %c0_36, %c0_37] : memref<9x128x200xf32, #tpu.memory_space<vmem>>, vector<1x128x200xf32>
    %38 = vector.shape_cast %37 : vector<1x128x200xf32> to vector<128x200xf32>
    %cst_38 = arith.constant dense<0.000000e+00> : vector<128x32xf32>
    %39 = tpu.matmul %38, %7, %cst_38 {dimension_numbers = #tpu.dot_dimension_numbers<[1], [0], [0], [1], [0, 0, 1, 1], [], []>} : vector<128x200xf32>, vector<200x32xf32>, vector<128x32xf32> -> vector<128x32xf32>
    %c4_39 = arith.constant 4 : index
    %c0_40 = arith.constant 0 : index
    %c0_41 = arith.constant 0 : index
    %40 = vector.load %arg4[%c4_39, %c0_40, %c0_41] : memref<9x32x64xf32, #tpu.memory_space<vmem>>, vector<1x32x64xf32>
    %41 = vector.shape_cast %40 : vector<1x32x64xf32> to vector<32x64xf32>
    %cst_42 = arith.constant dense<0.000000e+00> : vector<128x64xf32>
    %42 = tpu.matmul %39, %41, %cst_42 {dimension_numbers = #tpu.dot_dimension_numbers<[1], [0], [0], [1], [0, 0, 1, 1], [], []>} : vector<128x32xf32>, vector<32x64xf32>, vector<128x64xf32> -> vector<128x64xf32>
    %43 = arith.addf %36, %42 : vector<128x64xf32>
    %c5 = arith.constant 5 : index
    %c0_43 = arith.constant 0 : index
    %c0_44 = arith.constant 0 : index
    %44 = vector.load %arg3[%c5, %c0_43, %c0_44] : memref<9x128x200xf32, #tpu.memory_space<vmem>>, vector<1x128x200xf32>
    %45 = vector.shape_cast %44 : vector<1x128x200xf32> to vector<128x200xf32>
    %cst_45 = arith.constant dense<0.000000e+00> : vector<128x32xf32>
    %46 = tpu.matmul %45, %7, %cst_45 {dimension_numbers = #tpu.dot_dimension_numbers<[1], [0], [0], [1], [0, 0, 1, 1], [], []>} : vector<128x200xf32>, vector<200x32xf32>, vector<128x32xf32> -> vector<128x32xf32>
    %c5_46 = arith.constant 5 : index
    %c0_47 = arith.constant 0 : index
    %c0_48 = arith.constant 0 : index
    %47 = vector.load %arg4[%c5_46, %c0_47, %c0_48] : memref<9x32x64xf32, #tpu.memory_space<vmem>>, vector<1x32x64xf32>
    %48 = vector.shape_cast %47 : vector<1x32x64xf32> to vector<32x64xf32>
    %cst_49 = arith.constant dense<0.000000e+00> : vector<128x64xf32>
    %49 = tpu.matmul %46, %48, %cst_49 {dimension_numbers = #tpu.dot_dimension_numbers<[1], [0], [0], [1], [0, 0, 1, 1], [], []>} : vector<128x32xf32>, vector<32x64xf32>, vector<128x64xf32> -> vector<128x64xf32>
    %50 = arith.addf %43, %49 : vector<128x64xf32>
    %c6 = arith.constant 6 : index
    %c0_50 = arith.constant 0 : index
    %c0_51 = arith.constant 0 : index
    %51 = vector.load %arg3[%c6, %c0_50, %c0_51] : memref<9x128x200xf32, #tpu.memory_space<vmem>>, vector<1x128x200xf32>
    %52 = vector.shape_cast %51 : vector<1x128x200xf32> to vector<128x200xf32>
    %cst_52 = arith.constant dense<0.000000e+00> : vector<128x32xf32>
    %53 = tpu.matmul %52, %7, %cst_52 {dimension_numbers = #tpu.dot_dimension_numbers<[1], [0], [0], [1], [0, 0, 1, 1], [], []>} : vector<128x200xf32>, vector<200x32xf32>, vector<128x32xf32> -> vector<128x32xf32>
    %c6_53 = arith.constant 6 : index
    %c0_54 = arith.constant 0 : index
    %c0_55 = arith.constant 0 : index
    %54 = vector.load %arg4[%c6_53, %c0_54, %c0_55] : memref<9x32x64xf32, #tpu.memory_space<vmem>>, vector<1x32x64xf32>
    %55 = vector.shape_cast %54 : vector<1x32x64xf32> to vector<32x64xf32>
    %cst_56 = arith.constant dense<0.000000e+00> : vector<128x64xf32>
    %56 = tpu.matmul %53, %55, %cst_56 {dimension_numbers = #tpu.dot_dimension_numbers<[1], [0], [0], [1], [0, 0, 1, 1], [], []>} : vector<128x32xf32>, vector<32x64xf32>, vector<128x64xf32> -> vector<128x64xf32>
    %57 = arith.addf %50, %56 : vector<128x64xf32>
    %c7 = arith.constant 7 : index
    %c0_57 = arith.constant 0 : index
    %c0_58 = arith.constant 0 : index
    %58 = vector.load %arg3[%c7, %c0_57, %c0_58] : memref<9x128x200xf32, #tpu.memory_space<vmem>>, vector<1x128x200xf32>
    %59 = vector.shape_cast %58 : vector<1x128x200xf32> to vector<128x200xf32>
    %cst_59 = arith.constant dense<0.000000e+00> : vector<128x32xf32>
    %60 = tpu.matmul %59, %7, %cst_59 {dimension_numbers = #tpu.dot_dimension_numbers<[1], [0], [0], [1], [0, 0, 1, 1], [], []>} : vector<128x200xf32>, vector<200x32xf32>, vector<128x32xf32> -> vector<128x32xf32>
    %c7_60 = arith.constant 7 : index
    %c0_61 = arith.constant 0 : index
    %c0_62 = arith.constant 0 : index
    %61 = vector.load %arg4[%c7_60, %c0_61, %c0_62] : memref<9x32x64xf32, #tpu.memory_space<vmem>>, vector<1x32x64xf32>
    %62 = vector.shape_cast %61 : vector<1x32x64xf32> to vector<32x64xf32>
    %cst_63 = arith.constant dense<0.000000e+00> : vector<128x64xf32>
    %63 = tpu.matmul %60, %62, %cst_63 {dimension_numbers = #tpu.dot_dimension_numbers<[1], [0], [0], [1], [0, 0, 1, 1], [], []>} : vector<128x32xf32>, vector<32x64xf32>, vector<128x64xf32> -> vector<128x64xf32>
    %64 = arith.addf %57, %63 : vector<128x64xf32>
    %c8 = arith.constant 8 : index
    %c0_64 = arith.constant 0 : index
    %c0_65 = arith.constant 0 : index
    %65 = vector.load %arg3[%c8, %c0_64, %c0_65] : memref<9x128x200xf32, #tpu.memory_space<vmem>>, vector<1x128x200xf32>
    %66 = vector.shape_cast %65 : vector<1x128x200xf32> to vector<128x200xf32>
    %cst_66 = arith.constant dense<0.000000e+00> : vector<128x32xf32>
    %67 = tpu.matmul %66, %7, %cst_66 {dimension_numbers = #tpu.dot_dimension_numbers<[1], [0], [0], [1], [0, 0, 1, 1], [], []>} : vector<128x200xf32>, vector<200x32xf32>, vector<128x32xf32> -> vector<128x32xf32>
    %c8_67 = arith.constant 8 : index
    %c0_68 = arith.constant 0 : index
    %c0_69 = arith.constant 0 : index
    %68 = vector.load %arg4[%c8_67, %c0_68, %c0_69] : memref<9x32x64xf32, #tpu.memory_space<vmem>>, vector<1x32x64xf32>
    %69 = vector.shape_cast %68 : vector<1x32x64xf32> to vector<32x64xf32>
    %cst_70 = arith.constant dense<0.000000e+00> : vector<128x64xf32>
    %70 = tpu.matmul %67, %69, %cst_70 {dimension_numbers = #tpu.dot_dimension_numbers<[1], [0], [0], [1], [0, 0, 1, 1], [], []>} : vector<128x32xf32>, vector<32x64xf32>, vector<128x64xf32> -> vector<128x64xf32>
    %71 = arith.addf %64, %70 : vector<128x64xf32>
    %c0_71 = arith.constant 0 : index
    %c0_72 = arith.constant 0 : index
    %72 = vector.load %arg5[%c0_71, %c0_72] : memref<1x64xf32, #tpu.memory_space<vmem>>, vector<1x64xf32>
    %73 = vector.broadcast %72 : vector<1x64xf32> to vector<128x64xf32>
    %74 = arith.addf %71, %73 : vector<128x64xf32>
    %cst_73 = arith.constant 0.000000e+00 : f32
    %75 = vector.broadcast %cst_73 : f32 to vector<128x64xf32>
    %76 = arith.maximumf %74, %75 : vector<128x64xf32>
    %c0_74 = arith.constant 0 : index
    %c0_75 = arith.constant 0 : index
    %c0_76 = arith.constant 0 : index
    %77 = vector.load %arg6[%c0_74, %c0_75, %c0_76] : memref<4x32x128xf32, #tpu.memory_space<vmem>>, vector<1x32x128xf32>
    %78 = vector.shape_cast %77 : vector<1x32x128xf32> to vector<32x128xf32>
    %cst_77 = arith.constant dense<0.000000e+00> : vector<32x64xf32>
    %79 = tpu.matmul %78, %76, %cst_77 {dimension_numbers = #tpu.dot_dimension_numbers<[1], [0], [0], [1], [0, 0, 1, 1], [], []>} : vector<32x128xf32>, vector<128x64xf32>, vector<32x64xf32> -> vector<32x64xf32>
    %c1_78 = arith.constant 1 : index
    %c0_79 = arith.constant 0 : index
    %c0_80 = arith.constant 0 : index
    %80 = vector.load %arg6[%c1_78, %c0_79, %c0_80] : memref<4x32x128xf32, #tpu.memory_space<vmem>>, vector<1x32x128xf32>
    %81 = vector.shape_cast %80 : vector<1x32x128xf32> to vector<32x128xf32>
    %cst_81 = arith.constant dense<0.000000e+00> : vector<32x64xf32>
    %82 = tpu.matmul %81, %76, %cst_81 {dimension_numbers = #tpu.dot_dimension_numbers<[1], [0], [0], [1], [0, 0, 1, 1], [], []>} : vector<32x128xf32>, vector<128x64xf32>, vector<32x64xf32> -> vector<32x64xf32>
    %83 = arith.maximumf %79, %82 : vector<32x64xf32>
    %c2_82 = arith.constant 2 : index
    %c0_83 = arith.constant 0 : index
    %c0_84 = arith.constant 0 : index
    %84 = vector.load %arg6[%c2_82, %c0_83, %c0_84] : memref<4x32x128xf32, #tpu.memory_space<vmem>>, vector<1x32x128xf32>
    %85 = vector.shape_cast %84 : vector<1x32x128xf32> to vector<32x128xf32>
    %cst_85 = arith.constant dense<0.000000e+00> : vector<32x64xf32>
    %86 = tpu.matmul %85, %76, %cst_85 {dimension_numbers = #tpu.dot_dimension_numbers<[1], [0], [0], [1], [0, 0, 1, 1], [], []>} : vector<32x128xf32>, vector<128x64xf32>, vector<32x64xf32> -> vector<32x64xf32>
    %87 = arith.maximumf %83, %86 : vector<32x64xf32>
    %c3_86 = arith.constant 3 : index
    %c0_87 = arith.constant 0 : index
    %c0_88 = arith.constant 0 : index
    %88 = vector.load %arg6[%c3_86, %c0_87, %c0_88] : memref<4x32x128xf32, #tpu.memory_space<vmem>>, vector<1x32x128xf32>
    %89 = vector.shape_cast %88 : vector<1x32x128xf32> to vector<32x128xf32>
    %cst_89 = arith.constant dense<0.000000e+00> : vector<32x64xf32>
    %90 = tpu.matmul %89, %76, %cst_89 {dimension_numbers = #tpu.dot_dimension_numbers<[1], [0], [0], [1], [0, 0, 1, 1], [], []>} : vector<32x128xf32>, vector<128x64xf32>, vector<32x64xf32> -> vector<32x64xf32>
    %91 = arith.maximumf %87, %90 : vector<32x64xf32>
    %cst_90 = arith.constant 0.000000e+00 : f32
    %92 = vector.broadcast %cst_90 : f32 to vector<8x128xf32>
    %c0_91 = arith.constant 0 : index
    %c0_92 = arith.constant 0 : index
    %c0_93 = arith.constant 0 : index
    %93 = vector.load %arg7[%c0_91, %c0_92, %c0_93] : memref<9x8x32xf32, #tpu.memory_space<vmem>>, vector<1x8x32xf32>
    %94 = vector.shape_cast %93 : vector<1x8x32xf32> to vector<8x32xf32>
    %cst_94 = arith.constant dense<0.000000e+00> : vector<8x64xf32>
    %95 = tpu.matmul %94, %91, %cst_94 {dimension_numbers = #tpu.dot_dimension_numbers<[1], [0], [0], [1], [0, 0, 1, 1], [], []>} : vector<8x32xf32>, vector<32x64xf32>, vector<8x64xf32> -> vector<8x64xf32>
    %c0_95 = arith.constant 0 : index
    %c0_96 = arith.constant 0 : index
    %c0_97 = arith.constant 0 : index
    %96 = vector.load %arg8[%c0_95, %c0_96, %c0_97] : memref<9x64x128xf32, #tpu.memory_space<vmem>>, vector<1x64x128xf32>
    %97 = vector.shape_cast %96 : vector<1x64x128xf32> to vector<64x128xf32>
    %cst_98 = arith.constant dense<0.000000e+00> : vector<8x128xf32>
    %98 = tpu.matmul %95, %97, %cst_98 {dimension_numbers = #tpu.dot_dimension_numbers<[1], [0], [0], [1], [0, 0, 1, 1], [], []>} : vector<8x64xf32>, vector<64x128xf32>, vector<8x128xf32> -> vector<8x128xf32>
    %99 = arith.addf %92, %98 : vector<8x128xf32>
    %c1_99 = arith.constant 1 : index
    %c0_100 = arith.constant 0 : index
    %c0_101 = arith.constant 0 : index
    %100 = vector.load %arg7[%c1_99, %c0_100, %c0_101] : memref<9x8x32xf32, #tpu.memory_space<vmem>>, vector<1x8x32xf32>
    %101 = vector.shape_cast %100 : vector<1x8x32xf32> to vector<8x32xf32>
    %cst_102 = arith.constant dense<0.000000e+00> : vector<8x64xf32>
    %102 = tpu.matmul %101, %91, %cst_102 {dimension_numbers = #tpu.dot_dimension_numbers<[1], [0], [0], [1], [0, 0, 1, 1], [], []>} : vector<8x32xf32>, vector<32x64xf32>, vector<8x64xf32> -> vector<8x64xf32>
    %c1_103 = arith.constant 1 : index
    %c0_104 = arith.constant 0 : index
    %c0_105 = arith.constant 0 : index
    %103 = vector.load %arg8[%c1_103, %c0_104, %c0_105] : memref<9x64x128xf32, #tpu.memory_space<vmem>>, vector<1x64x128xf32>
    %104 = vector.shape_cast %103 : vector<1x64x128xf32> to vector<64x128xf32>
    %cst_106 = arith.constant dense<0.000000e+00> : vector<8x128xf32>
    %105 = tpu.matmul %102, %104, %cst_106 {dimension_numbers = #tpu.dot_dimension_numbers<[1], [0], [0], [1], [0, 0, 1, 1], [], []>} : vector<8x64xf32>, vector<64x128xf32>, vector<8x128xf32> -> vector<8x128xf32>
    %106 = arith.addf %99, %105 : vector<8x128xf32>
    %c2_107 = arith.constant 2 : index
    %c0_108 = arith.constant 0 : index
    %c0_109 = arith.constant 0 : index
    %107 = vector.load %arg7[%c2_107, %c0_108, %c0_109] : memref<9x8x32xf32, #tpu.memory_space<vmem>>, vector<1x8x32xf32>
    %108 = vector.shape_cast %107 : vector<1x8x32xf32> to vector<8x32xf32>
    %cst_110 = arith.constant dense<0.000000e+00> : vector<8x64xf32>
    %109 = tpu.matmul %108, %91, %cst_110 {dimension_numbers = #tpu.dot_dimension_numbers<[1], [0], [0], [1], [0, 0, 1, 1], [], []>} : vector<8x32xf32>, vector<32x64xf32>, vector<8x64xf32> -> vector<8x64xf32>
    %c2_111 = arith.constant 2 : index
    %c0_112 = arith.constant 0 : index
    %c0_113 = arith.constant 0 : index
    %110 = vector.load %arg8[%c2_111, %c0_112, %c0_113] : memref<9x64x128xf32, #tpu.memory_space<vmem>>, vector<1x64x128xf32>
    %111 = vector.shape_cast %110 : vector<1x64x128xf32> to vector<64x128xf32>
    %cst_114 = arith.constant dense<0.000000e+00> : vector<8x128xf32>
    %112 = tpu.matmul %109, %111, %cst_114 {dimension_numbers = #tpu.dot_dimension_numbers<[1], [0], [0], [1], [0, 0, 1, 1], [], []>} : vector<8x64xf32>, vector<64x128xf32>, vector<8x128xf32> -> vector<8x128xf32>
    %113 = arith.addf %106, %112 : vector<8x128xf32>
    %c3_115 = arith.constant 3 : index
    %c0_116 = arith.constant 0 : index
    %c0_117 = arith.constant 0 : index
    %114 = vector.load %arg7[%c3_115, %c0_116, %c0_117] : memref<9x8x32xf32, #tpu.memory_space<vmem>>, vector<1x8x32xf32>
    %115 = vector.shape_cast %114 : vector<1x8x32xf32> to vector<8x32xf32>
    %cst_118 = arith.constant dense<0.000000e+00> : vector<8x64xf32>
    %116 = tpu.matmul %115, %91, %cst_118 {dimension_numbers = #tpu.dot_dimension_numbers<[1], [0], [0], [1], [0, 0, 1, 1], [], []>} : vector<8x32xf32>, vector<32x64xf32>, vector<8x64xf32> -> vector<8x64xf32>
    %c3_119 = arith.constant 3 : index
    %c0_120 = arith.constant 0 : index
    %c0_121 = arith.constant 0 : index
    %117 = vector.load %arg8[%c3_119, %c0_120, %c0_121] : memref<9x64x128xf32, #tpu.memory_space<vmem>>, vector<1x64x128xf32>
    %118 = vector.shape_cast %117 : vector<1x64x128xf32> to vector<64x128xf32>
    %cst_122 = arith.constant dense<0.000000e+00> : vector<8x128xf32>
    %119 = tpu.matmul %116, %118, %cst_122 {dimension_numbers = #tpu.dot_dimension_numbers<[1], [0], [0], [1], [0, 0, 1, 1], [], []>} : vector<8x64xf32>, vector<64x128xf32>, vector<8x128xf32> -> vector<8x128xf32>
    %120 = arith.addf %113, %119 : vector<8x128xf32>
    %c4_123 = arith.constant 4 : index
    %c0_124 = arith.constant 0 : index
    %c0_125 = arith.constant 0 : index
    %121 = vector.load %arg7[%c4_123, %c0_124, %c0_125] : memref<9x8x32xf32, #tpu.memory_space<vmem>>, vector<1x8x32xf32>
    %122 = vector.shape_cast %121 : vector<1x8x32xf32> to vector<8x32xf32>
    %cst_126 = arith.constant dense<0.000000e+00> : vector<8x64xf32>
    %123 = tpu.matmul %122, %91, %cst_126 {dimension_numbers = #tpu.dot_dimension_numbers<[1], [0], [0], [1], [0, 0, 1, 1], [], []>} : vector<8x32xf32>, vector<32x64xf32>, vector<8x64xf32> -> vector<8x64xf32>
    %c4_127 = arith.constant 4 : index
    %c0_128 = arith.constant 0 : index
    %c0_129 = arith.constant 0 : index
    %124 = vector.load %arg8[%c4_127, %c0_128, %c0_129] : memref<9x64x128xf32, #tpu.memory_space<vmem>>, vector<1x64x128xf32>
    %125 = vector.shape_cast %124 : vector<1x64x128xf32> to vector<64x128xf32>
    %cst_130 = arith.constant dense<0.000000e+00> : vector<8x128xf32>
    %126 = tpu.matmul %123, %125, %cst_130 {dimension_numbers = #tpu.dot_dimension_numbers<[1], [0], [0], [1], [0, 0, 1, 1], [], []>} : vector<8x64xf32>, vector<64x128xf32>, vector<8x128xf32> -> vector<8x128xf32>
    %127 = arith.addf %120, %126 : vector<8x128xf32>
    %c5_131 = arith.constant 5 : index
    %c0_132 = arith.constant 0 : index
    %c0_133 = arith.constant 0 : index
    %128 = vector.load %arg7[%c5_131, %c0_132, %c0_133] : memref<9x8x32xf32, #tpu.memory_space<vmem>>, vector<1x8x32xf32>
    %129 = vector.shape_cast %128 : vector<1x8x32xf32> to vector<8x32xf32>
    %cst_134 = arith.constant dense<0.000000e+00> : vector<8x64xf32>
    %130 = tpu.matmul %129, %91, %cst_134 {dimension_numbers = #tpu.dot_dimension_numbers<[1], [0], [0], [1], [0, 0, 1, 1], [], []>} : vector<8x32xf32>, vector<32x64xf32>, vector<8x64xf32> -> vector<8x64xf32>
    %c5_135 = arith.constant 5 : index
    %c0_136 = arith.constant 0 : index
    %c0_137 = arith.constant 0 : index
    %131 = vector.load %arg8[%c5_135, %c0_136, %c0_137] : memref<9x64x128xf32, #tpu.memory_space<vmem>>, vector<1x64x128xf32>
    %132 = vector.shape_cast %131 : vector<1x64x128xf32> to vector<64x128xf32>
    %cst_138 = arith.constant dense<0.000000e+00> : vector<8x128xf32>
    %133 = tpu.matmul %130, %132, %cst_138 {dimension_numbers = #tpu.dot_dimension_numbers<[1], [0], [0], [1], [0, 0, 1, 1], [], []>} : vector<8x64xf32>, vector<64x128xf32>, vector<8x128xf32> -> vector<8x128xf32>
    %134 = arith.addf %127, %133 : vector<8x128xf32>
    %c6_139 = arith.constant 6 : index
    %c0_140 = arith.constant 0 : index
    %c0_141 = arith.constant 0 : index
    %135 = vector.load %arg7[%c6_139, %c0_140, %c0_141] : memref<9x8x32xf32, #tpu.memory_space<vmem>>, vector<1x8x32xf32>
    %136 = vector.shape_cast %135 : vector<1x8x32xf32> to vector<8x32xf32>
    %cst_142 = arith.constant dense<0.000000e+00> : vector<8x64xf32>
    %137 = tpu.matmul %136, %91, %cst_142 {dimension_numbers = #tpu.dot_dimension_numbers<[1], [0], [0], [1], [0, 0, 1, 1], [], []>} : vector<8x32xf32>, vector<32x64xf32>, vector<8x64xf32> -> vector<8x64xf32>
    %c6_143 = arith.constant 6 : index
    %c0_144 = arith.constant 0 : index
    %c0_145 = arith.constant 0 : index
    %138 = vector.load %arg8[%c6_143, %c0_144, %c0_145] : memref<9x64x128xf32, #tpu.memory_space<vmem>>, vector<1x64x128xf32>
    %139 = vector.shape_cast %138 : vector<1x64x128xf32> to vector<64x128xf32>
    %cst_146 = arith.constant dense<0.000000e+00> : vector<8x128xf32>
    %140 = tpu.matmul %137, %139, %cst_146 {dimension_numbers = #tpu.dot_dimension_numbers<[1], [0], [0], [1], [0, 0, 1, 1], [], []>} : vector<8x64xf32>, vector<64x128xf32>, vector<8x128xf32> -> vector<8x128xf32>
    %141 = arith.addf %134, %140 : vector<8x128xf32>
    %c7_147 = arith.constant 7 : index
    %c0_148 = arith.constant 0 : index
    %c0_149 = arith.constant 0 : index
    %142 = vector.load %arg7[%c7_147, %c0_148, %c0_149] : memref<9x8x32xf32, #tpu.memory_space<vmem>>, vector<1x8x32xf32>
    %143 = vector.shape_cast %142 : vector<1x8x32xf32> to vector<8x32xf32>
    %cst_150 = arith.constant dense<0.000000e+00> : vector<8x64xf32>
    %144 = tpu.matmul %143, %91, %cst_150 {dimension_numbers = #tpu.dot_dimension_numbers<[1], [0], [0], [1], [0, 0, 1, 1], [], []>} : vector<8x32xf32>, vector<32x64xf32>, vector<8x64xf32> -> vector<8x64xf32>
    %c7_151 = arith.constant 7 : index
    %c0_152 = arith.constant 0 : index
    %c0_153 = arith.constant 0 : index
    %145 = vector.load %arg8[%c7_151, %c0_152, %c0_153] : memref<9x64x128xf32, #tpu.memory_space<vmem>>, vector<1x64x128xf32>
    %146 = vector.shape_cast %145 : vector<1x64x128xf32> to vector<64x128xf32>
    %cst_154 = arith.constant dense<0.000000e+00> : vector<8x128xf32>
    %147 = tpu.matmul %144, %146, %cst_154 {dimension_numbers = #tpu.dot_dimension_numbers<[1], [0], [0], [1], [0, 0, 1, 1], [], []>} : vector<8x64xf32>, vector<64x128xf32>, vector<8x128xf32> -> vector<8x128xf32>
    %148 = arith.addf %141, %147 : vector<8x128xf32>
    %c8_155 = arith.constant 8 : index
    %c0_156 = arith.constant 0 : index
    %c0_157 = arith.constant 0 : index
    %149 = vector.load %arg7[%c8_155, %c0_156, %c0_157] : memref<9x8x32xf32, #tpu.memory_space<vmem>>, vector<1x8x32xf32>
    %150 = vector.shape_cast %149 : vector<1x8x32xf32> to vector<8x32xf32>
    %cst_158 = arith.constant dense<0.000000e+00> : vector<8x64xf32>
    %151 = tpu.matmul %150, %91, %cst_158 {dimension_numbers = #tpu.dot_dimension_numbers<[1], [0], [0], [1], [0, 0, 1, 1], [], []>} : vector<8x32xf32>, vector<32x64xf32>, vector<8x64xf32> -> vector<8x64xf32>
    %c8_159 = arith.constant 8 : index
    %c0_160 = arith.constant 0 : index
    %c0_161 = arith.constant 0 : index
    %152 = vector.load %arg8[%c8_159, %c0_160, %c0_161] : memref<9x64x128xf32, #tpu.memory_space<vmem>>, vector<1x64x128xf32>
    %153 = vector.shape_cast %152 : vector<1x64x128xf32> to vector<64x128xf32>
    %cst_162 = arith.constant dense<0.000000e+00> : vector<8x128xf32>
    %154 = tpu.matmul %151, %153, %cst_162 {dimension_numbers = #tpu.dot_dimension_numbers<[1], [0], [0], [1], [0, 0, 1, 1], [], []>} : vector<8x64xf32>, vector<64x128xf32>, vector<8x128xf32> -> vector<8x128xf32>
    %155 = arith.addf %148, %154 : vector<8x128xf32>
    %c0_163 = arith.constant 0 : index
    %c0_164 = arith.constant 0 : index
    %156 = vector.load %arg9[%c0_163, %c0_164] : memref<1x128xf32, #tpu.memory_space<vmem>>, vector<1x128xf32>
    %157 = vector.broadcast %156 : vector<1x128xf32> to vector<8x128xf32>
    %158 = arith.addf %155, %157 : vector<8x128xf32>
    %cst_165 = arith.constant 0.000000e+00 : f32
    %159 = vector.broadcast %cst_165 : f32 to vector<8x128xf32>
    %160 = arith.maximumf %158, %159 : vector<8x128xf32>
    %c0_166 = arith.constant 0 : index
    %c0_167 = arith.constant 0 : index
    %c0_168 = arith.constant 0 : index
    %161 = vector.load %arg10[%c0_166, %c0_167, %c0_168] : memref<4x2x8xf32, #tpu.memory_space<vmem>>, vector<1x2x8xf32>
    %162 = vector.shape_cast %161 : vector<1x2x8xf32> to vector<2x8xf32>
    %cst_169 = arith.constant dense<0.000000e+00> : vector<2x128xf32>
    %163 = tpu.matmul %162, %160, %cst_169 {dimension_numbers = #tpu.dot_dimension_numbers<[1], [0], [0], [1], [0, 0, 1, 1], [], []>} : vector<2x8xf32>, vector<8x128xf32>, vector<2x128xf32> -> vector<2x128xf32>
    %c1_170 = arith.constant 1 : index
    %c0_171 = arith.constant 0 : index
    %c0_172 = arith.constant 0 : index
    %164 = vector.load %arg10[%c1_170, %c0_171, %c0_172] : memref<4x2x8xf32, #tpu.memory_space<vmem>>, vector<1x2x8xf32>
    %165 = vector.shape_cast %164 : vector<1x2x8xf32> to vector<2x8xf32>
    %cst_173 = arith.constant dense<0.000000e+00> : vector<2x128xf32>
    %166 = tpu.matmul %165, %160, %cst_173 {dimension_numbers = #tpu.dot_dimension_numbers<[1], [0], [0], [1], [0, 0, 1, 1], [], []>} : vector<2x8xf32>, vector<8x128xf32>, vector<2x128xf32> -> vector<2x128xf32>
    %167 = arith.maximumf %163, %166 : vector<2x128xf32>
    %c2_174 = arith.constant 2 : index
    %c0_175 = arith.constant 0 : index
    %c0_176 = arith.constant 0 : index
    %168 = vector.load %arg10[%c2_174, %c0_175, %c0_176] : memref<4x2x8xf32, #tpu.memory_space<vmem>>, vector<1x2x8xf32>
    %169 = vector.shape_cast %168 : vector<1x2x8xf32> to vector<2x8xf32>
    %cst_177 = arith.constant dense<0.000000e+00> : vector<2x128xf32>
    %170 = tpu.matmul %169, %160, %cst_177 {dimension_numbers = #tpu.dot_dimension_numbers<[1], [0], [0], [1], [0, 0, 1, 1], [], []>} : vector<2x8xf32>, vector<8x128xf32>, vector<2x128xf32> -> vector<2x128xf32>
    %171 = arith.maximumf %167, %170 : vector<2x128xf32>
    %c3_178 = arith.constant 3 : index
    %c0_179 = arith.constant 0 : index
    %c0_180 = arith.constant 0 : index
    %172 = vector.load %arg10[%c3_178, %c0_179, %c0_180] : memref<4x2x8xf32, #tpu.memory_space<vmem>>, vector<1x2x8xf32>
    %173 = vector.shape_cast %172 : vector<1x2x8xf32> to vector<2x8xf32>
    %cst_181 = arith.constant dense<0.000000e+00> : vector<2x128xf32>
    %174 = tpu.matmul %173, %160, %cst_181 {dimension_numbers = #tpu.dot_dimension_numbers<[1], [0], [0], [1], [0, 0, 1, 1], [], []>} : vector<2x8xf32>, vector<8x128xf32>, vector<2x128xf32> -> vector<2x128xf32>
    %175 = arith.maximumf %171, %174 : vector<2x128xf32>
    %c0_182 = arith.constant 0 : index
    %c0_183 = arith.constant 0 : index
    %176 = vector.load %arg11[%c0_182, %c0_183] : memref<128x128xf32, #tpu.memory_space<vmem>>, vector<128x128xf32>
    %cst_184 = arith.constant dense<0.000000e+00> : vector<2x128xf32>
    %177 = tpu.matmul %175, %176, %cst_184 {dimension_numbers = #tpu.dot_dimension_numbers<[1], [0], [0], [1], [0, 0, 1, 1], [], []>} : vector<2x128xf32>, vector<128x128xf32>, vector<2x128xf32> -> vector<2x128xf32>
    %c0_185 = arith.constant 0 : index
    %c0_186 = arith.constant 0 : index
    %178 = vector.load %arg12[%c0_185, %c0_186] : memref<1x128xf32, #tpu.memory_space<vmem>>, vector<1x128xf32>
    %179 = vector.broadcast %178 : vector<1x128xf32> to vector<2x128xf32>
    %180 = arith.addf %177, %179 : vector<2x128xf32>
    %c0_187 = arith.constant 0 : index
    %c0_188 = arith.constant 0 : index
    %181 = vector.load %arg13[%c0_187, %c0_188] : memref<2x128xf32, #tpu.memory_space<vmem>>, vector<2x128xf32>
    tpu.vector_store %arg13[%c0_187, %c0_188], %180 {strides = array<i32>} : memref<2x128xf32, #tpu.memory_space<vmem>>, vector<2x128xf32>,
    return
  }
}

</mosaic_0001>

<bundles_post_ra>
// kernel: forward.1
= control target key start
LH: loop header
LB: loop body
LE: loop exit
PB: predicated region body
PF: predicated region fallthrough
CT: control target
= control target key end

     0   :  { %v9331_v3 = vmov 0.0|0.0   ;;  %s12062_s0 = inlined_call_operand.vmem [shape: f32[200,256], index: 0, kind: input, shape index: {}]   ;;  %s12063_s1 = inlined_call_operand.vmem [shape: f32[256,32], index: 1, kind: input, shape index: {}]   ;;  %s12064_s2 = inlined_call_operand.vmem [shape: f32[1,32], index: 2, kind: input, shape index: {}]   ;;  %s12065_s3 = inlined_call_operand.vmem [shape: f32[9,128,200], index: 3, kind: input, shape index: {}]   ;;  %s12066_s4 = inlined_call_operand.vmem [shape: f32[9,32,64], index: 4, kind: input, shape index: {}]   ;;  %s12067_s5 = inlined_call_operand.vmem [shape: f32[1,64], index: 5, kind: input, shape index: {}]   ;;  %s12068_s6 = inlined_call_operand.vmem [shape: f32[4,32,128], index: 6, kind: input, shape index: {}]   ;;  %s12069_s7 = inlined_call_operand.vmem [shape: f32[9,8,32], index: 7, kind: input, shape index: {}]   ;;  %s12070_s8 = inlined_call_operand.vmem [shape: f32[9,64,128], index: 8, kind: input, shape index: {}]   ;;  %s12071_s9 = inlined_call_operand.vmem [shape: f32[1,128], index: 9, kind: input, shape index: {}]   ;;  %s12072_s10 = inlined_call_operand.vmem [shape: f32[4,2,8], index: 10, kind: input, shape index: {}]   ;;  %s12073_s11 = inlined_call_operand.vmem [shape: f32[128,128], index: 11, kind: input, shape index: {}]   ;;  %s12074_s12 = inlined_call_operand.vmem [shape: f32[1,128], index: 12, kind: input, shape index: {}]   ;;  %s12075_s13 = inlined_call_operand.hbm [shape: f32[2,128], index: 13, kind: output, shape index: {}]  }
   0x1   :  { %v95_v0 = vld [vmem:[%s12063_s1] sm:$0xff]  ;;  %v96_v1 = vld [vmem:[%s12063_s1 + $0x8] sm:$0xff]  ;;  %v97_v2 = vld [vmem:[%s12063_s1 + $0x10] sm:$0xff]  ;;  %8391 = vmatprep.subr.bf16.mxu0 %v9331_v3  ;;  %9149 = vmatprep.subr.bf16.mxu1 %v9331_v3 }
   0x2   :  { %v8392_v4 = vpack.c.bf16 %v96_v1, %v95_v0  ;;  %v98_v5 = vld [vmem:[%s12063_s1 + $0x18] sm:$0xff]  ;;  %v99_v7 = vld [vmem:[%s12063_s1 + $0x20] sm:$0xff]  ;;  %v100_v8 = vld [vmem:[%s12063_s1 + $0x28] sm:$0xff] }
   0x3   :  { %v8395_v6 = vpack.c.bf16 %v98_v5, %v97_v2  ;;  %v8398_v9 = vpack.c.bf16 %v100_v8, %v99_v7  ;;  %v101_v10 = vld [vmem:[%s12063_s1 + $0x30] sm:$0xff]  ;;  %v102_v11 = vld [vmem:[%s12063_s1 + $0x38] sm:$0xff]  ;;  %v46_v12 = vld [vmem:[%s12062_s0 + $0x8] sm:$0xff] }
   0x4   :  { %8393 = vmatpush1.bf16.msra.mxu0 %v8392_v4  ;;  %v8401_v13 = vpack.c.bf16 %v102_v11, %v101_v10  ;;  %198 = vmatprep.mubr.f32.mxu0 %v46_v12  ;;  %v103_v14 = vld [vmem:[%s12063_s1 + $0x40] sm:$0xff]  ;;  %v104_v15 = vld [vmem:[%s12063_s1 + $0x48] sm:$0xff]  ;;  %v105_v17 = vld [vmem:[%s12063_s1 + $0x50] sm:$0xff] }
   0x5   :  { %8394 = vmatprep.subr.bf16.mxu0 %v9331_v3  ;;  %v8404_v16 = vpack.c.bf16 %v104_v15, %v103_v14  ;;  %v106_v18 = vld [vmem:[%s12063_s1 + $0x58] sm:$0xff]  ;;  %v107_v20 = vld [vmem:[%s12063_s1 + $0x60] sm:$0xff]  ;;  %v108_v21 = vld [vmem:[%s12063_s1 + $0x68] sm:$0xff] }
   0x6   :  { %v8407_v19 = vpack.c.bf16 %v106_v18, %v105_v17  ;;  %v8410_v22 = vpack.c.bf16 %v108_v21, %v107_v20  ;;  %v109_v23 = vld [vmem:[%s12063_s1 + $0x70] sm:$0xff]  ;;  %v110_v24 = vld [vmem:[%s12063_s1 + $0x78] sm:$0xff] }
   0x8   :  { %8396 = vmatpush1.bf16.msra.mxu0 %v8395_v6 }
   0x9   :  { %8397 = vmatprep.subr.bf16.mxu0 %v9331_v3 }
   0xc   :  { %8399 = vmatpush1.bf16.msra.mxu0 %v8398_v9 }
   0xd   :  { %8400 = vmatprep.subr.bf16.mxu0 %v9331_v3 }
  0x10   :  { %8402 = vmatpush1.bf16.msra.mxu0 %v8401_v13 }
  0x11   :  { %8403 = vmatprep.subr.bf16.mxu0 %v9331_v3 }
  0x14   :  { %8405 = vmatpush1.bf16.msra.mxu0 %v8404_v16 }
  0x15   :  { %8406 = vmatprep.subr.bf16.mxu0 %v9331_v3 }
  0x18   :  { %8408 = vmatpush1.bf16.msra.mxu0 %v8407_v19 }
  0x19   :  { %8409 = vmatprep.subr.bf16.mxu0 %v9331_v3 }
  0x1a   :  { %18 = vsyncpa [#allocation3], 0  ;;  %v8413_v25 = vpack.c.bf16 %v110_v24, %v109_v23  ;;  %v111_v26 = vld [vmem:[%s12063_s1 + $0x80] sm:$0xff]  ;;  %v112_v27 = vld [vmem:[%s12063_s1 + $0x88] sm:$0xff]  ;;  %vm381_vm0 = vcmask 588800   ;;  %vm810_vm1 = vcmask 261120  }
  0x1b   :  { %v8416_v28 = vpack.c.bf16 %v112_v27, %v111_v26  ;;  %v113_v29 = vld [vmem:[%s12063_s1 + $0x90] sm:$0xff]  ;;  %v114_v30 = vld [vmem:[%s12063_s1 + $0x98] sm:$0xff]  ;;  %v115_v32 = vld [vmem:[%s12063_s1 + $0xa0] sm:$0xff]  ;;  %vm9333_vm2 = vmmov 0   ;;  %vm4853_vm3 = vcmask 523264   ;;  %vm6116_vm4 = vcmask 64512  }
  0x1c   :  { %8411 = vmatpush1.bf16.msra.mxu0 %v8410_v22  ;;  %v8419_v31 = vpack.c.bf16 %v114_v30, %v113_v29  ;;  %v116_v33 = vld [vmem:[%s12063_s1 + $0xa8] sm:$0xff]  ;;  %v117_v35 = vld [vmem:[%s12063_s1 + $0xb0] sm:$0xff]  ;;  %v118_v36 = vld [vmem:[%s12063_s1 + $0xb8] sm:$0xff]  ;;  %s9334_s15 = smov [#allocation2]  }
  0x1d   :  { %8412 = vmatprep.subr.bf16.mxu0 %v9331_v3  ;;  %v8422_v34 = vpack.c.bf16 %v116_v33, %v115_v32  ;;  %v8425_v37 = vpack.c.bf16 %v118_v36, %v117_v35  ;;  %v119_v38 = vld [vmem:[%s12063_s1 + $0xc0] sm:$0xff]  ;;  %v120_v39 = vld [vmem:[%s12063_s1 + $0xc8] sm:$0xff]  ;;  %v121_v41 = vld [vmem:[%s12063_s1 + $0xd0] sm:$0xff] }
  0x1e   :  { %v8428_v40 = vpack.c.bf16 %v120_v39, %v119_v38  ;;  %v122_v42 = vld [vmem:[%s12063_s1 + $0xd8] sm:$0xff]  ;;  %v123_v44 = vld [vmem:[%s12063_s1 + $0xe0] sm:$0xff]  ;;  %v124_v45 = vld [vmem:[%s12063_s1 + $0xe8] sm:$0xff] }
  0x1f   :  { %v8431_v43 = vpack.c.bf16 %v122_v42, %v121_v41  ;;  %v8434_v46 = vpack.c.bf16 %v124_v45, %v123_v44  ;;  %v125_v47 = vld [vmem:[%s12063_s1 + $0xf0] sm:$0xff]  ;;  %v126_v48 = vld [vmem:[%s12063_s1 + $0xf8] sm:$0xff]  ;;  %v45_v50 = vld [vmem:[%s12062_s0] sm:$0xff] }
  0x20   :  { %8414 = vmatpush1.bf16.msra.mxu0 %v8413_v25  ;;  %v8437_v49 = vpack.c.bf16 %v126_v48, %v125_v47  ;;  %v48_v51 = vld [vmem:[%s12062_s0 + $0x18] sm:$0xff]  ;;  %v47_v52 = vld [vmem:[%s12062_s0 + $0x10] sm:$0xff]  ;;  %v50_v53 = vld [vmem:[%s12062_s0 + $0x28] sm:$0xff] }
  0x21   :  { %8415 = vmatprep.subr.bf16.mxu0 %v9331_v3  ;;  %v49_v54 = vld [vmem:[%s12062_s0 + $0x20] sm:$0xff]  ;;  %v52_v55 = vld [vmem:[%s12062_s0 + $0x38] sm:$0xff]  ;;  %v51_v56 = vld [vmem:[%s12062_s0 + $0x30] sm:$0xff] }
  0x22   :  { %v54_v57 = vld [vmem:[%s12062_s0 + $0x48] sm:$0xff]  ;;  %v53_v58 = vld [vmem:[%s12062_s0 + $0x40] sm:$0xff]  ;;  %v56_v59 = vld [vmem:[%s12062_s0 + $0x58] sm:$0xff] }
  0x23   :  { %v55_v60 = vld [vmem:[%s12062_s0 + $0x50] sm:$0xff]  ;;  %v58_v61 = vld [vmem:[%s12062_s0 + $0x68] sm:$0xff]  ;;  %v57_v62 = vld [vmem:[%s12062_s0 + $0x60] sm:$0xff] }
  0x24   :  { %8417 = vmatpush1.bf16.msra.mxu0 %v8416_v28  ;;  %v60_v63 = vld [vmem:[%s12062_s0 + $0x78] sm:$0xff]  ;;  %v59_v0 = vld [vmem:[%s12062_s0 + $0x70] sm:$0xff]  ;;  %v62_v1 = vld [vmem:[%s12062_s0 + $0x88] sm:$0xff] }
  0x25   :  { %8418 = vmatprep.subr.bf16.mxu0 %v9331_v3  ;;  %v61_v2 = vld [vmem:[%s12062_s0 + $0x80] sm:$0xff]  ;;  %v64_v4 = vld [vmem:[%s12062_s0 + $0x98] sm:$0xff]  ;;  %v63_v5 = vld [vmem:[%s12062_s0 + $0x90] sm:$0xff] }
  0x26   :  { %v66_v6 = vld [vmem:[%s12062_s0 + $0xa8] sm:$0xff]  ;;  %v65_v7 = vld [vmem:[%s12062_s0 + $0xa0] sm:$0xff]  ;;  %v68_v8 = vld [vmem:[%s12062_s0 + $0xb8] sm:$0xff] }
  0x27   :  { %v67_v9 = vld [vmem:[%s12062_s0 + $0xb0] sm:$0xff]  ;;  %v70_v10 = vld [vmem:[%s12062_s0 + $0xc8] sm:$0xff]  ;;  %v69_v11 = vld [vmem:[%s12062_s0 + $0xc0] sm:$0xff] }
  0x28   :  { %8420 = vmatpush1.bf16.msra.mxu0 %v8419_v31  ;;  %v72_v12 = vld [vmem:[%s12062_s0 + $0xd8] sm:$0xff]  ;;  %v71_v13 = vld [vmem:[%s12062_s0 + $0xd0] sm:$0xff]  ;;  %v74_v14 = vld [vmem:[%s12062_s0 + $0xe8] sm:$0xff] }
  0x29   :  { %8421 = vmatprep.subr.bf16.mxu0 %v9331_v3  ;;  %v73_v15 = vld [vmem:[%s12062_s0 + $0xe0] sm:$0xff]  ;;  %v76_v16 = vld [vmem:[%s12062_s0 + $0xf8] sm:$0xff]  ;;  %v75_v17 = vld [vmem:[%s12062_s0 + $0xf0] sm:$0xff] }
  0x2a   :  { %v78_v18 = vld [vmem:[%s12062_s0 + $0x108] sm:$0xff]  ;;  %v77_v19 = vld [vmem:[%s12062_s0 + $0x100] sm:$0xff]  ;;  %v80_v20 = vld [vmem:[%s12062_s0 + $0x118] sm:$0xff] }
  0x2b   :  { %v79_v21 = vld [vmem:[%s12062_s0 + $0x110] sm:$0xff]  ;;  %v82_v22 = vld [vmem:[%s12062_s0 + $0x128] sm:$0xff]  ;;  %v81_v23 = vld [vmem:[%s12062_s0 + $0x120] sm:$0xff] }
  0x2c   :  { %8423 = vmatpush1.bf16.msra.mxu0 %v8422_v34  ;;  %v84_v24 = vld [vmem:[%s12062_s0 + $0x138] sm:$0xff]  ;;  %v83_v25 = vld [vmem:[%s12062_s0 + $0x130] sm:$0xff]  ;;  %v86_v26 = vld [vmem:[%s12062_s0 + $0x148] sm:$0xff] }
  0x2d   :  { %8424 = vmatprep.subr.bf16.mxu0 %v9331_v3  ;;  %v85_v27 = vld [vmem:[%s12062_s0 + $0x140] sm:$0xff]  ;;  %v88_v28 = vld [vmem:[%s12062_s0 + $0x158] sm:$0xff]  ;;  %v87_v29 = vld [vmem:[%s12062_s0 + $0x150] sm:$0xff] }
  0x2e   :  { %v90_v30 = vld [vmem:[%s12062_s0 + $0x168] sm:$0xff]  ;;  %v89_v31 = vld [vmem:[%s12062_s0 + $0x160] sm:$0xff]  ;;  %v92_v32 = vld [vmem:[%s12062_s0 + $0x178] sm:$0xff] }
  0x2f   :  { %v91_v33 = vld [vmem:[%s12062_s0 + $0x170] sm:$0xff]  ;;  %v94_v34 = vld [vmem:[%s12062_s0 + $0x188] sm:$0xff]  ;;  %v93_v35 = vld [vmem:[%s12062_s0 + $0x180] sm:$0xff] }
  0x30   :  { %8426 = vmatpush1.bf16.msra.mxu0 %v8425_v37  ;;  %v356_v36 = vld [vmem:[%s12065_s3 + $0x38] sm:$0xff]  ;;  %v9676_v37 = vld [vmem:[%s12064_s2] ss:$0 sm:$0xff] }
  0x31   :  { %8427 = vmatprep.subr.bf16.mxu0 %v9331_v3  ;;  %6530 = vmatprep.mubr.msk.f32.mxu1 %vm381_vm0, %v356_v36 }
  0x34   :  { %8429 = vmatpush1.bf16.msra.mxu0 %v8428_v40 }
  0x35   :  { %8430 = vmatprep.subr.bf16.mxu0 %v9331_v3 }
  0x38   :  { %8432 = vmatpush1.bf16.msra.mxu0 %v8431_v43 }
  0x39   :  { %8433 = vmatprep.subr.bf16.mxu0 %v9331_v3 }
  0x3c   :  { %8435 = vmatpush1.bf16.msra.mxu0 %v8434_v46 }
  0x3d   :  { %8436 = vmatprep.subr.bf16.mxu0 %v9331_v3 }
  0x40   :  { %8438 = vmatpush1.bf16.msra.mxu0 %v8437_v49 }
  0x41   :  { %8439 = vmatprep.subr.bf16.mxu0 %v9331_v3 }
  0x43   :  { %199 = vmatmul.mubr.f32.vlgmr.msra.gmra.mrb[0].mxu0 %v45_v50 }
  0x44   :  { %203 = vmatprep.mubr.f32.mxu0 %v48_v51 }
  0x47   :  { %204 = vmatmul.mubr.f32.gmra.mrb[2].mxu0 %v47_v52 }
  0x48   :  { %208 = vmatprep.mubr.f32.mxu0 %v50_v53 }
  0x4b   :  { %209 = vmatmul.mubr.f32.gmra.mrb[4].mxu0 %v49_v54 }
  0x4c   :  { %213 = vmatprep.mubr.f32.mxu0 %v52_v55 }
  0x4f   :  { %214 = vmatmul.mubr.f32.gmra.mrb[6].mxu0 %v51_v56 }
  0x50   :  { %218 = vmatprep.mubr.f32.mxu0 %v54_v57 }
  0x53   :  { %219 = vmatmul.mubr.f32.gmra.mrb[8].mxu0 %v53_v58 }
  0x54   :  { %223 = vmatprep.mubr.f32.mxu0 %v56_v59 }
  0x57   :  { %224 = vmatmul.mubr.f32.gmra.mrb[10].mxu0 %v55_v60 }
  0x58   :  { %228 = vmatprep.mubr.f32.mxu0 %v58_v61 }
  0x5b   :  { %229 = vmatmul.mubr.f32.gmra.mrb[12].mxu0 %v57_v62 }
  0x5c   :  { %233 = vmatprep.mubr.f32.mxu0 %v60_v63 }
  0x5f   :  { %234 = vmatmul.mubr.f32.gmra.mrb[14].mxu0 %v59_v0 }
  0x60   :  { %238 = vmatprep.mubr.f32.mxu0 %v62_v1 }
  0x63   :  { %239 = vmatmul.mubr.f32.gmra.mrb[16].mxu0 %v61_v2 }
  0x64   :  { %243 = vmatprep.mubr.f32.mxu0 %v64_v4 }
  0x67   :  { %244 = vmatmul.mubr.f32.gmra.mrb[18].mxu0 %v63_v5 }
  0x68   :  { %248 = vmatprep.mubr.f32.mxu0 %v66_v6 }
  0x6b   :  { %249 = vmatmul.mubr.f32.gmra.mrb[20].mxu0 %v65_v7 }
  0x6c   :  { %253 = vmatprep.mubr.f32.mxu0 %v68_v8 }
  0x6f   :  { %254 = vmatmul.mubr.f32.gmra.mrb[22].mxu0 %v67_v9 }
  0x70   :  { %258 = vmatprep.mubr.f32.mxu0 %v70_v10 }
  0x73   :  { %259 = vmatmul.mubr.f32.gmra.mrb[24].mxu0 %v69_v11 }
  0x74   :  { %263 = vmatprep.mubr.f32.mxu0 %v72_v12 }
  0x77   :  { %264 = vmatmul.mubr.f32.gmra.mrb[26].mxu0 %v71_v13 }
  0x78   :  { %268 = vmatprep.mubr.f32.mxu0 %v74_v14 }
  0x7b   :  { %269 = vmatmul.mubr.f32.gmra.mrb[28].mxu0 %v73_v15 }
  0x7c   :  { %273 = vmatprep.mubr.f32.mxu0 %v76_v16 }
  0x7f   :  { %274 = vmatmul.mubr.f32.gmra.mrb[30].mxu0 %v75_v17 }
  0x80   :  { %278 = vmatprep.mubr.f32.mxu0 %v78_v18 }
  0x83   :  { %279 = vmatmul.mubr.f32.gmra.mrb[32].mxu0 %v77_v19 }
  0x84   :  { %283 = vmatprep.mubr.f32.mxu0 %v80_v20 }
  0x87   :  { %284 = vmatmul.mubr.f32.gmra.mrb[34].mxu0 %v79_v21 }
  0x88   :  { %288 = vmatprep.mubr.f32.mxu0 %v82_v22 }
  0x8b   :  { %289 = vmatmul.mubr.f32.gmra.mrb[36].mxu0 %v81_v23 }
  0x8c   :  { %293 = vmatprep.mubr.f32.mxu0 %v84_v24 }
  0x8f   :  { %294 = vmatmul.mubr.f32.gmra.mrb[38].mxu0 %v83_v25 }
  0x90   :  { %298 = vmatprep.mubr.f32.mxu0 %v86_v26 }
  0x93   :  { %299 = vmatmul.mubr.f32.gmra.mrb[40].mxu0 %v85_v27 }
  0x94   :  { %303 = vmatprep.mubr.f32.mxu0 %v88_v28 }
  0x97   :  { %304 = vmatmul.mubr.f32.gmra.mrb[42].mxu0 %v87_v29 }
  0x98   :  { %308 = vmatprep.mubr.f32.mxu0 %v90_v30 }
  0x9b   :  { %309 = vmatmul.mubr.f32.gmra.mrb[44].mxu0 %v89_v31 }
  0x9c   :  { %313 = vmatprep.mubr.f32.mxu0 %v92_v32 }
  0x9f   :  { %314 = vmatmul.mubr.f32.gmra.mrb[46].mxu0 %v91_v33 }
  0xa0   :  { %318 = vmatprep.mubr.f32.mxu0 %v94_v34 }
  0xa3   :  { %319 = vmatmul.mubr.f32.gmra.mrb[48].mxu0 %v93_v35 }
 0x116   :  { %v200_v38 = vpop.f32.mrb[0].mxu0 }
 0x117   :  { %v202_v39 = vpop.f32.mrb[1].mxu0  ;;  %v201_v40 = vadd.f32 %v9676_v37, %v200_v38 }
 0x119   :  { %v324_v44 = vmax.f32 %v201_v40, 0.0 }
 0x11a   :  { %v205_v41 = vpop.f32.mrb[2].mxu0 }
 0x11b   :  { %v206_v42 = vadd.f32 %v9676_v37, %v205_v41  ;;  %v207_v43 = vpop.f32.mrb[3].mxu0 }
 0x11d   :  { %v325_v45 = vmax.f32 %v206_v42, 0.0 }
 0x11e   :  { %v210_v46 = vpop.f32.mrb[4].mxu0 }
 0x11f   :  { %v9680_v47 = vpack.c.bf16 %v325_v45, %v324_v44  ;;  %v212_v48 = vpop.f32.mrb[5].mxu0  ;;  %v211_v49 = vadd.f32 %v9676_v37, %v210_v46 }
 0x121   :  { %8441 = vmatpush1.bf16.msra.mxu0 %v9680_v47  ;;  %9162 = vmatpush1.bf16.msra.mxu1 %v9680_v47  ;;  %v326_v53 = vmax.f32 %v211_v49, 0.0 }
 0x122   :  { %v215_v50 = vpop.f32.mrb[6].mxu0  ;;  %8442 = vmatprep.subr.bf16.mxu0 %v9331_v3  ;;  %9150 = vmatprep.subr.bf16.mxu1 %v9331_v3 }
 0x123   :  { %v216_v51 = vadd.f32 %v9676_v37, %v215_v50  ;;  %v217_v52 = vpop.f32.mrb[7].mxu0 }
 0x125   :  { %v327_v54 = vmax.f32 %v216_v51, 0.0 }
 0x126   :  { %v220_v55 = vpop.f32.mrb[8].mxu0 }
 0x127   :  { %v9688_v56 = vpack.c.bf16 %v327_v54, %v326_v53  ;;  %v222_v57 = vpop.f32.mrb[9].mxu0  ;;  %v221_v58 = vadd.f32 %v9676_v37, %v220_v55 }
 0x129   :  { %8444 = vmatpush1.bf16.msra.mxu0 %v9688_v56  ;;  %9163 = vmatpush1.bf16.msra.mxu1 %v9688_v56  ;;  %v328_v62 = vmax.f32 %v221_v58, 0.0 }
 0x12a   :  { %v225_v59 = vpop.f32.mrb[10].mxu0  ;;  %8445 = vmatprep.subr.bf16.mxu0 %v9331_v3  ;;  %9151 = vmatprep.subr.bf16.mxu1 %v9331_v3 }
 0x12b   :  { %v226_v60 = vadd.f32 %v9676_v37, %v225_v59  ;;  %v227_v61 = vpop.f32.mrb[11].mxu0 }
 0x12d   :  { %v329_v63 = vmax.f32 %v226_v60, 0.0 }
 0x12e   :  { %v230_v0 = vpop.f32.mrb[12].mxu0 }
 0x12f   :  { %v9696_v1 = vpack.c.bf16 %v329_v63, %v328_v62  ;;  %v232_v2 = vpop.f32.mrb[13].mxu0  ;;  %v231_v4 = vadd.f32 %v9676_v37, %v230_v0 }
 0x131   :  { %8447 = vmatpush1.bf16.msra.mxu0 %v9696_v1  ;;  %9164 = vmatpush1.bf16.msra.mxu1 %v9696_v1  ;;  %v330_v8 = vmax.f32 %v231_v4, 0.0 }
 0x132   :  { %v235_v5 = vpop.f32.mrb[14].mxu0  ;;  %8448 = vmatprep.subr.bf16.mxu0 %v9331_v3  ;;  %9152 = vmatprep.subr.bf16.mxu1 %v9331_v3 }
 0x133   :  { %v236_v6 = vadd.f32 %v9676_v37, %v235_v5  ;;  %v237_v7 = vpop.f32.mrb[15].mxu0 }
 0x135   :  { %v331_v9 = vmax.f32 %v236_v6, 0.0 }
 0x136   :  { %v240_v10 = vpop.f32.mrb[16].mxu0 }
 0x137   :  { %v9704_v11 = vpack.c.bf16 %v331_v9, %v330_v8  ;;  %v242_v12 = vpop.f32.mrb[17].mxu0  ;;  %v241_v13 = vadd.f32 %v9676_v37, %v240_v10  ;;  %v350_v10 = vld [vmem:[%s12065_s3 + $0x8] sm:$0xff] }
 0x138   :  { %6527 = vmatprep.mubr.msk.f32.mxu0 %vm381_vm0, %v350_v10  ;;  %v6545_v10 = vld [vmem:[%s12065_s3 + $0x110] sm:$0xff] }
 0x139   :  { %8450 = vmatpush1.bf16.msra.mxu0 %v9704_v11  ;;  %9165 = vmatpush1.bf16.msra.mxu1 %v9704_v11  ;;  %v332_v17 = vmax.f32 %v241_v13, 0.0 }
 0x13a   :  { %v245_v14 = vpop.f32.mrb[18].mxu0  ;;  %8451 = vmatprep.subr.bf16.mxu0 %v9331_v3  ;;  %9153 = vmatprep.subr.bf16.mxu1 %v9331_v3 }
 0x13b   :  { %v246_v15 = vadd.f32 %v9676_v37, %v245_v14  ;;  %v247_v16 = vpop.f32.mrb[19].mxu0 }
 0x13d   :  { %v333_v18 = vmax.f32 %v246_v15, 0.0 }
 0x13e   :  { %v250_v19 = vpop.f32.mrb[20].mxu0 }
 0x13f   :  { %v9712_v20 = vpack.c.bf16 %v333_v18, %v332_v17  ;;  %v252_v21 = vpop.f32.mrb[21].mxu0  ;;  %v251_v22 = vadd.f32 %v9676_v37, %v250_v19 }
 0x141   :  { %8453 = vmatpush1.bf16.msra.mxu0 %v9712_v20  ;;  %9166 = vmatpush1.bf16.msra.mxu1 %v9712_v20  ;;  %v334_v26 = vmax.f32 %v251_v22, 0.0 }
 0x142   :  { %v255_v23 = vpop.f32.mrb[22].mxu0  ;;  %8454 = vmatprep.subr.bf16.mxu0 %v9331_v3  ;;  %9154 = vmatprep.subr.bf16.mxu1 %v9331_v3 }
 0x143   :  { %v256_v24 = vadd.f32 %v9676_v37, %v255_v23  ;;  %v257_v25 = vpop.f32.mrb[23].mxu0 }
 0x145   :  { %v335_v27 = vmax.f32 %v256_v24, 0.0 }
 0x146   :  { %v260_v28 = vpop.f32.mrb[24].mxu0 }
 0x147   :  { %v9720_v29 = vpack.c.bf16 %v335_v27, %v334_v26  ;;  %v262_v30 = vpop.f32.mrb[25].mxu0  ;;  %v261_v31 = vadd.f32 %v9676_v37, %v260_v28 }
 0x149   :  { %8456 = vmatpush1.bf16.msra.mxu0 %v9720_v29  ;;  %9167 = vmatpush1.bf16.msra.mxu1 %v9720_v29  ;;  %v336_v35 = vmax.f32 %v261_v31, 0.0 }
 0x14a   :  { %v265_v32 = vpop.f32.mrb[26].mxu0  ;;  %8457 = vmatprep.subr.bf16.mxu0 %v9331_v3  ;;  %9155 = vmatprep.subr.bf16.mxu1 %v9331_v3 }
 0x14b   :  { %v266_v33 = vadd.f32 %v9676_v37, %v265_v32  ;;  %v267_v34 = vpop.f32.mrb[27].mxu0  ;;  %v9332_v32 = vmov 0.0  }
 0x14c   :  { %v349_v34 = vld [vmem:[%s12065_s3] sm:$0xff] }
 0x14d   :  { %v337_v36 = vmax.f32 %v266_v33, 0.0  ;;  %v355_v33 = vld [vmem:[%s12065_s3 + $0x30] sm:$0xff] }
 0x14e   :  { %v270_v38 = vpop.f32.mrb[28].mxu0 }
 0x14f   :  { %v9728_v39 = vpack.c.bf16 %v337_v36, %v336_v35  ;;  %v272_v40 = vpop.f32.mrb[29].mxu0  ;;  %v271_v41 = vadd.f32 %v9676_v37, %v270_v38  ;;  %v352_v35 = vld [vmem:[%s12065_s3 + $0x18] sm:$0xff]  ;;  %v357_v36 = vld [vmem:[%s12065_s3 + $0x40] sm:$0xff] }
 0x150   :  { %v360_v38 = vld [vmem:[%s12065_s3 + $0x58] sm:$0xff]  ;;  %v351_v40 = vld [vmem:[%s12065_s3 + $0x10] sm:$0xff] }
 0x151   :  { %8459 = vmatpush1.bf16.msra.mxu0 %v9728_v39  ;;  %9168 = vmatpush1.bf16.msra.mxu1 %v9728_v39  ;;  %v338_v45 = vmax.f32 %v271_v41, 0.0  ;;  %v354_v41 = vld [vmem:[%s12065_s3 + $0x28] sm:$0xff] }
 0x152   :  { %v275_v42 = vpop.f32.mrb[30].mxu0  ;;  %8460 = vmatprep.subr.bf16.mxu0 %v9331_v3  ;;  %9156 = vmatprep.subr.bf16.mxu1 %v9331_v3 }
 0x153   :  { %v276_v43 = vadd.f32 %v9676_v37, %v275_v42  ;;  %v277_v44 = vpop.f32.mrb[31].mxu0  ;;  %v359_v42 = vld [vmem:[%s12065_s3 + $0x50] sm:$0xff] }
 0x154   :  { %v353_v44 = vld [vmem:[%s12065_s3 + $0x20] sm:$0xff] }
 0x155   :  { %v339_v46 = vmax.f32 %v276_v43, 0.0  ;;  %v362_v43 = vld [vmem:[%s12065_s3 + $0x68] sm:$0xff] }
 0x156   :  { %v280_v48 = vpop.f32.mrb[32].mxu0 }
 0x157   :  { %v9736_v49 = vpack.c.bf16 %v339_v46, %v338_v45  ;;  %v282_v50 = vpop.f32.mrb[33].mxu0  ;;  %v281_v51 = vadd.f32 %v9676_v37, %v280_v48  ;;  %v361_v45 = vld [vmem:[%s12065_s3 + $0x60] sm:$0xff]  ;;  %v364_v46 = vld [vmem:[%s12065_s3 + $0x78] sm:$0xff]  ;;  %v363_v48 = vld [vmem:[%s12065_s3 + $0x70] sm:$0xff] }
 0x158   :  { %v366_v50 = vld [vmem:[%s12065_s3 + $0x88] sm:$0xff] }
 0x159   :  { %8462 = vmatpush1.bf16.msra.mxu0 %v9736_v49  ;;  %9169 = vmatpush1.bf16.msra.mxu1 %v9736_v49  ;;  %v340_v55 = vmax.f32 %v281_v51, 0.0  ;;  %v365_v51 = vld [vmem:[%s12065_s3 + $0x80] sm:$0xff] }
 0x15a   :  { %v285_v52 = vpop.f32.mrb[34].mxu0  ;;  %8463 = vmatprep.subr.bf16.mxu0 %v9331_v3  ;;  %9157 = vmatprep.subr.bf16.mxu1 %v9331_v3 }
 0x15b   :  { %v286_v53 = vadd.f32 %v9676_v37, %v285_v52  ;;  %v287_v54 = vpop.f32.mrb[35].mxu0  ;;  %v368_v52 = vld [vmem:[%s12065_s3 + $0x98] sm:$0xff] }
 0x15c   :  { %v370_v54 = vld [vmem:[%s12065_s3 + $0xa8] sm:$0xff] }
 0x15d   :  { %v341_v57 = vmax.f32 %v286_v53, 0.0  ;;  %v367_v53 = vld [vmem:[%s12065_s3 + $0x90] sm:$0xff] }
 0x15e   :  { %v290_v58 = vpop.f32.mrb[36].mxu0 }
 0x15f   :  { %v9744_v59 = vpack.c.bf16 %v341_v57, %v340_v55  ;;  %v292_v60 = vpop.f32.mrb[37].mxu0  ;;  %v291_v61 = vadd.f32 %v9676_v37, %v290_v58  ;;  %v369_v55 = vld [vmem:[%s12065_s3 + $0xa0] sm:$0xff]  ;;  %v372_v57 = vld [vmem:[%s12065_s3 + $0xb8] sm:$0xff]  ;;  %v371_v58 = vld [vmem:[%s12065_s3 + $0xb0] sm:$0xff] }
 0x160   :  { %v374_v60 = vld [vmem:[%s12065_s3 + $0xc8] sm:$0xff] }
 0x161   :  { %8465 = vmatpush1.bf16.msra.mxu0 %v9744_v59  ;;  %9170 = vmatpush1.bf16.msra.mxu1 %v9744_v59  ;;  %v342_v2 = vmax.f32 %v291_v61, 0.0  ;;  %v373_v61 = vld [vmem:[%s12065_s3 + $0xc0] sm:$0xff] }
 0x162   :  { %v295_v62 = vpop.f32.mrb[38].mxu0  ;;  %8466 = vmatprep.subr.bf16.mxu0 %v9331_v3  ;;  %9158 = vmatprep.subr.bf16.mxu1 %v9331_v3 }
 0x163   :  { %v296_v63 = vadd.f32 %v9676_v37, %v295_v62  ;;  %v297_v0 = vpop.f32.mrb[39].mxu0  ;;  %v376_v62 = vld [vmem:[%s12065_s3 + $0xd8] sm:$0xff] }
 0x164   :  { %v378_v0 = vld [vmem:[%s12065_s3 + $0xe8] sm:$0xff] }
 0x165   :  { %v343_v4 = vmax.f32 %v296_v63, 0.0  ;;  %v375_v63 = vld [vmem:[%s12065_s3 + $0xd0] sm:$0xff] }
 0x166   :  { %v300_v5 = vpop.f32.mrb[40].mxu0 }
 0x167   :  { %v9752_v6 = vpack.c.bf16 %v343_v4, %v342_v2  ;;  %v302_v7 = vpop.f32.mrb[41].mxu0  ;;  %v301_v8 = vadd.f32 %v9676_v37, %v300_v5  ;;  %v377_v2 = vld [vmem:[%s12065_s3 + $0xe0] sm:$0xff]  ;;  %v380_v4 = vld [vmem:[%s12065_s3 + $0xf8] sm:$0xff]  ;;  %v379_v5 = vld [vmem:[%s12065_s3 + $0xf0] sm:$0xff] }
 0x168   :  { %v6544_v7 = vld [vmem:[%s12065_s3 + $0x108] sm:$0xff] }
 0x169   :  { %8468 = vmatpush1.bf16.msra.mxu0 %v9752_v6  ;;  %9171 = vmatpush1.bf16.msra.mxu1 %v9752_v6  ;;  %v344_v14 = vmax.f32 %v301_v8, 0.0  ;;  %v6543_v8 = vld [vmem:[%s12065_s3 + $0x100] sm:$0xff] }
 0x16a   :  { %v305_v9 = vpop.f32.mrb[42].mxu0  ;;  %8469 = vmatprep.subr.bf16.mxu0 %v9331_v3  ;;  %9159 = vmatprep.subr.bf16.mxu1 %v9331_v3 }
 0x16b   :  { %v306_v12 = vadd.f32 %v9676_v37, %v305_v9  ;;  %v307_v13 = vpop.f32.mrb[43].mxu0  ;;  %v6546_v9 = vld [vmem:[%s12065_s3 + $0x118] sm:$0xff] }
 0x16c   :  { %v6547_v13 = vld [vmem:[%s12065_s3 + $0x120] sm:$0xff] }
 0x16d   :  { %v345_v15 = vmax.f32 %v306_v12, 0.0  ;;  %v6548_v12 = vld [vmem:[%s12065_s3 + $0x128] sm:$0xff] }
 0x16e   :  { %v310_v16 = vpop.f32.mrb[44].mxu0 }
 0x16f   :  { %v9764_v17 = vpack.c.bf16 %v345_v15, %v344_v14  ;;  %v312_v18 = vpop.f32.mrb[45].mxu0  ;;  %v311_v19 = vadd.f32 %v9676_v37, %v310_v16  ;;  %v6550_v14 = vld [vmem:[%s12065_s3 + $0x138] sm:$0xff]  ;;  %v6549_v15 = vld [vmem:[%s12065_s3 + $0x130] sm:$0xff]  ;;  %v6552_v16 = vld [vmem:[%s12065_s3 + $0x148] sm:$0xff] }
 0x170   :  { %v6551_v18 = vld [vmem:[%s12065_s3 + $0x140] sm:$0xff] }
 0x171   :  { %8471 = vmatpush1.bf16.msra.mxu0 %v9764_v17  ;;  %9172 = vmatpush1.bf16.msra.mxu1 %v9764_v17  ;;  %v346_v24 = vmax.f32 %v311_v19, 0.0  ;;  %v6554_v19 = vld [vmem:[%s12065_s3 + $0x158] sm:$0xff] }
 0x172   :  { %v315_v21 = vpop.f32.mrb[46].mxu0  ;;  %8472 = vmatprep.subr.bf16.mxu0 %v9331_v3  ;;  %9160 = vmatprep.subr.bf16.mxu1 %v9331_v3 }
 0x173   :  { %v316_v22 = vadd.f32 %v9676_v37, %v315_v21  ;;  %v317_v23 = vpop.f32.mrb[47].mxu0  ;;  %v6553_v21 = vld [vmem:[%s12065_s3 + $0x150] sm:$0xff] }
 0x174   :  { %v6555_v23 = vld [vmem:[%s12065_s3 + $0x160] sm:$0xff] }
 0x175   :  { %v347_v25 = vmax.f32 %v316_v22, 0.0  ;;  %v6556_v22 = vld [vmem:[%s12065_s3 + $0x168] sm:$0xff] }
 0x176   :  { %v320_v26 = vpop.f32.mrb[48].mxu0 }
 0x177   :  { %v9772_v27 = vpack.c.bf16 %v347_v25, %v346_v24  ;;  %v321_v28 = vadd.f32 %v9676_v37, %v320_v26  ;;  %v322_v30 = vpop.f32.mrb[49].mxu0  ;;  %v358_v37 = vld [vmem:[%s12065_s3 + $0x48] sm:$0xff]  ;;  %v6558_v24 = vld [vmem:[%s12065_s3 + $0x178] sm:$0xff]  ;;  %v6557_v25 = vld [vmem:[%s12065_s3 + $0x170] sm:$0xff] }
 0x178   :  { %v6560_v26 = vld [vmem:[%s12065_s3 + $0x188] sm:$0xff]  ;;  %v6562_v30 = vld [vmem:[%s12065_s3 + $0x198] sm:$0xff] }
 0x179   :  { %v9775_v31 = vmax.f32 %v321_v28, 0.0  ;;  %8474 = vmatpush1.bf16.msra.mxu0 %v9772_v27  ;;  %9173 = vmatpush1.bf16.msra.mxu1 %v9772_v27  ;;  %v6559_v28 = vld [vmem:[%s12065_s3 + $0x180] sm:$0xff] }
 0x17a   :  { %478 = vmatprep.subr.mxu0 %v9332_v32  ;;  %9161 = vmatprep.subr.mxu1 %v9332_v32 }
 0x17d   :  { %479 = vmatpush1.msra.mxu0 %v9775_v31  ;;  %9174 = vmatpush1.msra.mxu1 %v9775_v31 }
 0x17e   :  { %510 = vmatmul.mubr.f32.vlgmr.msra.gmra.mrb[0].mxu1 %v355_v33  ;;  %8475 = vmatprep.subr.bf16.mxu1 %v9331_v3  ;;  %v6561_v33 = vld [vmem:[%s12065_s3 + $0x190] sm:$0xff] }
 0x17f   :  { %8477 = vmatpush1.bf16.msra.mxu1 %v9680_v47  ;;  %6531 = vmatprep.mubr.msk.f32.mxu1 %vm381_vm0, %v358_v37  ;;  %v6564_v37 = vld [vmem:[%s12065_s3 + $0x1a8] sm:$0xff] }
 0x180   :  { %8478 = vmatprep.subr.bf16.mxu1 %v9331_v3  ;;  %495 = vmatmul.mubr.f32.vlgmr.msra.gmra.mrb[50].mxu0 %v349_v34  ;;  %v6563_v34 = vld [vmem:[%s12065_s3 + $0x1a0] sm:$0xff] }
 0x181   :  { %6528 = vmatprep.mubr.msk.f32.mxu0 %vm381_vm0, %v352_v35  ;;  %v6566_v35 = vld [vmem:[%s12065_s3 + $0x1b8] sm:$0xff] }
 0x182   :  { %515 = vmatmul.mubr.f32.gmra.mrb[2].mxu1 %v357_v36  ;;  %v6565_v36 = vld [vmem:[%s12065_s3 + $0x1b0] sm:$0xff] }
 0x183   :  { %8480 = vmatpush1.bf16.msra.mxu1 %v9688_v56  ;;  %6532 = vmatprep.mubr.msk.f32.mxu1 %vm381_vm0, %v360_v38  ;;  %v6568_v38 = vld [vmem:[%s12065_s3 + $0x1c8] sm:$0xff] }
 0x184   :  { %8481 = vmatprep.subr.bf16.mxu1 %v9331_v3  ;;  %500 = vmatmul.mubr.f32.gmra.mrb[52].mxu0 %v351_v40  ;;  %v6567_v40 = vld [vmem:[%s12065_s3 + $0x1c0] sm:$0xff] }
 0x185   :  { %6529 = vmatprep.mubr.msk.f32.mxu0 %vm381_vm0, %v354_v41  ;;  %v6570_v41 = vld [vmem:[%s12065_s3 + $0x1d8] sm:$0xff] }
 0x186   :  { %520 = vmatmul.mubr.f32.gmra.mrb[4].mxu1 %v359_v42  ;;  %v6569_v42 = vld [vmem:[%s12065_s3 + $0x1d0] sm:$0xff] }
 0x187   :  { %8483 = vmatpush1.bf16.msra.mxu1 %v9696_v1  ;;  %6533 = vmatprep.mubr.msk.f32.mxu1 %vm381_vm0, %v362_v43  ;;  %v6572_v43 = vld [vmem:[%s12065_s3 + $0x1e8] sm:$0xff] }
 0x188   :  { %8484 = vmatprep.subr.bf16.mxu1 %v9331_v3  ;;  %505 = vmatmul.mubr.f32.gmra.mrb[54].mxu0 %v353_v44  ;;  %v6571_v44 = vld [vmem:[%s12065_s3 + $0x1e0] sm:$0xff] }
 0x18a   :  { %525 = vmatmul.mubr.f32.gmra.mrb[6].mxu1 %v361_v45  ;;  %v6574_v45 = vld [vmem:[%s12065_s3 + $0x1f8] sm:$0xff] }
 0x18b   :  { %8486 = vmatpush1.bf16.msra.mxu1 %v9704_v11  ;;  %6534 = vmatprep.mubr.msk.f32.mxu1 %vm381_vm0, %v364_v46  ;;  %v6573_v46 = vld [vmem:[%s12065_s3 + $0x1f0] sm:$0xff] }
 0x18c   :  { %8487 = vmatprep.subr.bf16.mxu1 %v9331_v3 }
 0x18e   :  { %530 = vmatmul.mubr.f32.gmra.mrb[8].mxu1 %v363_v48  ;;  %v6628_v48 = vld [vmem:[%s12065_s3 + $0x208] sm:$0xff] }
 0x18f   :  { %8489 = vmatpush1.bf16.msra.mxu1 %v9712_v20  ;;  %6535 = vmatprep.mubr.msk.f32.mxu1 %vm381_vm0, %v366_v50  ;;  %v6627_v50 = vld [vmem:[%s12065_s3 + $0x200] sm:$0xff] }
 0x190   :  { %8490 = vmatprep.subr.bf16.mxu1 %v9331_v3 }
 0x192   :  { %535 = vmatmul.mubr.f32.gmra.mrb[10].mxu1 %v365_v51  ;;  %v6630_v51 = vld [vmem:[%s12065_s3 + $0x218] sm:$0xff] }
 0x193   :  { %8492 = vmatpush1.bf16.msra.mxu1 %v9720_v29  ;;  %6536 = vmatprep.mubr.msk.f32.mxu1 %vm381_vm0, %v368_v52  ;;  %v6629_v52 = vld [vmem:[%s12065_s3 + $0x210] sm:$0xff] }
 0x194   :  { %8493 = vmatprep.subr.bf16.mxu1 %v9331_v3 }
 0x196   :  { %540 = vmatmul.mubr.f32.gmra.mrb[12].mxu1 %v367_v53  ;;  %v6632_v53 = vld [vmem:[%s12065_s3 + $0x228] sm:$0xff] }
 0x197   :  { %8495 = vmatpush1.bf16.msra.mxu1 %v9728_v39  ;;  %6537 = vmatprep.mubr.msk.f32.mxu1 %vm381_vm0, %v370_v54  ;;  %v6631_v54 = vld [vmem:[%s12065_s3 + $0x220] sm:$0xff] }
 0x198   :  { %8496 = vmatprep.subr.bf16.mxu1 %v9331_v3 }
 0x19a   :  { %545 = vmatmul.mubr.f32.gmra.mrb[14].mxu1 %v369_v55  ;;  %v6634_v55 = vld [vmem:[%s12065_s3 + $0x238] sm:$0xff] }
 0x19b   :  { %8498 = vmatpush1.bf16.msra.mxu1 %v9736_v49  ;;  %6538 = vmatprep.mubr.msk.f32.mxu1 %vm381_vm0, %v372_v57  ;;  %v6633_v57 = vld [vmem:[%s12065_s3 + $0x230] sm:$0xff] }
 0x19c   :  { %8499 = vmatprep.subr.bf16.mxu1 %v9331_v3 }
 0x19e   :  { %550 = vmatmul.mubr.f32.gmra.mrb[16].mxu1 %v371_v58  ;;  %v6636_v58 = vld [vmem:[%s12065_s3 + $0x248] sm:$0xff] }
 0x19f   :  { %8501 = vmatpush1.bf16.msra.mxu1 %v9744_v59  ;;  %6539 = vmatprep.mubr.msk.f32.mxu1 %vm381_vm0, %v374_v60  ;;  %v6635_v60 = vld [vmem:[%s12065_s3 + $0x240] sm:$0xff] }
 0x1a0   :  { %8502 = vmatprep.subr.bf16.mxu1 %v9331_v3 }
 0x1a2   :  { %555 = vmatmul.mubr.f32.gmra.mrb[18].mxu1 %v373_v61  ;;  %v6638_v61 = vld [vmem:[%s12065_s3 + $0x258] sm:$0xff] }
 0x1a3   :  { %8504 = vmatpush1.bf16.msra.mxu1 %v9752_v6  ;;  %6540 = vmatprep.mubr.msk.f32.mxu1 %vm381_vm0, %v376_v62  ;;  %v6591_v62 = vld [vmem:[%s12066_s4 + $0x20] sm:$0xff] }
 0x1a4   :  { %8505 = vmatprep.subr.bf16.mxu1 %v9331_v3 }
 0x1a6   :  { %560 = vmatmul.mubr.f32.gmra.mrb[20].mxu1 %v375_v63  ;;  %v6592_v63 = vld [vmem:[%s12066_s4 + $0x28] sm:$0xff] }
 0x1a7   :  { %8507 = vmatpush1.bf16.msra.mxu1 %v9764_v17  ;;  %6541 = vmatprep.mubr.msk.f32.mxu1 %vm381_vm0, %v378_v0  ;;  %v8511_v0 = vpack.c.bf16 %v6592_v63, %v6591_v62 }
 0x1a8   :  { %8508 = vmatprep.subr.bf16.mxu1 %v9331_v3 }
 0x1a9   :  { %8512 = vmatprep.subr.bf16.mxu0 %v8511_v0 }
 0x1aa   :  { %565 = vmatmul.mubr.f32.gmra.mrb[22].mxu1 %v377_v2  ;;  %v6637_v2 = vld [vmem:[%s12065_s3 + $0x250] sm:$0xff]  ;;  %8514 = vmatpush3.bf16.msra.mxu0 %v8511_v0 }
 0x1ab   :  { %8510 = vmatpush1.bf16.msra.mxu1 %v9772_v27  ;;  %6542 = vmatprep.mubr.msk.f32.mxu1 %vm381_vm0, %v380_v4  ;;  %v6640_v4 = vld [vmem:[%s12065_s3 + $0x268] sm:$0xff]  ;;  %v6713_v0 = vld [vmem:[%s12065_s3 + $0x390] sm:$0xff] }
 0x1ac   :  { %708 = vmatprep.subr.mxu1 %v9332_v32 }
 0x1ae   :  { %570 = vmatmul.mubr.f32.gmra.mrb[24].mxu1 %v379_v5  ;;  %v6593_v5 = vld [vmem:[%s12066_s4 + $0x30] sm:$0xff] }
 0x1af   :  { %709 = vmatpush1.msra.mxu1 %v9775_v31  ;;  %6575 = vmatprep.mubr.msk.f32.mxu1 %vm381_vm0, %v6544_v7  ;;  %v6594_v7 = vld [vmem:[%s12066_s4 + $0x38] sm:$0xff] }
 0x1b0   :  { %8527 = vmatprep.subr.bf16.mxu1 %v9331_v3 }
 0x1b2   :  { %725 = vmatmul.mubr.f32.vlgmr.msra.gmra.mrb[26].mxu1 %v6543_v8  ;;  %v8515_v8 = vpack.c.bf16 %v6594_v7, %v6593_v5 }
 0x1b3   :  { %8529 = vmatpush1.bf16.msra.mxu1 %v9680_v47  ;;  %6576 = vmatprep.mubr.msk.f32.mxu1 %vm381_vm0, %v6546_v9  ;;  %v6639_v9 = vld [vmem:[%s12065_s3 + $0x260] sm:$0xff] }
 0x1b4   :  { %8530 = vmatprep.subr.bf16.mxu1 %v9331_v3  ;;  %8516 = vmatprep.subr.bf16.mxu0 %v8515_v8 }
 0x1b5   :  { %8518 = vmatpush3.bf16.msra.mxu0 %v8515_v8 }
 0x1b6   :  { %730 = vmatmul.mubr.f32.gmra.mrb[28].mxu1 %v6545_v10  ;;  %v6642_v10 = vld [vmem:[%s12065_s3 + $0x278] sm:$0xff] }
 0x1b7   :  { %8532 = vmatpush1.bf16.msra.mxu1 %v9688_v56  ;;  %6577 = vmatprep.mubr.msk.f32.mxu1 %vm381_vm0, %v6548_v12  ;;  %v6641_v12 = vld [vmem:[%s12065_s3 + $0x270] sm:$0xff] }
 0x1b8   :  { %8533 = vmatprep.subr.bf16.mxu1 %v9331_v3 }
 0x1ba   :  { %735 = vmatmul.mubr.f32.gmra.mrb[30].mxu1 %v6547_v13  ;;  %v6644_v13 = vld [vmem:[%s12065_s3 + $0x288] sm:$0xff] }
 0x1bb   :  { %8535 = vmatpush1.bf16.msra.mxu1 %v9696_v1  ;;  %6578 = vmatprep.mubr.msk.f32.mxu1 %vm381_vm0, %v6550_v14  ;;  %v6643_v14 = vld [vmem:[%s12065_s3 + $0x280] sm:$0xff] }
 0x1bc   :  { %8536 = vmatprep.subr.bf16.mxu1 %v9331_v3 }
 0x1be   :  { %740 = vmatmul.mubr.f32.gmra.mrb[32].mxu1 %v6549_v15  ;;  %v6646_v15 = vld [vmem:[%s12065_s3 + $0x298] sm:$0xff] }
 0x1bf   :  { %8538 = vmatpush1.bf16.msra.mxu1 %v9704_v11  ;;  %6579 = vmatprep.mubr.msk.f32.mxu1 %vm381_vm0, %v6552_v16  ;;  %v6645_v16 = vld [vmem:[%s12065_s3 + $0x290] sm:$0xff] }
 0x1c0   :  { %8539 = vmatprep.subr.bf16.mxu1 %v9331_v3 }
 0x1c2   :  { %745 = vmatmul.mubr.f32.gmra.mrb[34].mxu1 %v6551_v18  ;;  %v6648_v18 = vld [vmem:[%s12065_s3 + $0x2a8] sm:$0xff] }
 0x1c3   :  { %8541 = vmatpush1.bf16.msra.mxu1 %v9712_v20  ;;  %6580 = vmatprep.mubr.msk.f32.mxu1 %vm381_vm0, %v6554_v19  ;;  %v6647_v19 = vld [vmem:[%s12065_s3 + $0x2a0] sm:$0xff] }
 0x1c4   :  { %8542 = vmatprep.subr.bf16.mxu1 %v9331_v3 }
 0x1c6   :  { %750 = vmatmul.mubr.f32.gmra.mrb[36].mxu1 %v6553_v21  ;;  %v6650_v21 = vld [vmem:[%s12065_s3 + $0x2b8] sm:$0xff] }
 0x1c7   :  { %8544 = vmatpush1.bf16.msra.mxu1 %v9720_v29  ;;  %6581 = vmatprep.mubr.msk.f32.mxu1 %vm381_vm0, %v6556_v22  ;;  %v6649_v22 = vld [vmem:[%s12065_s3 + $0x2b0] sm:$0xff] }
 0x1c8   :  { %8545 = vmatprep.subr.bf16.mxu1 %v9331_v3 }
 0x1ca   :  { %755 = vmatmul.mubr.f32.gmra.mrb[38].mxu1 %v6555_v23  ;;  %v6652_v23 = vld [vmem:[%s12065_s3 + $0x2c8] sm:$0xff] }
 0x1cb   :  { %8547 = vmatpush1.bf16.msra.mxu1 %v9728_v39  ;;  %6582 = vmatprep.mubr.msk.f32.mxu1 %vm381_vm0, %v6558_v24  ;;  %v6651_v24 = vld [vmem:[%s12065_s3 + $0x2c0] sm:$0xff] }
 0x1cc   :  { %8548 = vmatprep.subr.bf16.mxu1 %v9331_v3 }
 0x1ce   :  { %760 = vmatmul.mubr.f32.gmra.mrb[40].mxu1 %v6557_v25  ;;  %v6654_v25 = vld [vmem:[%s12065_s3 + $0x2d8] sm:$0xff] }
 0x1cf   :  { %8550 = vmatpush1.bf16.msra.mxu1 %v9736_v49  ;;  %6583 = vmatprep.mubr.msk.f32.mxu1 %vm381_vm0, %v6560_v26  ;;  %v6653_v26 = vld [vmem:[%s12065_s3 + $0x2d0] sm:$0xff] }
 0x1d0   :  { %8551 = vmatprep.subr.bf16.mxu1 %v9331_v3 }
 0x1d2   :  { %765 = vmatmul.mubr.f32.gmra.mrb[42].mxu1 %v6559_v28  ;;  %v6656_v28 = vld [vmem:[%s12065_s3 + $0x2e8] sm:$0xff] }
 0x1d3   :  { %8553 = vmatpush1.bf16.msra.mxu1 %v9744_v59  ;;  %6584 = vmatprep.mubr.msk.f32.mxu1 %vm381_vm0, %v6562_v30  ;;  %v6655_v30 = vld [vmem:[%s12065_s3 + $0x2e0] sm:$0xff] }
 0x1d4   :  { %8554 = vmatprep.subr.bf16.mxu1 %v9331_v3 }
 0x1d6   :  { %770 = vmatmul.mubr.f32.gmra.mrb[44].mxu1 %v6561_v33  ;;  %v6658_v33 = vld [vmem:[%s12065_s3 + $0x2f8] sm:$0xff] }
 0x1d7   :  { %8556 = vmatpush1.bf16.msra.mxu1 %v9752_v6  ;;  %6585 = vmatprep.mubr.msk.f32.mxu1 %vm381_vm0, %v6564_v37  ;;  %v6657_v37 = vld [vmem:[%s12065_s3 + $0x2f0] sm:$0xff] }
 0x1d8   :  { %8557 = vmatprep.subr.bf16.mxu1 %v9331_v3 }
 0x1da   :  { %775 = vmatmul.mubr.f32.gmra.mrb[46].mxu1 %v6563_v34  ;;  %v6696_v34 = vld [vmem:[%s12065_s3 + $0x308] sm:$0xff] }
 0x1db   :  { %8559 = vmatpush1.bf16.msra.mxu1 %v9764_v17  ;;  %6586 = vmatprep.mubr.msk.f32.mxu1 %vm381_vm0, %v6566_v35  ;;  %v6695_v35 = vld [vmem:[%s12065_s3 + $0x300] sm:$0xff] }
 0x1dc   :  { %8560 = vmatprep.subr.bf16.mxu1 %v9331_v3 }
 0x1de   :  { %780 = vmatmul.mubr.f32.gmra.mrb[48].mxu1 %v6565_v36  ;;  %v6698_v36 = vld [vmem:[%s12065_s3 + $0x318] sm:$0xff] }
 0x1df   :  { %8562 = vmatpush1.bf16.msra.mxu1 %v9772_v27  ;;  %6587 = vmatprep.mubr.msk.f32.mxu1 %vm381_vm0, %v6568_v38  ;;  %v6697_v38 = vld [vmem:[%s12065_s3 + $0x310] sm:$0xff] }
 0x1e0   :  { %1326 = vmatprep.subr.mxu1 %v9332_v32 }
 0x1e2   :  { %785 = vmatmul.mubr.f32.gmra.mrb[50].mxu1 %v6567_v40  ;;  %v6700_v40 = vld [vmem:[%s12065_s3 + $0x328] sm:$0xff] }
 0x1e3   :  { %1327 = vmatpush1.msra.mxu1 %v9775_v31  ;;  %6588 = vmatprep.mubr.msk.f32.mxu1 %vm381_vm0, %v6570_v41  ;;  %v6699_v41 = vld [vmem:[%s12065_s3 + $0x320] sm:$0xff] }
 0x1e4   :  { %8571 = vmatprep.subr.bf16.mxu1 %v9331_v3 }
 0x1e6   :  { %790 = vmatmul.mubr.f32.gmra.mrb[52].mxu1 %v6569_v42  ;;  %v6702_v42 = vld [vmem:[%s12065_s3 + $0x338] sm:$0xff] }
 0x1e7   :  { %6589 = vmatprep.mubr.msk.f32.mxu1 %vm381_vm0, %v6572_v43  ;;  %v6701_v43 = vld [vmem:[%s12065_s3 + $0x330] sm:$0xff] }
 0x1ea   :  { %795 = vmatmul.mubr.f32.gmra.mrb[54].mxu1 %v6571_v44  ;;  %v6704_v44 = vld [vmem:[%s12065_s3 + $0x348] sm:$0xff] }
 0x1eb   :  { %6590 = vmatprep.mubr.msk.f32.mxu1 %vm381_vm0, %v6574_v45  ;;  %v575_v45 = vld [vmem:[%s12066_s4] sm:$0xff] }
 0x1ee   :  { %800 = vmatmul.mubr.f32.gmra.mrb[56].mxu1 %v6573_v46  ;;  %v576_v46 = vld [vmem:[%s12066_s4 + $0x8] sm:$0xff] }
 0x1ef   :  { %6659 = vmatprep.mubr.msk.f32.mxu1 %vm381_vm0, %v6628_v48  ;;  %v10245_v48 = vpack.c.bf16 %v576_v46, %v575_v45  ;;  %v6763_v45 = vld [vmem:[%s12065_s3 + $0x400] sm:$0xff]  ;;  %v6766_v46 = vld [vmem:[%s12065_s3 + $0x418] sm:$0xff] }
 0x1f1   :  { %8520 = vmatprep.subr.bf16.mxu0 %v10245_v48 }
 0x1f2   :  { %1343 = vmatmul.mubr.f32.vlgmr.msra.gmra.mrb[58].mxu1 %v6627_v50  ;;  %v6703_v50 = vld [vmem:[%s12065_s3 + $0x340] sm:$0xff] }
 0x1f3   :  { %8573 = vmatpush1.bf16.msra.mxu1 %v9680_v47  ;;  %6660 = vmatprep.mubr.msk.f32.mxu1 %vm381_vm0, %v6630_v51  ;;  %v6706_v51 = vld [vmem:[%s12065_s3 + $0x358] sm:$0xff] }
 0x1f4   :  { %8574 = vmatprep.subr.bf16.mxu1 %v9331_v3 }
 0x1f6   :  { %1348 = vmatmul.mubr.f32.gmra.mrb[60].mxu1 %v6629_v52  ;;  %v6705_v52 = vld [vmem:[%s12065_s3 + $0x350] sm:$0xff] }
 0x1f7   :  { %8576 = vmatpush1.bf16.msra.mxu1 %v9688_v56  ;;  %6661 = vmatprep.mubr.msk.f32.mxu1 %vm381_vm0, %v6632_v53  ;;  %v6708_v53 = vld [vmem:[%s12065_s3 + $0x368] sm:$0xff] }
 0x1f8   :  { %8577 = vmatprep.subr.bf16.mxu1 %v9331_v3 }
 0x1fa   :  { %1353 = vmatmul.mubr.f32.gmra.mrb[62].mxu1 %v6631_v54  ;;  %v6707_v54 = vld [vmem:[%s12065_s3 + $0x360] sm:$0xff] }
 0x1fb   :  { %8579 = vmatpush1.bf16.msra.mxu1 %v9696_v1  ;;  %6662 = vmatprep.mubr.msk.f32.mxu1 %vm381_vm0, %v6634_v55  ;;  %v6710_v55 = vld [vmem:[%s12065_s3 + $0x378] sm:$0xff] }
 0x1fc   :  { %8580 = vmatprep.subr.bf16.mxu1 %v9331_v3 }
 0x1fe   :  { %1358 = vmatmul.mubr.f32.gmra.mrb[64].mxu1 %v6633_v57  ;;  %v6709_v57 = vld [vmem:[%s12065_s3 + $0x370] sm:$0xff] }
 0x1ff   :  { %8582 = vmatpush1.bf16.msra.mxu1 %v9704_v11  ;;  %6663 = vmatprep.mubr.msk.f32.mxu1 %vm381_vm0, %v6636_v58  ;;  %v6712_v58 = vld [vmem:[%s12065_s3 + $0x388] sm:$0xff] }
 0x200   :  { %8583 = vmatprep.subr.bf16.mxu1 %v9331_v3 }
 0x202   :  { %1363 = vmatmul.mubr.f32.gmra.mrb[66].mxu1 %v6635_v60  ;;  %v6711_v60 = vld [vmem:[%s12065_s3 + $0x380] sm:$0xff] }
 0x203   :  { %8585 = vmatpush1.bf16.msra.mxu1 %v9712_v20  ;;  %6664 = vmatprep.mubr.msk.f32.mxu1 %vm381_vm0, %v6638_v61  ;;  %v6714_v61 = vld [vmem:[%s12065_s3 + $0x398] sm:$0xff] }
 0x204   :  { %8586 = vmatprep.subr.bf16.mxu1 %v9331_v3 }
 0x206   :  { %1368 = vmatmul.mubr.f32.gmra.mrb[68].mxu1 %v6637_v2 }
 0x207   :  { %8588 = vmatpush1.bf16.msra.mxu1 %v9720_v29  ;;  %6665 = vmatprep.mubr.msk.f32.mxu1 %vm381_vm0, %v6640_v4  ;;  %v6716_v4 = vld [vmem:[%s12065_s3 + $0x3a8] sm:$0xff] }
 0x208   :  { %8589 = vmatprep.subr.bf16.mxu1 %v9331_v3 }
 0x20a   :  { %1373 = vmatmul.mubr.f32.gmra.mrb[70].mxu1 %v6639_v9  ;;  %v6715_v9 = vld [vmem:[%s12065_s3 + $0x3a0] sm:$0xff] }
 0x20b   :  { %8591 = vmatpush1.bf16.msra.mxu1 %v9728_v39  ;;  %6666 = vmatprep.mubr.msk.f32.mxu1 %vm381_vm0, %v6642_v10 }
 0x20c   :  { %8592 = vmatprep.subr.bf16.mxu1 %v9331_v3 }
 0x20e   :  { %1378 = vmatmul.mubr.f32.gmra.mrb[72].mxu1 %v6641_v12  ;;  %v6718_v12 = vld [vmem:[%s12065_s3 + $0x3b8] sm:$0xff] }
 0x20f   :  { %8594 = vmatpush1.bf16.msra.mxu1 %v9736_v49  ;;  %6667 = vmatprep.mubr.msk.f32.mxu1 %vm381_vm0, %v6644_v13 }
 0x210   :  { %8595 = vmatprep.subr.bf16.mxu1 %v9331_v3 }
 0x212   :  { %1383 = vmatmul.mubr.f32.gmra.mrb[74].mxu1 %v6643_v14 }
 0x213   :  { %8597 = vmatpush1.bf16.msra.mxu1 %v9744_v59  ;;  %6668 = vmatprep.mubr.msk.f32.mxu1 %vm381_vm0, %v6646_v15 }
 0x214   :  { %8598 = vmatprep.subr.bf16.mxu1 %v9331_v3 }
 0x216   :  { %1388 = vmatmul.mubr.f32.gmra.mrb[76].mxu1 %v6645_v16  ;;  %v6717_v16 = vld [vmem:[%s12065_s3 + $0x3b0] sm:$0xff] }
 0x217   :  { %8600 = vmatpush1.bf16.msra.mxu1 %v9752_v6  ;;  %6669 = vmatprep.mubr.msk.f32.mxu1 %vm381_vm0, %v6648_v18 }
 0x218   :  { %8601 = vmatprep.subr.bf16.mxu1 %v9331_v3 }
 0x21a   :  { %1393 = vmatmul.mubr.f32.gmra.mrb[78].mxu1 %v6647_v19  ;;  %v6720_v19 = vld [vmem:[%s12065_s3 + $0x3c8] sm:$0xff] }
 0x21b   :  { %8603 = vmatpush1.bf16.msra.mxu1 %v9764_v17  ;;  %6670 = vmatprep.mubr.msk.f32.mxu1 %vm381_vm0, %v6650_v21 }
 0x21c   :  { %8604 = vmatprep.subr.bf16.mxu1 %v9331_v3 }
 0x21e   :  { %1398 = vmatmul.mubr.f32.gmra.mrb[80].mxu1 %v6649_v22 }
 0x21f   :  { %8606 = vmatpush1.bf16.msra.mxu1 %v9772_v27  ;;  %6671 = vmatprep.mubr.msk.f32.mxu1 %vm381_vm0, %v6652_v23 }
 0x220   :  { %1766 = vmatprep.subr.mxu1 %v9332_v32 }
 0x222   :  { %1403 = vmatmul.mubr.f32.gmra.mrb[82].mxu1 %v6651_v24  ;;  %v6719_v24 = vld [vmem:[%s12065_s3 + $0x3c0] sm:$0xff] }
 0x223   :  { %1767 = vmatpush1.msra.mxu1 %v9775_v31  ;;  %6672 = vmatprep.mubr.msk.f32.mxu1 %vm381_vm0, %v6654_v25  ;;  %v6722_v25 = vld [vmem:[%s12065_s3 + $0x3d8] sm:$0xff] }
 0x224   :  { %8615 = vmatprep.subr.bf16.mxu1 %v9331_v3 }
 0x226   :  { %1408 = vmatmul.mubr.f32.gmra.mrb[84].mxu1 %v6653_v26 }
 0x227   :  { %6673 = vmatprep.mubr.msk.f32.mxu1 %vm381_vm0, %v6656_v28 }
 0x22a   :  { %1413 = vmatmul.mubr.f32.gmra.mrb[86].mxu1 %v6655_v30  ;;  %v6721_v30 = vld [vmem:[%s12065_s3 + $0x3d0] sm:$0xff] }
 0x22b   :  { %6674 = vmatprep.mubr.msk.f32.mxu1 %vm381_vm0, %v6658_v33  ;;  %v6724_v33 = vld [vmem:[%s12065_s3 + $0x3e8] sm:$0xff] }
 0x22e   :  { %1418 = vmatmul.mubr.f32.gmra.mrb[88].mxu1 %v6657_v37 }
 0x22f   :  { %6727 = vmatprep.mubr.msk.f32.mxu1 %vm381_vm0, %v6696_v34 }
 0x232   :  { %1783 = vmatmul.mubr.f32.vlgmr.msra.gmra.mrb[90].mxu1 %v6695_v35  ;;  %v6723_v35 = vld [vmem:[%s12065_s3 + $0x3e0] sm:$0xff] }
 0x233   :  { %8617 = vmatpush1.bf16.msra.mxu1 %v9680_v47  ;;  %6728 = vmatprep.mubr.msk.f32.mxu1 %vm381_vm0, %v6698_v36  ;;  %v6726_v36 = vld [vmem:[%s12065_s3 + $0x3f8] sm:$0xff] }
 0x234   :  { %8618 = vmatprep.subr.bf16.mxu1 %v9331_v3 }
 0x236   :  { %1788 = vmatmul.mubr.f32.gmra.mrb[92].mxu1 %v6697_v38 }
 0x237   :  { %8620 = vmatpush1.bf16.msra.mxu1 %v9688_v56  ;;  %6729 = vmatprep.mubr.msk.f32.mxu1 %vm381_vm0, %v6700_v40 }
 0x238   :  { %8621 = vmatprep.subr.bf16.mxu1 %v9331_v3 }
 0x23a   :  { %1793 = vmatmul.mubr.f32.gmra.mrb[94].mxu1 %v6699_v41  ;;  %v6725_v41 = vld [vmem:[%s12065_s3 + $0x3f0] sm:$0xff] }
 0x23b   :  { %8623 = vmatpush1.bf16.msra.mxu1 %v9696_v1  ;;  %6730 = vmatprep.mubr.msk.f32.mxu1 %vm381_vm0, %v6702_v42  ;;  %v6764_v42 = vld [vmem:[%s12065_s3 + $0x408] sm:$0xff] }
 0x23c   :  { %8624 = vmatprep.subr.bf16.mxu1 %v9331_v3 }
 0x23e   :  { %1798 = vmatmul.mubr.f32.gmra.mrb[96].mxu1 %v6701_v43 }
 0x23f   :  { %8626 = vmatpush1.bf16.msra.mxu1 %v9704_v11  ;;  %6731 = vmatprep.mubr.msk.f32.mxu1 %vm381_vm0, %v6704_v44 }
 0x240   :  { %8627 = vmatprep.subr.bf16.mxu1 %v9331_v3 }
 0x242   :  { %1803 = vmatmul.mubr.f32.gmra.mrb[98].mxu1 %v6703_v50 }
 0x243   :  { %8629 = vmatpush1.bf16.msra.mxu1 %v9712_v20  ;;  %6732 = vmatprep.mubr.msk.f32.mxu1 %vm381_vm0, %v6706_v51 }
 0x244   :  { %8630 = vmatprep.subr.bf16.mxu1 %v9331_v3 }
 0x246   :  { %1808 = vmatmul.mubr.f32.gmra.mrb[100].mxu1 %v6705_v52  ;;  %v6765_v52 = vld [vmem:[%s12065_s3 + $0x410] sm:$0xff] }
 0x247   :  { %8632 = vmatpush1.bf16.msra.mxu1 %v9720_v29  ;;  %6733 = vmatprep.mubr.msk.f32.mxu1 %vm381_vm0, %v6708_v53  ;;  %v6768_v53 = vld [vmem:[%s12065_s3 + $0x428] sm:$0xff] }
 0x248   :  { %8633 = vmatprep.subr.bf16.mxu1 %v9331_v3 }
 0x24a   :  { %1813 = vmatmul.mubr.f32.gmra.mrb[102].mxu1 %v6707_v54 }
 0x24b   :  { %8635 = vmatpush1.bf16.msra.mxu1 %v9728_v39  ;;  %6734 = vmatprep.mubr.msk.f32.mxu1 %vm381_vm0, %v6710_v55 }
 0x24c   :  { %8636 = vmatprep.subr.bf16.mxu1 %v9331_v3 }
 0x24e   :  { %1818 = vmatmul.mubr.f32.gmra.mrb[104].mxu1 %v6709_v57  ;;  %v6767_v57 = vld [vmem:[%s12065_s3 + $0x420] sm:$0xff] }
 0x24f   :  { %8638 = vmatpush1.bf16.msra.mxu1 %v9736_v49  ;;  %6735 = vmatprep.mubr.msk.f32.mxu1 %vm381_vm0, %v6712_v58  ;;  %v6770_v58 = vld [vmem:[%s12065_s3 + $0x438] sm:$0xff] }
 0x250   :  { %8639 = vmatprep.subr.bf16.mxu1 %v9331_v3 }
 0x251   :  { %v10293_v62 = vpop.f32.mrb[0].mxu1 }
 0x252   :  { %v513_v63 = vpop.f32.mrb[1].mxu1  ;;  %1823 = vmatmul.mubr.f32.gmra.mrb[106].mxu1 %v6711_v60 }
 0x253   :  { %8641 = vmatpush1.bf16.msra.mxu1 %v9744_v59  ;;  %6736 = vmatprep.mubr.msk.f32.mxu1 %vm381_vm0, %v6714_v61  ;;  %v10300_v2 = vpop.f32.mrb[50].mxu0  ;;  %v6769_v63 = vld [vmem:[%s12065_s3 + $0x430] sm:$0xff] }
 0x254   :  { %8642 = vmatprep.subr.bf16.mxu1 %v9331_v3  ;;  %v498_v5 = vpop.f32.mrb[51].mxu0 }
 0x255   :  { %v10306_v7 = vpop.f32.mrb[2].mxu1 }
 0x256   :  { %v518_v8 = vpop.f32.mrb[3].mxu1  ;;  %1828 = vmatmul.mubr.f32.gmra.mrb[108].mxu1 %v6713_v0  ;;  %v6772_v0 = vld [vmem:[%s12065_s3 + $0x448] sm:$0xff] }
 0x257   :  { %8644 = vmatpush1.bf16.msra.mxu1 %v9752_v6  ;;  %6737 = vmatprep.mubr.msk.f32.mxu1 %vm381_vm0, %v6716_v4  ;;  %v10313_v10 = vpop.f32.mrb[52].mxu0  ;;  %v6771_v8 = vld [vmem:[%s12065_s3 + $0x440] sm:$0xff] }
 0x258   :  { %8645 = vmatprep.subr.bf16.mxu1 %v9331_v3  ;;  %v503_v13 = vpop.f32.mrb[53].mxu0 }
 0x259   :  { %v10319_v14 = vpop.f32.mrb[4].mxu1 }
 0x25a   :  { %v523_v15 = vpop.f32.mrb[5].mxu1  ;;  %1833 = vmatmul.mubr.f32.gmra.mrb[110].mxu1 %v6715_v9  ;;  %v6774_v9 = vld [vmem:[%s12065_s3 + $0x458] sm:$0xff] }
 0x25b   :  { %8647 = vmatpush1.bf16.msra.mxu1 %v9764_v17  ;;  %6738 = vmatprep.mubr.msk.f32.mxu1 %vm381_vm0, %v6718_v12  ;;  %v10326_v18 = vpop.f32.mrb[54].mxu0  ;;  %v6773_v15 = vld [vmem:[%s12065_s3 + $0x450] sm:$0xff] }
 0x25c   :  { %8648 = vmatprep.subr.bf16.mxu1 %v9331_v3  ;;  %v508_v21 = vpop.f32.mrb[55].mxu0 }
 0x25d   :  { %v10332_v22 = vpop.f32.mrb[6].mxu1 }
 0x25e   :  { %v528_v23 = vpop.f32.mrb[7].mxu1  ;;  %1838 = vmatmul.mubr.f32.gmra.mrb[112].mxu1 %v6717_v16  ;;  %v6776_v16 = vld [vmem:[%s12065_s3 + $0x468] sm:$0xff] }
 0x25f   :  { %8650 = vmatpush1.bf16.msra.mxu1 %v9772_v27  ;;  %6739 = vmatprep.mubr.msk.f32.mxu1 %vm381_vm0, %v6720_v19  ;;  %v577_v23 = vld [vmem:[%s12066_s4 + $0x10] sm:$0xff] }
 0x260   :  { %2206 = vmatprep.subr.mxu1 %v9332_v32 }
 0x261   :  { %v10343_v26 = vpop.f32.mrb[8].mxu1 }
 0x262   :  { %v533_v28 = vpop.f32.mrb[9].mxu1  ;;  %1843 = vmatmul.mubr.f32.gmra.mrb[114].mxu1 %v6719_v24  ;;  %v578_v24 = vld [vmem:[%s12066_s4 + $0x18] sm:$0xff] }
 0x263   :  { %2207 = vmatpush1.msra.mxu1 %v9775_v31  ;;  %6740 = vmatprep.mubr.msk.f32.mxu1 %vm381_vm0, %v6722_v25  ;;  %v6775_v25 = vld [vmem:[%s12065_s3 + $0x460] sm:$0xff]  ;;  %v6778_v28 = vld [vmem:[%s12065_s3 + $0x478] sm:$0xff] }
 0x264   :  { %8703 = vmatprep.subr.bf16.mxu1 %v9331_v3 }
 0x265   :  { %v10354_v37 = vpop.f32.mrb[10].mxu1 }
 0x266   :  { %v538_v34 = vpop.f32.mrb[11].mxu1  ;;  %1848 = vmatmul.mubr.f32.gmra.mrb[116].mxu1 %v6721_v30 }
 0x267   :  { %6741 = vmatprep.mubr.msk.f32.mxu1 %vm381_vm0, %v6724_v33  ;;  %v8523_v33 = vpack.c.bf16 %v578_v24, %v577_v23  ;;  %v6789_v24 = vld [vmem:[%s12065_s3 + $0x4d0] sm:$0xff] }
 0x269   :  { %v10363_v38 = vpop.f32.mrb[12].mxu1 }
 0x26a   :  { %v543_v40 = vpop.f32.mrb[13].mxu1  ;;  %1853 = vmatmul.mubr.f32.gmra.mrb[118].mxu1 %v6723_v35  ;;  %v6675_v35 = vld [vmem:[%s12066_s4 + $0x40] sm:$0xff] }
 0x26b   :  { %6742 = vmatprep.mubr.msk.f32.mxu1 %vm381_vm0, %v6726_v36  ;;  %v6676_v36 = vld [vmem:[%s12066_s4 + $0x48] sm:$0xff]  ;;  %v6777_v40 = vld [vmem:[%s12065_s3 + $0x470] sm:$0xff] }
 0x26d   :  { %v10372_v43 = vpop.f32.mrb[14].mxu1 }
 0x26e   :  { %v548_v44 = vpop.f32.mrb[15].mxu1  ;;  %1858 = vmatmul.mubr.f32.gmra.mrb[120].mxu1 %v6725_v41  ;;  %v6780_v41 = vld [vmem:[%s12065_s3 + $0x488] sm:$0xff] }
 0x26f   :  { %6795 = vmatprep.mubr.msk.f32.mxu1 %vm381_vm0, %v6764_v42  ;;  %v10469_v44 = vpack.c.bf16 %v6676_v36, %v6675_v35 }
 0x271   :  { %v10381_v50 = vpop.f32.mrb[16].mxu1 }
 0x272   :  { %v553_v51 = vpop.f32.mrb[17].mxu1  ;;  %2223 = vmatmul.mubr.f32.vlgmr.msra.gmra.mrb[122].mxu1 %v6763_v45 }
 0x273   :  { %8705 = vmatpush1.bf16.msra.mxu1 %v9680_v47  ;;  %6796 = vmatprep.mubr.msk.f32.mxu1 %vm381_vm0, %v6766_v46  ;;  %v6779_v46 = vld [vmem:[%s12065_s3 + $0x480] sm:$0xff] }
 0x274   :  { %8706 = vmatprep.subr.bf16.mxu1 %v9331_v3 }
 0x275   :  { %v10392_v54 = vpop.f32.mrb[18].mxu1 }
 0x276   :  { %v558_v55 = vpop.f32.mrb[19].mxu1  ;;  %2228 = vmatmul.mubr.f32.gmra.mrb[124].mxu1 %v6765_v52 }
 0x277   :  { %8708 = vmatpush1.bf16.msra.mxu1 %v9688_v56  ;;  %6797 = vmatprep.mubr.msk.f32.mxu1 %vm381_vm0, %v6768_v53  ;;  %v6781_v53 = vld [vmem:[%s12065_s3 + $0x490] sm:$0xff]  ;;  %v6784_v55 = vld [vmem:[%s12065_s3 + $0x4a8] sm:$0xff] }
 0x278   :  { %8709 = vmatprep.subr.bf16.mxu1 %v9331_v3 }
 0x279   :  { %v10403_v60 = vpop.f32.mrb[20].mxu1 }
 0x27a   :  { %v563_v61 = vpop.f32.mrb[21].mxu1  ;;  %2233 = vmatmul.mubr.f32.gmra.mrb[126].mxu1 %v6767_v57 }
 0x27b   :  { %8711 = vmatpush1.bf16.msra.mxu1 %v9696_v1  ;;  %6798 = vmatprep.mubr.msk.f32.mxu1 %vm381_vm0, %v6770_v58  ;;  %v6783_v61 = vld [vmem:[%s12065_s3 + $0x4a0] sm:$0xff] }
 0x27c   :  { %8712 = vmatprep.subr.bf16.mxu1 %v9331_v3 }
 0x27d   :  { %v10414_v4 = vpop.f32.mrb[22].mxu1 }
 0x27e   :  { %v568_v5 = vpop.f32.mrb[23].mxu1  ;;  %2238 = vmatmul.mubr.f32.gmra.mrb[128].mxu1 %v6769_v63  ;;  %v6786_v63 = vld [vmem:[%s12065_s3 + $0x4b8] sm:$0xff] }
 0x27f   :  { %8714 = vmatpush1.bf16.msra.mxu1 %v9704_v11  ;;  %6799 = vmatprep.mubr.msk.f32.mxu1 %vm381_vm0, %v6772_v0 }
 0x280   :  { %8715 = vmatprep.subr.bf16.mxu1 %v9331_v3 }
 0x281   :  { %v10425_v12 = vpop.f32.mrb[24].mxu1 }
 0x282   :  { %v573_v13 = vpop.f32.mrb[25].mxu1  ;;  %2243 = vmatmul.mubr.f32.gmra.mrb[130].mxu1 %v6771_v8  ;;  %v6785_v8 = vld [vmem:[%s12065_s3 + $0x4b0] sm:$0xff] }
 0x283   :  { %8717 = vmatpush1.bf16.msra.mxu1 %v9712_v20  ;;  %6800 = vmatprep.mubr.msk.f32.mxu1 %vm381_vm0, %v6774_v9  ;;  %v6788_v9 = vld [vmem:[%s12065_s3 + $0x4c8] sm:$0xff] }
 0x284   :  { %8718 = vmatprep.subr.bf16.mxu1 %v9331_v3 }
 0x285   :  { %v726_v19 = vpop.f32.mrb[26].mxu1 }
 0x286   :  { %v728_v21 = vpop.f32.mrb[27].mxu1  ;;  %7634 = vmatprep.mubr.msk.f32.mxu0 %vm810_vm1, %v726_v19  ;;  %2248 = vmatmul.mubr.f32.gmra.mrb[132].mxu1 %v6773_v15  ;;  %v6790_v19 = vld [vmem:[%s12065_s3 + $0x4d8] sm:$0xff] }
 0x287   :  { %8720 = vmatpush1.bf16.msra.mxu1 %v9720_v29  ;;  %6801 = vmatprep.mubr.msk.f32.mxu1 %vm381_vm0, %v6776_v16  ;;  %v6787_v16 = vld [vmem:[%s12065_s3 + $0x4c0] sm:$0xff] }
 0x288   :  { %8721 = vmatprep.subr.bf16.mxu1 %v9331_v3 }
 0x289   :  { %v731_v30 = vpop.f32.mrb[28].mxu1 }
 0x28a   :  { %v733_v34 = vpop.f32.mrb[29].mxu1  ;;  %7635 = vmatmul.mubr.msk.f32.vlgmr.msra.gmra.mrb[56].mxu0 %vm810_vm1, %v731_v30  ;;  %2253 = vmatmul.mubr.f32.gmra.mrb[134].mxu1 %v6775_v25  ;;  %v6792_v25 = vld [vmem:[%s12065_s3 + $0x4e8] sm:$0xff] }
 0x28b   :  { %8723 = vmatpush1.bf16.msra.mxu1 %v9728_v39  ;;  %6802 = vmatprep.mubr.msk.f32.mxu1 %vm381_vm0, %v6778_v28  ;;  %v6794_v34 = vld [vmem:[%s12065_s3 + $0x4f8] sm:$0xff] }
 0x28c   :  { %8724 = vmatprep.subr.bf16.mxu1 %v9331_v3  ;;  %8522 = vmatpush3.bf16.msra.mxu0 %v10245_v48  ;;  %v6782_v48 = vld [vmem:[%s12065_s3 + $0x498] sm:$0xff] }
 0x28d   :  { %v736_v42 = vpop.f32.mrb[30].mxu1  ;;  %8524 = vmatprep.subr.bf16.mxu0 %v8523_v33 }
 0x28e   :  { %v738_v45 = vpop.f32.mrb[31].mxu1  ;;  %7637 = vmatprep.mubr.msk.f32.mxu0 %vm810_vm1, %v736_v42  ;;  %2258 = vmatmul.mubr.f32.gmra.mrb[136].mxu1 %v6777_v40  ;;  %v6793_v40 = vld [vmem:[%s12065_s3 + $0x4f0] sm:$0xff] }
 0x28f   :  { %8726 = vmatpush1.bf16.msra.mxu1 %v9736_v49  ;;  %6803 = vmatprep.mubr.msk.f32.mxu1 %vm381_vm0, %v6780_v41  ;;  %v6900_v41 = vld [vmem:[%s12065_s3 + $0x608] sm:$0xff] }
 0x290   :  { %8727 = vmatprep.subr.bf16.mxu1 %v9331_v3  ;;  %8526 = vmatpush3.bf16.msra.mxu0 %v8523_v33  ;;  %v6791_v33 = vld [vmem:[%s12065_s3 + $0x4e0] sm:$0xff] }
 0x291   :  { %v741_v51 = vpop.f32.mrb[32].mxu1  ;;  %8564 = vmatprep.subr.bf16.mxu0 %v10469_v44 }
 0x292   :  { %v743_v52 = vpop.f32.mrb[33].mxu1  ;;  %7638 = vmatmul.mubr.msk.f32.gmra.mrb[58].mxu0 %vm810_vm1, %v741_v51  ;;  %2263 = vmatmul.mubr.f32.gmra.mrb[138].mxu1 %v6779_v46  ;;  %v6899_v46 = vld [vmem:[%s12065_s3 + $0x600] sm:$0xff] }
 0x293   :  { %8729 = vmatpush1.bf16.msra.mxu1 %v9744_v59  ;;  %6804 = vmatprep.mubr.msk.f32.mxu1 %vm381_vm0, %v6782_v48  ;;  %v6902_v48 = vld [vmem:[%s12065_s3 + $0x618] sm:$0xff] }
 0x294   :  { %8730 = vmatprep.subr.bf16.mxu1 %v9331_v3 }
 0x295   :  { %v746_v57 = vpop.f32.mrb[34].mxu1 }
 0x296   :  { %v748_v58 = vpop.f32.mrb[35].mxu1  ;;  %7640 = vmatprep.mubr.msk.f32.mxu0 %vm810_vm1, %v746_v57  ;;  %2268 = vmatmul.mubr.f32.gmra.mrb[140].mxu1 %v6781_v53  ;;  %v6901_v53 = vld [vmem:[%s12065_s3 + $0x610] sm:$0xff] }
 0x297   :  { %8732 = vmatpush1.bf16.msra.mxu1 %v9752_v6  ;;  %6805 = vmatprep.mubr.msk.f32.mxu1 %vm381_vm0, %v6784_v55  ;;  %v6904_v55 = vld [vmem:[%s12065_s3 + $0x628] sm:$0xff] }
 0x298   :  { %8733 = vmatprep.subr.bf16.mxu1 %v9331_v3 }
 0x299   :  { %v751_v0 = vpop.f32.mrb[36].mxu1 }
 0x29a   :  { %v753_v5 = vpop.f32.mrb[37].mxu1  ;;  %7641 = vmatmul.mubr.msk.f32.gmra.mrb[60].mxu0 %vm810_vm1, %v751_v0  ;;  %2273 = vmatmul.mubr.f32.gmra.mrb[142].mxu1 %v6783_v61  ;;  %v6903_v61 = vld [vmem:[%s12065_s3 + $0x620] sm:$0xff] }
 0x29b   :  { %8735 = vmatpush1.bf16.msra.mxu1 %v9764_v17  ;;  %6806 = vmatprep.mubr.msk.f32.mxu1 %vm381_vm0, %v6786_v63  ;;  %v6906_v63 = vld [vmem:[%s12065_s3 + $0x638] sm:$0xff] }
 0x29c   :  { %8736 = vmatprep.subr.bf16.mxu1 %v9331_v3 }
 0x29d   :  { %v756_v13 = vpop.f32.mrb[38].mxu1 }
 0x29e   :  { %v758_v15 = vpop.f32.mrb[39].mxu1  ;;  %7643 = vmatprep.mubr.msk.f32.mxu0 %vm810_vm1, %v756_v13  ;;  %2278 = vmatmul.mubr.f32.gmra.mrb[144].mxu1 %v6785_v8  ;;  %v6905_v8 = vld [vmem:[%s12065_s3 + $0x630] sm:$0xff] }
 0x29f   :  { %8738 = vmatpush1.bf16.msra.mxu1 %v9772_v27  ;;  %6807 = vmatprep.mubr.msk.f32.mxu1 %vm381_vm0, %v6788_v9  ;;  %v6908_v9 = vld [vmem:[%s12065_s3 + $0x648] sm:$0xff] }
 0x2a0   :  { %3086 = vmatprep.subr.mxu1 %v9332_v32 }
 0x2a1   :  { %v761_v21 = vpop.f32.mrb[40].mxu1 }
 0x2a2   :  { %v763_v23 = vpop.f32.mrb[41].mxu1  ;;  %7644 = vmatmul.mubr.msk.f32.gmra.mrb[62].mxu0 %vm810_vm1, %v761_v21  ;;  %2283 = vmatmul.mubr.f32.gmra.mrb[146].mxu1 %v6787_v16  ;;  %v6907_v16 = vld [vmem:[%s12065_s3 + $0x640] sm:$0xff]  ;;  %v6910_v21 = vld [vmem:[%s12065_s3 + $0x658] sm:$0xff] }
 0x2a3   :  { %3087 = vmatpush1.msra.mxu1 %v9775_v31  ;;  %6808 = vmatprep.mubr.msk.f32.mxu1 %vm381_vm0, %v6790_v19 }
 0x2a4   :  { %8747 = vmatprep.subr.bf16.mxu1 %v9331_v3 }
 0x2a5   :  { %v766_v28 = vpop.f32.mrb[42].mxu1 }
 0x2a6   :  { %v768_v30 = vpop.f32.mrb[43].mxu1  ;;  %7646 = vmatprep.mubr.msk.f32.mxu0 %vm810_vm1, %v766_v28  ;;  %2288 = vmatmul.mubr.f32.gmra.mrb[148].mxu1 %v6789_v24  ;;  %v6909_v24 = vld [vmem:[%s12065_s3 + $0x650] sm:$0xff]  ;;  %v6912_v28 = vld [vmem:[%s12065_s3 + $0x668] sm:$0xff] }
 0x2a7   :  { %6809 = vmatprep.mubr.msk.f32.mxu1 %vm381_vm0, %v6792_v25 }
 0x2a9   :  { %v771_v35 = vpop.f32.mrb[44].mxu1 }
 0x2aa   :  { %v773_v36 = vpop.f32.mrb[45].mxu1  ;;  %7647 = vmatmul.mubr.msk.f32.gmra.mrb[64].mxu0 %vm810_vm1, %v771_v35  ;;  %2293 = vmatmul.mubr.f32.gmra.mrb[150].mxu1 %v6791_v33  ;;  %v6678_v33 = vld [vmem:[%s12066_s4 + $0x58] sm:$0xff] }
 0x2ab   :  { %6810 = vmatprep.mubr.msk.f32.mxu1 %vm381_vm0, %v6794_v34  ;;  %v6911_v34 = vld [vmem:[%s12065_s3 + $0x660] sm:$0xff]  ;;  %v6914_v35 = vld [vmem:[%s12065_s3 + $0x678] sm:$0xff] }
 0x2ad   :  { %v776_v42 = vpop.f32.mrb[46].mxu1 }
 0x2ae   :  { %v778_v45 = vpop.f32.mrb[47].mxu1  ;;  %7649 = vmatprep.mubr.msk.f32.mxu0 %vm810_vm1, %v776_v42  ;;  %2298 = vmatmul.mubr.f32.gmra.mrb[152].mxu1 %v6793_v40  ;;  %v6913_v40 = vld [vmem:[%s12065_s3 + $0x670] sm:$0xff]  ;;  %v6744_v42 = vld [vmem:[%s12066_s4 + $0x68] sm:$0xff] }
 0x2af   :  { %6931 = vmatprep.mubr.msk.f32.mxu1 %vm381_vm0, %v6900_v41  ;;  %v6915_v45 = vld [vmem:[%s12065_s3 + $0x680] sm:$0xff] }
 0x2b1   :  { %v781_v51 = vpop.f32.mrb[48].mxu1 }
 0x2b2   :  { %v783_v52 = vpop.f32.mrb[49].mxu1  ;;  %7650 = vmatmul.mubr.msk.f32.gmra.mrb[66].mxu0 %vm810_vm1, %v781_v51  ;;  %3103 = vmatmul.mubr.f32.vlgmr.msra.gmra.mrb[154].mxu1 %v6899_v46  ;;  %v6918_v46 = vld [vmem:[%s12065_s3 + $0x698] sm:$0xff]  ;;  %v6917_v51 = vld [vmem:[%s12065_s3 + $0x690] sm:$0xff] }
 0x2b3   :  { %8749 = vmatpush1.bf16.msra.mxu1 %v9680_v47  ;;  %6932 = vmatprep.mubr.msk.f32.mxu1 %vm381_vm0, %v6902_v48 }
 0x2b4   :  { %8750 = vmatprep.subr.bf16.mxu1 %v9331_v3 }
 0x2b5   :  { %v786_v57 = vpop.f32.mrb[50].mxu1 }
 0x2b6   :  { %v788_v58 = vpop.f32.mrb[51].mxu1  ;;  %7652 = vmatprep.mubr.msk.f32.mxu0 %vm810_vm1, %v786_v57  ;;  %3108 = vmatmul.mubr.f32.gmra.mrb[156].mxu1 %v6901_v53 }
 0x2b7   :  { %8752 = vmatpush1.bf16.msra.mxu1 %v9688_v56  ;;  %6933 = vmatprep.mubr.msk.f32.mxu1 %vm381_vm0, %v6904_v55 }
 0x2b8   :  { %8753 = vmatprep.subr.bf16.mxu1 %v9331_v3 }
 0x2b9   :  { %v791_v0 = vpop.f32.mrb[52].mxu1 }
 0x2ba   :  { %v793_v5 = vpop.f32.mrb[53].mxu1  ;;  %7653 = vmatmul.mubr.msk.f32.gmra.mrb[68].mxu0 %vm810_vm1, %v791_v0  ;;  %3113 = vmatmul.mubr.f32.gmra.mrb[158].mxu1 %v6903_v61 }
 0x2bb   :  { %8755 = vmatpush1.bf16.msra.mxu1 %v9696_v1  ;;  %6934 = vmatprep.mubr.msk.f32.mxu1 %vm381_vm0, %v6906_v63  ;;  %v6746_v5 = vld [vmem:[%s12066_s4 + $0x78] sm:$0xff] }
 0x2bc   :  { %8756 = vmatprep.subr.bf16.mxu1 %v9331_v3 }
 0x2bd   :  { %v796_v13 = vpop.f32.mrb[54].mxu1 }
 0x2be   :  { %v798_v15 = vpop.f32.mrb[55].mxu1  ;;  %7655 = vmatprep.mubr.msk.f32.mxu0 %vm810_vm1, %v796_v13  ;;  %3118 = vmatmul.mubr.f32.gmra.mrb[160].mxu1 %v6905_v8  ;;  %v6925_v8 = vld [vmem:[%s12065_s3 + $0x6d0] sm:$0xff] }
 0x2bf   :  { %8758 = vmatpush1.bf16.msra.mxu1 %v9704_v11  ;;  %6935 = vmatprep.mubr.msk.f32.mxu1 %vm381_vm0, %v6908_v9 }
 0x2c0   :  { %8759 = vmatprep.subr.bf16.mxu1 %v9331_v3 }
 0x2c1   :  { %v801_v19 = vpop.f32.mrb[56].mxu1 }
 0x2c2   :  { %v803_v23 = vpop.f32.mrb[57].mxu1  ;;  %7656 = vmatmul.mubr.msk.f32.gmra.mrb[70].mxu0 %vm810_vm1, %v801_v19  ;;  %3123 = vmatmul.mubr.f32.gmra.mrb[162].mxu1 %v6907_v16  ;;  %v6811_v16 = vld [vmem:[%s12066_s4 + $0x80] sm:$0xff]  ;;  %v6812_v19 = vld [vmem:[%s12066_s4 + $0x88] sm:$0xff] }
 0x2c3   :  { %8761 = vmatpush1.bf16.msra.mxu1 %v9712_v20  ;;  %7666 = vmatprep.mubr.msk.f32.mxu0 %vm810_vm1, %v10300_v2  ;;  %v6677_v2 = vld [vmem:[%s12066_s4 + $0x50] sm:$0xff]  ;;  %v6930_v23 = vld [vmem:[%s12065_s3 + $0x6f8] sm:$0xff] }
 0x2c4   :  { %6936 = vmatprep.mubr.msk.f32.mxu1 %vm381_vm0, %v6910_v21  ;;  %8762 = vmatprep.subr.bf16.mxu1 %v9331_v3  ;;  %v8567_v36 = vpack.c.bf16 %v6678_v33, %v6677_v2  ;;  %v6927_v21 = vld [vmem:[%s12065_s3 + $0x6e0] sm:$0xff]  ;;  %v6968_v2 = vld [vmem:[%s12065_s3 + $0x708] sm:$0xff] }
 0x2c5   :  { %v10605_v25 = vpop.f32.mrb[58].mxu1 }
 0x2c6   :  { %7667 = vmatmul.mubr.msk.f32.vlgmr.msra.gmra.mrb[56].mxu0 %vm810_vm1, %v10313_v10  ;;  %v1346_v30 = vpop.f32.mrb[59].mxu1  ;;  %3128 = vmatmul.mubr.f32.gmra.mrb[164].mxu1 %v6909_v24 }
 0x2c7   :  { %8764 = vmatpush1.bf16.msra.mxu1 %v9720_v29  ;;  %7669 = vmatprep.mubr.msk.f32.mxu0 %vm810_vm1, %v10326_v18  ;;  %v6929_v30 = vld [vmem:[%s12065_s3 + $0x6f0] sm:$0xff] }
 0x2c8   :  { %6937 = vmatprep.mubr.msk.f32.mxu1 %vm381_vm0, %v6912_v28  ;;  %8765 = vmatprep.subr.bf16.mxu1 %v9331_v3 }
 0x2c9   :  { %v10626_v10 = vpop.f32.mrb[60].mxu1  ;;  %8566 = vmatpush3.bf16.msra.mxu0 %v10469_v44 }
 0x2ca   :  { %7670 = vmatmul.mubr.msk.f32.gmra.mrb[58].mxu0 %vm810_vm1, %v10293_v62  ;;  %v1351_v18 = vpop.f32.mrb[61].mxu1  ;;  %3133 = vmatmul.mubr.f32.gmra.mrb[166].mxu1 %v6911_v34  ;;  %v6916_v62 = vld [vmem:[%s12065_s3 + $0x688] sm:$0xff] }
 0x2cb   :  { %8767 = vmatpush1.bf16.msra.mxu1 %v9728_v39  ;;  %7672 = vmatprep.mubr.msk.f32.mxu0 %vm810_vm1, %v10306_v7  ;;  %v6743_v7 = vld [vmem:[%s12066_s4 + $0x60] sm:$0xff] }
 0x2cc   :  { %6938 = vmatprep.mubr.msk.f32.mxu1 %vm381_vm0, %v6914_v35  ;;  %8768 = vmatprep.subr.bf16.mxu1 %v9331_v3  ;;  %v10668_v48 = vpack.c.bf16 %v6744_v42, %v6743_v7 }
 0x2cd   :  { %v10642_v44 = vpop.f32.mrb[62].mxu1  ;;  %8568 = vmatprep.subr.bf16.mxu0 %v8567_v36 }
 0x2ce   :  { %7673 = vmatmul.mubr.msk.f32.gmra.mrb[60].mxu0 %vm810_vm1, %v10319_v14  ;;  %v1356_v41 = vpop.f32.mrb[63].mxu1  ;;  %3138 = vmatmul.mubr.f32.gmra.mrb[168].mxu1 %v6913_v40 }
 0x2cf   :  { %8770 = vmatpush1.bf16.msra.mxu1 %v9736_v49  ;;  %7675 = vmatprep.mubr.msk.f32.mxu0 %vm810_vm1, %v10332_v22 }
 0x2d0   :  { %6939 = vmatprep.mubr.msk.f32.mxu1 %vm381_vm0, %v6916_v62  ;;  %8771 = vmatprep.subr.bf16.mxu1 %v9331_v3 }
 0x2d1   :  { %v10663_v14 = vpop.f32.mrb[64].mxu1  ;;  %8570 = vmatpush3.bf16.msra.mxu0 %v8567_v36 }
 0x2d2   :  { %7676 = vmatmul.mubr.msk.f32.gmra.mrb[62].mxu0 %vm810_vm1, %v10343_v26  ;;  %v1361_v22 = vpop.f32.mrb[65].mxu1  ;;  %3143 = vmatmul.mubr.f32.gmra.mrb[170].mxu1 %v6915_v45  ;;  %v6920_v26 = vld [vmem:[%s12065_s3 + $0x6a8] sm:$0xff] }
 0x2d3   :  { %8773 = vmatpush1.bf16.msra.mxu1 %v9744_v59  ;;  %7678 = vmatprep.mubr.msk.f32.mxu0 %vm810_vm1, %v10354_v37  ;;  %v6919_v37 = vld [vmem:[%s12065_s3 + $0x6a0] sm:$0xff] }
 0x2d4   :  { %6940 = vmatprep.mubr.msk.f32.mxu1 %vm381_vm0, %v6918_v46  ;;  %8774 = vmatprep.subr.bf16.mxu1 %v9331_v3  ;;  %v6813_v46 = vld [vmem:[%s12066_s4 + $0x90] sm:$0xff] }
 0x2d5   :  { %v1364_v52 = vpop.f32.mrb[66].mxu1  ;;  %8608 = vmatprep.subr.bf16.mxu0 %v10668_v48 }
 0x2d6   :  { %7679 = vmatmul.mubr.msk.f32.gmra.mrb[64].mxu0 %vm810_vm1, %v10363_v38  ;;  %v1366_v53 = vpop.f32.mrb[67].mxu1  ;;  %3148 = vmatmul.mubr.f32.gmra.mrb[172].mxu1 %v6917_v51  ;;  %v6922_v38 = vld [vmem:[%s12065_s3 + $0x6b8] sm:$0xff] }
 0x2d7   :  { %8776 = vmatpush1.bf16.msra.mxu1 %v9752_v6  ;;  %7681 = vmatprep.mubr.msk.f32.mxu0 %vm810_vm1, %v10372_v43  ;;  %v6921_v43 = vld [vmem:[%s12065_s3 + $0x6b0] sm:$0xff] }
 0x2d8   :  { %6941 = vmatprep.mubr.msk.f32.mxu1 %vm381_vm0, %v6920_v26  ;;  %8777 = vmatprep.subr.bf16.mxu1 %v9331_v3 }
 0x2d9   :  { %v1369_v55 = vpop.f32.mrb[68].mxu1 }
 0x2da   :  { %7682 = vmatmul.mubr.msk.f32.gmra.mrb[66].mxu0 %vm810_vm1, %v10381_v50  ;;  %v1371_v57 = vpop.f32.mrb[69].mxu1  ;;  %3153 = vmatmul.mubr.f32.gmra.mrb[174].mxu1 %v6919_v37  ;;  %v6924_v50 = vld [vmem:[%s12065_s3 + $0x6c8] sm:$0xff] }
 0x2db   :  { %8779 = vmatpush1.bf16.msra.mxu1 %v9764_v17  ;;  %7684 = vmatprep.mubr.msk.f32.mxu0 %vm810_vm1, %v10392_v54  ;;  %v6923_v54 = vld [vmem:[%s12065_s3 + $0x6c0] sm:$0xff] }
 0x2dc   :  { %6942 = vmatprep.mubr.msk.f32.mxu1 %vm381_vm0, %v6922_v38  ;;  %8780 = vmatprep.subr.bf16.mxu1 %v9331_v3 }
 0x2dd   :  { %v1374_v58 = vpop.f32.mrb[70].mxu1 }
 0x2de   :  { %7685 = vmatmul.mubr.msk.f32.gmra.mrb[68].mxu0 %vm810_vm1, %v10403_v60  ;;  %v1376_v61 = vpop.f32.mrb[71].mxu1  ;;  %3158 = vmatmul.mubr.f32.gmra.mrb[176].mxu1 %v6921_v43  ;;  %v6926_v60 = vld [vmem:[%s12065_s3 + $0x6d8] sm:$0xff] }
 0x2df   :  { %8782 = vmatpush1.bf16.msra.mxu1 %v9772_v27  ;;  %7687 = vmatprep.mubr.msk.f32.mxu0 %vm810_vm1, %v10414_v4  ;;  %v6745_v4 = vld [vmem:[%s12066_s4 + $0x70] sm:$0xff] }
 0x2e0   :  { %6943 = vmatprep.mubr.msk.f32.mxu1 %vm381_vm0, %v6924_v50  ;;  %3526 = vmatprep.subr.mxu1 %v9332_v32  ;;  %v8611_v13 = vpack.c.bf16 %v6746_v5, %v6745_v4  ;;  %v6970_v5 = vld [vmem:[%s12065_s3 + $0x718] sm:$0xff] }
 0x2e1   :  { %v1379_v63 = vpop.f32.mrb[72].mxu1 }
 0x2e2   :  { %7688 = vmatmul.mubr.msk.f32.gmra.mrb[70].mxu0 %vm810_vm1, %v10425_v12  ;;  %v1381_v0 = vpop.f32.mrb[73].mxu1  ;;  %3163 = vmatmul.mubr.f32.gmra.mrb[178].mxu1 %v6923_v54  ;;  %v6928_v12 = vld [vmem:[%s12065_s3 + $0x6e8] sm:$0xff] }
 0x2e3   :  { %3527 = vmatpush1.msra.mxu1 %v9775_v31  ;;  %7698 = vmatprep.mubr.msk.f32.mxu0 %vm810_vm1, %v10605_v25  ;;  %v8651_v25 = vpack.c.bf16 %v6812_v19, %v6811_v16  ;;  %v6971_v16 = vld [vmem:[%s12065_s3 + $0x720] sm:$0xff] }
 0x2e4   :  { %6944 = vmatprep.mubr.msk.f32.mxu1 %vm381_vm0, %v6926_v60  ;;  %8791 = vmatprep.subr.bf16.mxu1 %v9331_v3 }
 0x2e5   :  { %v1384_v9 = vpop.f32.mrb[74].mxu1 }
 0x2e6   :  { %v1386_v15 = vpop.f32.mrb[75].mxu1  ;;  %7699 = vmatmul.mubr.msk.f32.vlgmr.msra.gmra.mrb[56].mxu0 %vm810_vm1, %v10626_v10  ;;  %3168 = vmatmul.mubr.f32.gmra.mrb[180].mxu1 %v6925_v8  ;;  %v6967_v10 = vld [vmem:[%s12065_s3 + $0x700] sm:$0xff] }
 0x2e7   :  { %7701 = vmatprep.mubr.msk.f32.mxu0 %vm810_vm1, %v10642_v44  ;;  %6945 = vmatprep.mubr.msk.f32.mxu1 %vm381_vm0, %v6928_v12  ;;  %v6969_v12 = vld [vmem:[%s12065_s3 + $0x710] sm:$0xff] }
 0x2e8   :  { %8610 = vmatpush3.bf16.msra.mxu0 %v10668_v48  ;;  %v6814_v48 = vld [vmem:[%s12066_s4 + $0x98] sm:$0xff] }
 0x2e9   :  { %v1389_v24 = vpop.f32.mrb[76].mxu1  ;;  %8612 = vmatprep.subr.bf16.mxu0 %v8611_v13  ;;  %v8655_v51 = vpack.c.bf16 %v6814_v48, %v6813_v46  ;;  %v6983_v46 = vld [vmem:[%s12065_s3 + $0x780] sm:$0xff]  ;;  %v6986_v48 = vld [vmem:[%s12065_s3 + $0x798] sm:$0xff] }
 0x2ea   :  { %v1391_v28 = vpop.f32.mrb[77].mxu1  ;;  %7702 = vmatmul.mubr.msk.f32.gmra.mrb[58].mxu0 %vm810_vm1, %v10663_v14  ;;  %3173 = vmatmul.mubr.f32.gmra.mrb[182].mxu1 %v6927_v21  ;;  %v6974_v21 = vld [vmem:[%s12065_s3 + $0x738] sm:$0xff] }
 0x2eb   :  { %7704 = vmatprep.mubr.msk.f32.mxu0 %vm810_vm1, %v1364_v52  ;;  %6946 = vmatprep.mubr.msk.f32.mxu1 %vm381_vm0, %v6930_v23  ;;  %v6976_v28 = vld [vmem:[%s12065_s3 + $0x748] sm:$0xff] }
 0x2ec   :  { %8614 = vmatpush3.bf16.msra.mxu0 %v8611_v13  ;;  %v6972_v13 = vld [vmem:[%s12065_s3 + $0x728] sm:$0xff] }
 0x2ed   :  { %v1394_v33 = vpop.f32.mrb[78].mxu1  ;;  %8652 = vmatprep.subr.bf16.mxu0 %v8651_v25 }
 0x2ee   :  { %v1396_v34 = vpop.f32.mrb[79].mxu1  ;;  %7705 = vmatmul.mubr.msk.f32.gmra.mrb[60].mxu0 %vm810_vm1, %v1369_v55  ;;  %3178 = vmatmul.mubr.f32.gmra.mrb[184].mxu1 %v6929_v30 }
 0x2ef   :  { %7707 = vmatprep.mubr.msk.f32.mxu0 %vm810_vm1, %v1374_v58  ;;  %6999 = vmatprep.mubr.msk.f32.mxu1 %vm381_vm0, %v6968_v2  ;;  %v6975_v2 = vld [vmem:[%s12065_s3 + $0x740] sm:$0xff]  ;;  %v6978_v34 = vld [vmem:[%s12065_s3 + $0x758] sm:$0xff] }
 0x2f1   :  { %v1399_v35 = vpop.f32.mrb[80].mxu1 }
 0x2f2   :  { %v1401_v36 = vpop.f32.mrb[81].mxu1  ;;  %7708 = vmatmul.mubr.msk.f32.gmra.mrb[62].mxu0 %vm810_vm1, %v1379_v63  ;;  %3543 = vmatmul.mubr.f32.vlgmr.msra.gmra.mrb[186].mxu1 %v6967_v10 }
 0x2f3   :  { %8793 = vmatpush1.bf16.msra.mxu1 %v9680_v47  ;;  %7710 = vmatprep.mubr.msk.f32.mxu0 %vm810_vm1, %v1384_v9 }
 0x2f4   :  { %8794 = vmatprep.subr.bf16.mxu1 %v9331_v3  ;;  %7000 = vmatprep.mubr.msk.f32.mxu1 %vm381_vm0, %v6970_v5 }
 0x2f5   :  { %v1404_v18 = vpop.f32.mrb[82].mxu1 }
 0x2f6   :  { %v1406_v40 = vpop.f32.mrb[83].mxu1  ;;  %7711 = vmatmul.mubr.msk.f32.gmra.mrb[64].mxu0 %vm810_vm1, %v1389_v24  ;;  %3548 = vmatmul.mubr.f32.gmra.mrb[188].mxu1 %v6969_v12  ;;  %v6973_v24 = vld [vmem:[%s12065_s3 + $0x730] sm:$0xff] }
 0x2f7   :  { %8796 = vmatpush1.bf16.msra.mxu1 %v9688_v56  ;;  %7713 = vmatprep.mubr.msk.f32.mxu0 %vm810_vm1, %v1394_v33 }
 0x2f8   :  { %8797 = vmatprep.subr.bf16.mxu1 %v9331_v3  ;;  %7001 = vmatprep.mubr.msk.f32.mxu1 %vm381_vm0, %v6972_v13  ;;  %v7036_v13 = vld [vmem:[%s12065_s3 + $0x808] sm:$0xff] }
 0x2f9   :  { %v1409_v44 = vpop.f32.mrb[84].mxu1 }
 0x2fa   :  { %v1411_v62 = vpop.f32.mrb[85].mxu1  ;;  %7714 = vmatmul.mubr.msk.f32.gmra.mrb[66].mxu0 %vm810_vm1, %v1399_v35  ;;  %3553 = vmatmul.mubr.f32.gmra.mrb[190].mxu1 %v6971_v16  ;;  %v6977_v35 = vld [vmem:[%s12065_s3 + $0x750] sm:$0xff] }
 0x2fb   :  { %8799 = vmatpush1.bf16.msra.mxu1 %v9696_v1  ;;  %7716 = vmatprep.mubr.msk.f32.mxu0 %vm810_vm1, %v1404_v18  ;;  %v6980_v18 = vld [vmem:[%s12065_s3 + $0x768] sm:$0xff] }
 0x2fc   :  { %8800 = vmatprep.subr.bf16.mxu1 %v9331_v3  ;;  %7002 = vmatprep.mubr.msk.f32.mxu1 %vm381_vm0, %v6974_v21 }
 0x2fd   :  { %v1414_v41 = vpop.f32.mrb[86].mxu1 }
 0x2fe   :  { %v1416_v7 = vpop.f32.mrb[87].mxu1  ;;  %7717 = vmatmul.mubr.msk.f32.gmra.mrb[68].mxu0 %vm810_vm1, %v1409_v44  ;;  %3558 = vmatmul.mubr.f32.gmra.mrb[192].mxu1 %v6973_v24  ;;  %v6979_v44 = vld [vmem:[%s12065_s3 + $0x760] sm:$0xff]  ;;  %v7040_v24 = vld [vmem:[%s12065_s3 + $0x828] sm:$0xff] }
 0x2ff   :  { %8802 = vmatpush1.bf16.msra.mxu1 %v9704_v11  ;;  %7719 = vmatprep.mubr.msk.f32.mxu0 %vm810_vm1, %v1414_v41  ;;  %v6982_v41 = vld [vmem:[%s12065_s3 + $0x778] sm:$0xff] }
 0x300   :  { %8803 = vmatprep.subr.bf16.mxu1 %v9331_v3  ;;  %7003 = vmatprep.mubr.msk.f32.mxu1 %vm381_vm0, %v6976_v28 }
 0x301   :  { %v1419_v42 = vpop.f32.mrb[88].mxu1 }
 0x302   :  { %v1421_v45 = vpop.f32.mrb[89].mxu1  ;;  %7720 = vmatmul.mubr.msk.f32.gmra.mrb[70].mxu0 %vm810_vm1, %v1419_v42  ;;  %3563 = vmatmul.mubr.f32.gmra.mrb[194].mxu1 %v6975_v2  ;;  %v6981_v42 = vld [vmem:[%s12065_s3 + $0x770] sm:$0xff] }
 0x303   :  { %8805 = vmatpush1.bf16.msra.mxu1 %v9712_v20  ;;  %7004 = vmatprep.mubr.msk.f32.mxu1 %vm381_vm0, %v6978_v34  ;;  %v7044_v34 = vld [vmem:[%s12065_s3 + $0x848] sm:$0xff] }
 0x304   :  { %8806 = vmatprep.subr.bf16.mxu1 %v9331_v3 }
 0x305   :  { %v1784_v14 = vpop.f32.mrb[90].mxu1 }
 0x306   :  { %v1786_v22 = vpop.f32.mrb[91].mxu1  ;;  %7730 = vmatprep.mubr.msk.f32.mxu0 %vm810_vm1, %v1784_v14  ;;  %3568 = vmatmul.mubr.f32.gmra.mrb[196].mxu1 %v6977_v35  ;;  %v6984_v14 = vld [vmem:[%s12065_s3 + $0x788] sm:$0xff] }
 0x307   :  { %8808 = vmatpush1.bf16.msra.mxu1 %v9720_v29  ;;  %7005 = vmatprep.mubr.msk.f32.mxu1 %vm381_vm0, %v6980_v18 }
 0x308   :  { %8809 = vmatprep.subr.bf16.mxu1 %v9331_v3 }
 0x309   :  { %v1789_v52 = vpop.f32.mrb[92].mxu1 }
 0x30a   :  { %v1791_v26 = vpop.f32.mrb[93].mxu1  ;;  %7731 = vmatmul.mubr.msk.f32.vlgmr.msra.gmra.mrb[56].mxu0 %vm810_vm1, %v1789_v52  ;;  %3573 = vmatmul.mubr.f32.gmra.mrb[198].mxu1 %v6979_v44  ;;  %v6985_v52 = vld [vmem:[%s12065_s3 + $0x790] sm:$0xff] }
 0x30b   :  { %8811 = vmatpush1.bf16.msra.mxu1 %v9728_v39  ;;  %8654 = vmatpush3.bf16.msra.mxu0 %v8651_v25  ;;  %v6988_v26 = vld [vmem:[%s12065_s3 + $0x7a8] sm:$0xff] }
 0x30c   :  { %8812 = vmatprep.subr.bf16.mxu1 %v9331_v3  ;;  %8656 = vmatprep.subr.bf16.mxu0 %v8655_v51 }
 0x30d   :  { %v1794_v53 = vpop.f32.mrb[94].mxu1  ;;  %7006 = vmatprep.mubr.msk.f32.mxu1 %vm381_vm0, %v6982_v41  ;;  %v7048_v41 = vld [vmem:[%s12065_s3 + $0x868] sm:$0xff] }
 0x30e   :  { %v1796_v37 = vpop.f32.mrb[95].mxu1  ;;  %7733 = vmatprep.mubr.msk.f32.mxu0 %vm810_vm1, %v1794_v53  ;;  %3578 = vmatmul.mubr.f32.gmra.mrb[200].mxu1 %v6981_v42 }
 0x30f   :  { %8814 = vmatpush1.bf16.msra.mxu1 %v9736_v49  ;;  %8658 = vmatpush3.bf16.msra.mxu0 %v8655_v51 }
 0x310   :  { %8815 = vmatprep.subr.bf16.mxu1 %v9331_v3  ;;  %8659 = vmatprep.subr.bf16.mxu0 %v9331_v3 }
 0x311   :  { %v1799_v55 = vpop.f32.mrb[96].mxu1  ;;  %7007 = vmatprep.mubr.msk.f32.mxu1 %vm381_vm0, %v6984_v14  ;;  %v7050_v14 = vld [vmem:[%s12065_s3 + $0x878] sm:$0xff] }
 0x312   :  { %v1801_v38 = vpop.f32.mrb[97].mxu1  ;;  %7734 = vmatmul.mubr.msk.f32.gmra.mrb[58].mxu0 %vm810_vm1, %v1799_v55  ;;  %3583 = vmatmul.mubr.f32.gmra.mrb[202].mxu1 %v6983_v46  ;;  %v6987_v55 = vld [vmem:[%s12065_s3 + $0x7a0] sm:$0xff] }
 0x313   :  { %8817 = vmatpush1.bf16.msra.mxu1 %v9744_v59  ;;  %7008 = vmatprep.mubr.msk.f32.mxu1 %vm381_vm0, %v6986_v48  ;;  %v6990_v38 = vld [vmem:[%s12065_s3 + $0x7b8] sm:$0xff] }
 0x314   :  { %8818 = vmatprep.subr.bf16.mxu1 %v9331_v3 }
 0x315   :  { %v1804_v57 = vpop.f32.mrb[98].mxu1 }
 0x316   :  { %v1806_v43 = vpop.f32.mrb[99].mxu1  ;;  %7736 = vmatprep.mubr.msk.f32.mxu0 %vm810_vm1, %v1804_v57  ;;  %3588 = vmatmul.mubr.f32.gmra.mrb[204].mxu1 %v6985_v52 }
 0x317   :  { %8820 = vmatpush1.bf16.msra.mxu1 %v9752_v6  ;;  %7009 = vmatprep.mubr.msk.f32.mxu1 %vm381_vm0, %v6988_v26 }
 0x318   :  { %8821 = vmatprep.subr.bf16.mxu1 %v9331_v3 }
 0x319   :  { %v1809_v58 = vpop.f32.mrb[100].mxu1 }
 0x31a   :  { %v1811_v50 = vpop.f32.mrb[101].mxu1  ;;  %7737 = vmatmul.mubr.msk.f32.gmra.mrb[60].mxu0 %vm810_vm1, %v1809_v58  ;;  %3593 = vmatmul.mubr.f32.gmra.mrb[206].mxu1 %v6987_v55  ;;  %v6992_v58 = vld [vmem:[%s12065_s3 + $0x7c8] sm:$0xff]  ;;  %v6834_v55 = vld [vmem:[%s12065_s3 + $0x518] sm:$0xff] }
 0x31b   :  { %8823 = vmatpush1.bf16.msra.mxu1 %v9764_v17  ;;  %7010 = vmatprep.mubr.msk.f32.mxu1 %vm381_vm0, %v6990_v38  ;;  %v7054_v38 = vld [vmem:[%s12065_s3 + $0x898] sm:$0xff] }
 0x31c   :  { %8824 = vmatprep.subr.bf16.mxu1 %v9331_v3 }
 0x31d   :  { %v1814_v61 = vpop.f32.mrb[102].mxu1 }
 0x31e   :  { %v1816_v54 = vpop.f32.mrb[103].mxu1  ;;  %7739 = vmatprep.mubr.msk.f32.mxu0 %vm810_vm1, %v1814_v61 }
 0x31f   :  { %8826 = vmatpush1.bf16.msra.mxu1 %v9772_v27  ;;  %v6994_v54 = vld [vmem:[%s12065_s3 + $0x7d8] sm:$0xff] }
 0x320   :  { %3966 = vmatprep.subr.mxu1 %v9332_v32 }
 0x321   :  { %v1819_v63 = vpop.f32.mrb[104].mxu1 }
 0x322   :  { %v1821_v60 = vpop.f32.mrb[105].mxu1  ;;  %7740 = vmatmul.mubr.msk.f32.gmra.mrb[62].mxu0 %vm810_vm1, %v1819_v63 }
 0x323   :  { %3967 = vmatpush1.msra.mxu1 %v9775_v31 }
 0x325   :  { %v1824_v0 = vpop.f32.mrb[106].mxu1 }
 0x326   :  { %v1826_v4 = vpop.f32.mrb[107].mxu1  ;;  %7742 = vmatprep.mubr.msk.f32.mxu0 %vm810_vm1, %v1824_v0  ;;  %v6996_v0 = vld [vmem:[%s12065_s3 + $0x7e8] sm:$0xff] }
 0x329   :  { %v1829_v8 = vpop.f32.mrb[108].mxu1 }
 0x32a   :  { %v1831_v9 = vpop.f32.mrb[109].mxu1  ;;  %7743 = vmatmul.mubr.msk.f32.gmra.mrb[64].mxu0 %vm810_vm1, %v1829_v8  ;;  %v6998_v8 = vld [vmem:[%s12065_s3 + $0x7f8] sm:$0xff] }
 0x32d   :  { %v1834_v15 = vpop.f32.mrb[110].mxu1 }
 0x32e   :  { %v1836_v19 = vpop.f32.mrb[111].mxu1  ;;  %7745 = vmatprep.mubr.msk.f32.mxu0 %vm810_vm1, %v1834_v15 }
 0x32f   :  { %v7038_v19 = vld [vmem:[%s12065_s3 + $0x818] sm:$0xff] }
 0x331   :  { %v1839_v23 = vpop.f32.mrb[112].mxu1 }
 0x332   :  { %v1841_v25 = vpop.f32.mrb[113].mxu1  ;;  %7746 = vmatmul.mubr.msk.f32.gmra.mrb[66].mxu0 %vm810_vm1, %v1839_v23 }
 0x335   :  { %v1844_v30 = vpop.f32.mrb[114].mxu1 }
 0x336   :  { %v1846_v33 = vpop.f32.mrb[115].mxu1  ;;  %7748 = vmatprep.mubr.msk.f32.mxu0 %vm810_vm1, %v1844_v30  ;;  %v7042_v30 = vld [vmem:[%s12065_s3 + $0x838] sm:$0xff] }
 0x339   :  { %v1849_v10 = vpop.f32.mrb[116].mxu1 }
 0x33a   :  { %v1851_v36 = vpop.f32.mrb[117].mxu1  ;;  %7749 = vmatmul.mubr.msk.f32.gmra.mrb[68].mxu0 %vm810_vm1, %v1849_v10 }
 0x33b   :  { %v7046_v36 = vld [vmem:[%s12065_s3 + $0x858] sm:$0xff] }
 0x33d   :  { %v1854_v40 = vpop.f32.mrb[118].mxu1 }
 0x33e   :  { %v1856_v62 = vpop.f32.mrb[119].mxu1  ;;  %7751 = vmatprep.mubr.msk.f32.mxu0 %vm810_vm1, %v1854_v40  ;;  %v6879_v40 = vld [vmem:[%s12066_s4 + $0xa0] sm:$0xff] }
 0x33f   :  { %v7045_v62 = vld [vmem:[%s12065_s3 + $0x850] sm:$0xff] }
 0x341   :  { %v1859_v7 = vpop.f32.mrb[120].mxu1 }
 0x342   :  { %v1861_v45 = vpop.f32.mrb[121].mxu1  ;;  %7752 = vmatmul.mubr.msk.f32.gmra.mrb[70].mxu0 %vm810_vm1, %v1859_v7 }
 0x345   :  { %v2224_v22 = vpop.f32.mrb[122].mxu1 }
 0x346   :  { %v2226_v51 = vpop.f32.mrb[123].mxu1  ;;  %7762 = vmatprep.mubr.msk.f32.mxu0 %vm810_vm1, %v2224_v22  ;;  %v6832_v22 = vld [vmem:[%s12065_s3 + $0x508] sm:$0xff] }
 0x347   :  { %v7052_v51 = vld [vmem:[%s12065_s3 + $0x888] sm:$0xff] }
 0x349   :  { %v2229_v53 = vpop.f32.mrb[124].mxu1 }
 0x34a   :  { %v2231_v37 = vpop.f32.mrb[125].mxu1  ;;  %7763 = vmatmul.mubr.msk.f32.vlgmr.msra.gmra.mrb[56].mxu0 %vm810_vm1, %v2229_v53  ;;  %v6831_v53 = vld [vmem:[%s12065_s3 + $0x500] sm:$0xff] }
 0x34b   :  { %8661 = vmatpush1.bf16.msra.mxu0 %v9680_v47  ;;  %v6989_v47 = vld [vmem:[%s12065_s3 + $0x7b0] sm:$0xff]  ;;  %v7051_v37 = vld [vmem:[%s12065_s3 + $0x880] sm:$0xff] }
 0x34c   :  { %8662 = vmatprep.subr.bf16.mxu0 %v9331_v3  ;;  %3598 = vmatmul.mubr.f32.gmra.mrb[208].mxu1 %v6989_v47  ;;  %v6833_v47 = vld [vmem:[%s12065_s3 + $0x510] sm:$0xff] }
 0x34d   :  { %v2234_v57 = vpop.f32.mrb[126].mxu1  ;;  %7011 = vmatprep.mubr.msk.f32.mxu1 %vm381_vm0, %v6992_v58  ;;  %v7053_v58 = vld [vmem:[%s12065_s3 + $0x890] sm:$0xff] }
 0x34e   :  { %v2236_v43 = vpop.f32.mrb[127].mxu1  ;;  %7765 = vmatprep.mubr.msk.f32.mxu0 %vm810_vm1, %v2234_v57 }
 0x34f   :  { %8664 = vmatpush1.bf16.msra.mxu0 %v9688_v56  ;;  %v6991_v56 = vld [vmem:[%s12065_s3 + $0x7c0] sm:$0xff] }
 0x350   :  { %8665 = vmatprep.subr.bf16.mxu0 %v9331_v3  ;;  %3603 = vmatmul.mubr.f32.gmra.mrb[210].mxu1 %v6991_v56 }
 0x351   :  { %v2239_v50 = vpop.f32.mrb[128].mxu1  ;;  %7012 = vmatprep.mubr.msk.f32.mxu1 %vm381_vm0, %v6994_v54 }
 0x352   :  { %v2241_v61 = vpop.f32.mrb[129].mxu1  ;;  %7766 = vmatmul.mubr.msk.f32.gmra.mrb[58].mxu0 %vm810_vm1, %v2239_v50  ;;  %v6836_v50 = vld [vmem:[%s12065_s3 + $0x528] sm:$0xff] }
 0x353   :  { %8667 = vmatpush1.bf16.msra.mxu0 %v9696_v1  ;;  %v6993_v1 = vld [vmem:[%s12065_s3 + $0x7d0] sm:$0xff]  ;;  %v7056_v61 = vld [vmem:[%s12065_s3 + $0x8a8] sm:$0xff] }
 0x354   :  { %8668 = vmatprep.subr.bf16.mxu0 %v9331_v3  ;;  %3608 = vmatmul.mubr.f32.gmra.mrb[212].mxu1 %v6993_v1  ;;  %v6838_v1 = vld [vmem:[%s12065_s3 + $0x538] sm:$0xff] }
 0x355   :  { %v2244_v63 = vpop.f32.mrb[130].mxu1  ;;  %7013 = vmatprep.mubr.msk.f32.mxu1 %vm381_vm0, %v6996_v0  ;;  %v7058_v0 = vld [vmem:[%s12065_s3 + $0x8b8] sm:$0xff] }
 0x356   :  { %v2246_v60 = vpop.f32.mrb[131].mxu1  ;;  %7768 = vmatprep.mubr.msk.f32.mxu0 %vm810_vm1, %v2244_v63  ;;  %v6835_v63 = vld [vmem:[%s12065_s3 + $0x520] sm:$0xff] }
 0x357   :  { %8670 = vmatpush1.bf16.msra.mxu0 %v9704_v11  ;;  %v6995_v11 = vld [vmem:[%s12065_s3 + $0x7e0] sm:$0xff] }
 0x358   :  { %8671 = vmatprep.subr.bf16.mxu0 %v9331_v3  ;;  %3613 = vmatmul.mubr.f32.gmra.mrb[214].mxu1 %v6995_v11  ;;  %v7055_v60 = vld [vmem:[%s12065_s3 + $0x8a0] sm:$0xff]  ;;  %v6840_v11 = vld [vmem:[%s12065_s3 + $0x548] sm:$0xff] }
 0x359   :  { %v2249_v4 = vpop.f32.mrb[132].mxu1  ;;  %7014 = vmatprep.mubr.msk.f32.mxu1 %vm381_vm0, %v6998_v8  ;;  %v7060_v8 = vld [vmem:[%s12065_s3 + $0x8c8] sm:$0xff] }
 0x35a   :  { %v2251_v5 = vpop.f32.mrb[133].mxu1  ;;  %7769 = vmatmul.mubr.msk.f32.gmra.mrb[60].mxu0 %vm810_vm1, %v2249_v4  ;;  %v6837_v4 = vld [vmem:[%s12065_s3 + $0x530] sm:$0xff] }
 0x35b   :  { %8673 = vmatpush1.bf16.msra.mxu0 %v9712_v20  ;;  %v6997_v20 = vld [vmem:[%s12065_s3 + $0x7f0] sm:$0xff] }
 0x35c   :  { %8674 = vmatprep.subr.bf16.mxu0 %v9331_v3  ;;  %3618 = vmatmul.mubr.f32.gmra.mrb[216].mxu1 %v6997_v20  ;;  %v7057_v5 = vld [vmem:[%s12065_s3 + $0x8b0] sm:$0xff]  ;;  %v6842_v20 = vld [vmem:[%s12065_s3 + $0x558] sm:$0xff] }
 0x35d   :  { %v2254_v12 = vpop.f32.mrb[134].mxu1  ;;  %7067 = vmatprep.mubr.msk.f32.mxu1 %vm381_vm0, %v7036_v13  ;;  %v7062_v13 = vld [vmem:[%s12065_s3 + $0x8d8] sm:$0xff] }
 0x35e   :  { %v2256_v9 = vpop.f32.mrb[135].mxu1  ;;  %7771 = vmatprep.mubr.msk.f32.mxu0 %vm810_vm1, %v2254_v12  ;;  %v6839_v12 = vld [vmem:[%s12065_s3 + $0x540] sm:$0xff] }
 0x35f   :  { %8676 = vmatpush1.bf16.msra.mxu0 %v9720_v29  ;;  %v7035_v29 = vld [vmem:[%s12065_s3 + $0x800] sm:$0xff] }
 0x360   :  { %8677 = vmatprep.subr.bf16.mxu0 %v9331_v3  ;;  %3983 = vmatmul.mubr.f32.vlgmr.msra.gmra.mrb[218].mxu1 %v7035_v29  ;;  %v7059_v9 = vld [vmem:[%s12065_s3 + $0x8c0] sm:$0xff]  ;;  %v6844_v29 = vld [vmem:[%s12065_s3 + $0x568] sm:$0xff] }
 0x361   :  { %v2259_v15 = vpop.f32.mrb[136].mxu1  ;;  %7068 = vmatprep.mubr.msk.f32.mxu1 %vm381_vm0, %v7038_v19  ;;  %v7064_v19 = vld [vmem:[%s12065_s3 + $0x8e8] sm:$0xff] }
 0x362   :  { %v2261_v16 = vpop.f32.mrb[137].mxu1  ;;  %7772 = vmatmul.mubr.msk.f32.gmra.mrb[62].mxu0 %vm810_vm1, %v2259_v15  ;;  %v6841_v15 = vld [vmem:[%s12065_s3 + $0x550] sm:$0xff] }
 0x363   :  { %8679 = vmatpush1.bf16.msra.mxu0 %v9728_v39  ;;  %v7037_v39 = vld [vmem:[%s12065_s3 + $0x810] sm:$0xff] }
 0x364   :  { %8680 = vmatprep.subr.bf16.mxu0 %v9331_v3  ;;  %3988 = vmatmul.mubr.f32.gmra.mrb[220].mxu1 %v7037_v39  ;;  %v7061_v16 = vld [vmem:[%s12065_s3 + $0x8d0] sm:$0xff]  ;;  %v6846_v39 = vld [vmem:[%s12065_s3 + $0x578] sm:$0xff] }
 0x365   :  { %v2264_v21 = vpop.f32.mrb[138].mxu1  ;;  %7069 = vmatprep.mubr.msk.f32.mxu1 %vm381_vm0, %v7040_v24  ;;  %v7066_v24 = vld [vmem:[%s12065_s3 + $0x8f8] sm:$0xff] }
 0x366   :  { %v2266_v23 = vpop.f32.mrb[139].mxu1  ;;  %7774 = vmatprep.mubr.msk.f32.mxu0 %vm810_vm1, %v2264_v21  ;;  %v6843_v21 = vld [vmem:[%s12065_s3 + $0x560] sm:$0xff] }
 0x367   :  { %8682 = vmatpush1.bf16.msra.mxu0 %v9736_v49  ;;  %v7039_v49 = vld [vmem:[%s12065_s3 + $0x820] sm:$0xff] }
 0x368   :  { %8683 = vmatprep.subr.bf16.mxu0 %v9331_v3  ;;  %3993 = vmatmul.mubr.f32.gmra.mrb[222].mxu1 %v7039_v49  ;;  %v7063_v23 = vld [vmem:[%s12065_s3 + $0x8e0] sm:$0xff]  ;;  %v6848_v49 = vld [vmem:[%s12065_s3 + $0x588] sm:$0xff] }
 0x369   :  { %v2269_v25 = vpop.f32.mrb[140].mxu1  ;;  %7070 = vmatprep.mubr.msk.f32.mxu1 %vm381_vm0, %v7042_v30  ;;  %v6847_v30 = vld [vmem:[%s12065_s3 + $0x580] sm:$0xff] }
 0x36a   :  { %v2271_v28 = vpop.f32.mrb[141].mxu1  ;;  %7775 = vmatmul.mubr.msk.f32.gmra.mrb[64].mxu0 %vm810_vm1, %v2269_v25  ;;  %v6845_v25 = vld [vmem:[%s12065_s3 + $0x570] sm:$0xff] }
 0x36b   :  { %8685 = vmatpush1.bf16.msra.mxu0 %v9744_v59  ;;  %v7041_v59 = vld [vmem:[%s12065_s3 + $0x830] sm:$0xff] }
 0x36c   :  { %8686 = vmatprep.subr.bf16.mxu0 %v9331_v3  ;;  %3998 = vmatmul.mubr.f32.gmra.mrb[224].mxu1 %v7041_v59  ;;  %v7065_v28 = vld [vmem:[%s12065_s3 + $0x8f0] sm:$0xff]  ;;  %v6852_v59 = vld [vmem:[%s12065_s3 + $0x5a8] sm:$0xff] }
 0x36d   :  { %v2274_v2 = vpop.f32.mrb[142].mxu1  ;;  %7071 = vmatprep.mubr.msk.f32.mxu1 %vm381_vm0, %v7044_v34  ;;  %v6851_v34 = vld [vmem:[%s12065_s3 + $0x5a0] sm:$0xff] }
 0x36e   :  { %v2276_v33 = vpop.f32.mrb[143].mxu1  ;;  %7777 = vmatprep.mubr.msk.f32.mxu0 %vm810_vm1, %v2274_v2  ;;  %v6850_v2 = vld [vmem:[%s12065_s3 + $0x598] sm:$0xff] }
 0x36f   :  { %8688 = vmatpush1.bf16.msra.mxu0 %v9752_v6  ;;  %v7043_v6 = vld [vmem:[%s12065_s3 + $0x840] sm:$0xff]  ;;  %v6849_v33 = vld [vmem:[%s12065_s3 + $0x590] sm:$0xff] }
 0x370   :  { %8689 = vmatprep.subr.bf16.mxu0 %v9331_v3  ;;  %4003 = vmatmul.mubr.f32.gmra.mrb[226].mxu1 %v7043_v6  ;;  %v6856_v6 = vld [vmem:[%s12065_s3 + $0x5c8] sm:$0xff] }
 0x371   :  { %v2279_v10 = vpop.f32.mrb[144].mxu1  ;;  %7072 = vmatprep.mubr.msk.f32.mxu1 %vm381_vm0, %v7046_v36  ;;  %v6855_v36 = vld [vmem:[%s12065_s3 + $0x5c0] sm:$0xff] }
 0x372   :  { %v2281_v35 = vpop.f32.mrb[145].mxu1  ;;  %7778 = vmatmul.mubr.msk.f32.gmra.mrb[66].mxu0 %vm810_vm1, %v2279_v10  ;;  %v6854_v10 = vld [vmem:[%s12065_s3 + $0x5b8] sm:$0xff] }
 0x373   :  { %8691 = vmatpush1.bf16.msra.mxu0 %v9764_v17  ;;  %v6880_v17 = vld [vmem:[%s12066_s4 + $0xa8] sm:$0xff]  ;;  %v6853_v35 = vld [vmem:[%s12065_s3 + $0x5b0] sm:$0xff] }
 0x374   :  { %8692 = vmatprep.subr.bf16.mxu0 %v9331_v3  ;;  %v8695_v7 = vpack.c.bf16 %v6880_v17, %v6879_v40  ;;  %4008 = vmatmul.mubr.f32.gmra.mrb[228].mxu1 %v7045_v62  ;;  %v6857_v40 = vld [vmem:[%s12065_s3 + $0x5d0] sm:$0xff]  ;;  %v6860_v17 = vld [vmem:[%s12065_s3 + $0x5e8] sm:$0xff]  ;;  %v6862_v62 = vld [vmem:[%s12065_s3 + $0x5f8] sm:$0xff] }
 0x375   :  { %v2284_v18 = vpop.f32.mrb[146].mxu1  ;;  %7073 = vmatprep.mubr.msk.f32.mxu1 %vm381_vm0, %v7048_v41  ;;  %v6861_v41 = vld [vmem:[%s12065_s3 + $0x5f0] sm:$0xff] }
 0x376   :  { %v2286_v44 = vpop.f32.mrb[147].mxu1  ;;  %7780 = vmatprep.mubr.msk.f32.mxu0 %vm810_vm1, %v2284_v18  ;;  %v6858_v18 = vld [vmem:[%s12065_s3 + $0x5d8] sm:$0xff] }
 0x377   :  { %8694 = vmatpush1.bf16.msra.mxu0 %v9772_v27  ;;  %v7047_v27 = vld [vmem:[%s12065_s3 + $0x860] sm:$0xff] }
 0x378   :  { %2646 = vmatprep.subr.mxu0 %v9332_v32  ;;  %4013 = vmatmul.mubr.f32.gmra.mrb[230].mxu1 %v7047_v27  ;;  %v6859_v44 = vld [vmem:[%s12065_s3 + $0x5e0] sm:$0xff] }
 0x379   :  { %v2289_v42 = vpop.f32.mrb[148].mxu1  ;;  %7074 = vmatprep.mubr.msk.f32.mxu1 %vm381_vm0, %v7050_v14 }
 0x37a   :  { %v2291_v45 = vpop.f32.mrb[149].mxu1  ;;  %7781 = vmatmul.mubr.msk.f32.gmra.mrb[68].mxu0 %vm810_vm1, %v2289_v42 }
 0x37b   :  { %2647 = vmatpush1.msra.mxu0 %v9775_v31  ;;  %v7049_v31 = vld [vmem:[%s12065_s3 + $0x870] sm:$0xff] }
 0x37c   :  { %8696 = vmatprep.subr.bf16.mxu0 %v8695_v7  ;;  %4018 = vmatmul.mubr.f32.gmra.mrb[232].mxu1 %v7049_v31 }
 0x37d   :  { %v2294_v46 = vpop.f32.mrb[150].mxu1  ;;  %7075 = vmatprep.mubr.msk.f32.mxu1 %vm381_vm0, %v7052_v51 }
 0x37e   :  { %v2296_v48 = vpop.f32.mrb[151].mxu1  ;;  %7783 = vmatprep.mubr.msk.f32.mxu0 %vm810_vm1, %v2294_v46 }
 0x380   :  { %4023 = vmatmul.mubr.f32.gmra.mrb[234].mxu1 %v7051_v37  ;;  %v6882_v37 = vld [vmem:[%s12066_s4 + $0xb8] sm:$0xff] }
 0x381   :  { %v2299_v52 = vpop.f32.mrb[152].mxu1  ;;  %7076 = vmatprep.mubr.msk.f32.mxu1 %vm381_vm0, %v7054_v38 }
 0x382   :  { %v2301_v26 = vpop.f32.mrb[153].mxu1  ;;  %7784 = vmatmul.mubr.msk.f32.gmra.mrb[70].mxu0 %vm810_vm1, %v2299_v52 }
 0x383   :  { %6863 = vmatprep.mubr.msk.f32.mxu0 %vm381_vm0, %v6832_v22 }
 0x384   :  { %4028 = vmatmul.mubr.f32.gmra.mrb[236].mxu1 %v7053_v58 }
 0x385   :  { %v11061_v57 = vpop.f32.mrb[154].mxu1  ;;  %7077 = vmatprep.mubr.msk.f32.mxu1 %vm381_vm0, %v7056_v61 }
 0x386   :  { %2663 = vmatmul.mubr.f32.vlgmr.msra.gmra.mrb[72].mxu0 %v6831_v53  ;;  %v3106_v43 = vpop.f32.mrb[155].mxu1  ;;  %v6881_v53 = vld [vmem:[%s12066_s4 + $0xb0] sm:$0xff] }
 0x387   :  { %6864 = vmatprep.mubr.msk.f32.mxu0 %vm381_vm0, %v6834_v55  ;;  %8698 = vmatpush3.bf16.msra.mxu0 %v8695_v7  ;;  %v8699_v55 = vpack.c.bf16 %v6882_v37, %v6881_v53 }
 0x388   :  { %4033 = vmatmul.mubr.f32.gmra.mrb[238].mxu1 %v7055_v60 }
 0x389   :  { %v11077_v56 = vpop.f32.mrb[156].mxu1  ;;  %7078 = vmatprep.mubr.msk.f32.mxu1 %vm381_vm0, %v7058_v0  ;;  %8700 = vmatprep.subr.bf16.mxu0 %v8699_v55 }
 0x38a   :  { %2668 = vmatmul.mubr.f32.gmra.mrb[74].mxu0 %v6833_v47  ;;  %v3111_v54 = vpop.f32.mrb[157].mxu1 }
 0x38b   :  { %6865 = vmatprep.mubr.msk.f32.mxu0 %vm381_vm0, %v6836_v50  ;;  %8702 = vmatpush3.bf16.msra.mxu0 %v8699_v55 }
 0x38c   :  { %4038 = vmatmul.mubr.f32.gmra.mrb[240].mxu1 %v7057_v5 }
 0x38d   :  { %7079 = vmatprep.mubr.msk.f32.mxu1 %vm381_vm0, %v7060_v8  ;;  %v11213_v7 = vpop.f32.mrb[158].mxu1 }
 0x38e   :  { %2673 = vmatmul.mubr.f32.gmra.mrb[76].mxu0 %v6835_v63  ;;  %v3116_v42 = vpop.f32.mrb[159].mxu1 }
 0x38f   :  { %6866 = vmatprep.mubr.msk.f32.mxu0 %vm381_vm0, %v6838_v1 }
 0x390   :  { %4043 = vmatmul.mubr.f32.gmra.mrb[242].mxu1 %v7059_v9 }
 0x391   :  { %7080 = vmatprep.mubr.msk.f32.mxu1 %vm381_vm0, %v7062_v13  ;;  %v11215_v45 = vpop.f32.mrb[160].mxu1 }
 0x392   :  { %2678 = vmatmul.mubr.f32.gmra.mrb[78].mxu0 %v6837_v4  ;;  %v3121_v27 = vpop.f32.mrb[161].mxu1 }
 0x393   :  { %6867 = vmatprep.mubr.msk.f32.mxu0 %vm381_vm0, %v6840_v11 }
 0x394   :  { %4048 = vmatmul.mubr.f32.gmra.mrb[244].mxu1 %v7061_v16 }
 0x395   :  { %7081 = vmatprep.mubr.msk.f32.mxu1 %vm381_vm0, %v7064_v19  ;;  %v11217_v14 = vpop.f32.mrb[162].mxu1 }
 0x396   :  { %2683 = vmatmul.mubr.f32.gmra.mrb[80].mxu0 %v6839_v12  ;;  %v3126_v46 = vpop.f32.mrb[163].mxu1 }
 0x397   :  { %6868 = vmatprep.mubr.msk.f32.mxu0 %vm381_vm0, %v6842_v20 }
 0x398   :  { %4053 = vmatmul.mubr.f32.gmra.mrb[246].mxu1 %v7063_v23 }
 0x399   :  { %7082 = vmatprep.mubr.msk.f32.mxu1 %vm381_vm0, %v7066_v24  ;;  %v11219_v48 = vpop.f32.mrb[164].mxu1 }
 0x39a   :  { %2688 = vmatmul.mubr.f32.gmra.mrb[82].mxu0 %v6841_v15  ;;  %v3131_v31 = vpop.f32.mrb[165].mxu1 }
 0x39b   :  { %6869 = vmatprep.mubr.msk.f32.mxu0 %vm381_vm0, %v6844_v29 }
 0x39c   :  { %4058 = vmatmul.mubr.f32.gmra.mrb[248].mxu1 %v7065_v28  ;;  %v6947_v28 = vld [vmem:[%s12066_s4 + $0xc0] sm:$0xff] }
 0x39d   :  { %v11221_v22 = vpop.f32.mrb[166].mxu1 }
 0x39e   :  { %2693 = vmatmul.mubr.f32.gmra.mrb[84].mxu0 %v6843_v21  ;;  %v3136_v51 = vpop.f32.mrb[167].mxu1 }
 0x39f   :  { %6870 = vmatprep.mubr.msk.f32.mxu0 %vm381_vm0, %v6846_v39 }
 0x3a1   :  { %v11223_v52 = vpop.f32.mrb[168].mxu1 }
 0x3a2   :  { %2698 = vmatmul.mubr.f32.gmra.mrb[86].mxu0 %v6845_v25  ;;  %v3141_v26 = vpop.f32.mrb[169].mxu1 }
 0x3a3   :  { %6871 = vmatprep.mubr.msk.f32.mxu0 %vm381_vm0, %v6848_v49  ;;  %v6948_v49 = vld [vmem:[%s12066_s4 + $0xc8] sm:$0xff] }
 0x3a5   :  { %v11231_v38 = vpop.f32.mrb[170].mxu1 }
 0x3a6   :  { %2703 = vmatmul.mubr.f32.gmra.mrb[88].mxu0 %v6847_v30  ;;  %v3146_v43 = vpop.f32.mrb[171].mxu1  ;;  %v8739_v30 = vpack.c.bf16 %v6948_v49, %v6947_v28  ;;  %v6949_v28 = vld [vmem:[%s12066_s4 + $0xd0] sm:$0xff]  ;;  %v6950_v49 = vld [vmem:[%s12066_s4 + $0xd8] sm:$0xff] }
 0x3a7   :  { %6872 = vmatprep.mubr.msk.f32.mxu0 %vm381_vm0, %v6850_v2 }
 0x3a8   :  { %8740 = vmatprep.subr.bf16.mxu0 %v8739_v30 }
 0x3a9   :  { %v11233_v47 = vpop.f32.mrb[172].mxu1 }
 0x3aa   :  { %2708 = vmatmul.mubr.f32.gmra.mrb[90].mxu0 %v6849_v33  ;;  %v3151_v58 = vpop.f32.mrb[173].mxu1 }
 0x3ab   :  { %6873 = vmatprep.mubr.msk.f32.mxu0 %vm381_vm0, %v6852_v59 }
 0x3ad   :  { %v11235_v50 = vpop.f32.mrb[174].mxu1 }
 0x3ae   :  { %2713 = vmatmul.mubr.f32.gmra.mrb[92].mxu0 %v6851_v34  ;;  %v3156_v61 = vpop.f32.mrb[175].mxu1 }
 0x3af   :  { %6874 = vmatprep.mubr.msk.f32.mxu0 %vm381_vm0, %v6854_v10 }
 0x3b1   :  { %v11237_v54 = vpop.f32.mrb[176].mxu1 }
 0x3b2   :  { %2718 = vmatmul.mubr.f32.gmra.mrb[94].mxu0 %v6853_v35  ;;  %v3161_v63 = vpop.f32.mrb[177].mxu1 }
 0x3b3   :  { %6875 = vmatprep.mubr.msk.f32.mxu0 %vm381_vm0, %v6856_v6 }
 0x3b5   :  { %v11239_v60 = vpop.f32.mrb[178].mxu1 }
 0x3b6   :  { %2723 = vmatmul.mubr.f32.gmra.mrb[96].mxu0 %v6855_v36  ;;  %v3166_v1 = vpop.f32.mrb[179].mxu1 }
 0x3b7   :  { %6876 = vmatprep.mubr.msk.f32.mxu0 %vm381_vm0, %v6858_v18 }
 0x3b9   :  { %v11241_v0 = vpop.f32.mrb[180].mxu1 }
 0x3ba   :  { %2728 = vmatmul.mubr.f32.gmra.mrb[98].mxu0 %v6857_v40  ;;  %v3171_v4 = vpop.f32.mrb[181].mxu1 }
 0x3bb   :  { %6877 = vmatprep.mubr.msk.f32.mxu0 %vm381_vm0, %v6860_v17 }
 0x3bd   :  { %v11243_v5 = vpop.f32.mrb[182].mxu1 }
 0x3be   :  { %2733 = vmatmul.mubr.f32.gmra.mrb[100].mxu0 %v6859_v44  ;;  %v3176_v11 = vpop.f32.mrb[183].mxu1 }
 0x3bf   :  { %6878 = vmatprep.mubr.msk.f32.mxu0 %vm381_vm0, %v6862_v62 }
 0x3c1   :  { %v11245_v8 = vpop.f32.mrb[184].mxu1 }
 0x3c2   :  { %2738 = vmatmul.mubr.f32.gmra.mrb[102].mxu0 %v6861_v41  ;;  %v3181_v12 = vpop.f32.mrb[185].mxu1 }
 0x3c5   :  { %v11247_v9 = vpop.f32.mrb[186].mxu1 }
 0x3c6   :  { %v3546_v20 = vpop.f32.mrb[187].mxu1 }
 0x3c9   :  { %v11249_v13 = vpop.f32.mrb[188].mxu1 }
 0x3ca   :  { %v3551_v15 = vpop.f32.mrb[189].mxu1 }
 0x3cd   :  { %v11251_v16 = vpop.f32.mrb[190].mxu1 }
 0x3ce   :  { %v3556_v29 = vpop.f32.mrb[191].mxu1 }
 0x3d1   :  { %v11253_v19 = vpop.f32.mrb[192].mxu1 }
 0x3d2   :  { %v3561_v21 = vpop.f32.mrb[193].mxu1 }
 0x3d5   :  { %v11255_v23 = vpop.f32.mrb[194].mxu1 }
 0x3d6   :  { %v3566_v39 = vpop.f32.mrb[195].mxu1 }
 0x3d9   :  { %v11257_v24 = vpop.f32.mrb[196].mxu1 }
 0x3da   :  { %v3571_v25 = vpop.f32.mrb[197].mxu1 }
 0x3dd   :  { %v11265_v2 = vpop.f32.mrb[198].mxu1 }
 0x3de   :  { %v3576_v33 = vpop.f32.mrb[199].mxu1 }
 0x3e1   :  { %v11267_v59 = vpop.f32.mrb[200].mxu1 }
 0x3e2   :  { %v3581_v34 = vpop.f32.mrb[201].mxu1 }
 0x3e5   :  { %v11269_v10 = vpop.f32.mrb[202].mxu1 }
 0x3e6   :  { %v3586_v35 = vpop.f32.mrb[203].mxu1 }
 0x3e9   :  { %v11271_v6 = vpop.f32.mrb[204].mxu1 }
 0x3ea   :  { %v3591_v36 = vpop.f32.mrb[205].mxu1 }
 0x3eb   :  { %v8743_v36 = vpack.c.bf16 %v6950_v49, %v6949_v28 }
 0x3ed   :  { %v11273_v18 = vpop.f32.mrb[206].mxu1 }
 0x3ee   :  { %v3596_v40 = vpop.f32.mrb[207].mxu1 }
 0x41f   :  { %v11275_v17 = vpop.f32.mrb[208].mxu1 }
 0x420   :  { %v3601_v44 = vpop.f32.mrb[209].mxu1 }
 0x421   :  { %v7015_v44 = vld [vmem:[%s12066_s4 + $0xe0] sm:$0xff] }
 0x423   :  { %v11277_v62 = vpop.f32.mrb[210].mxu1 }
 0x424   :  { %v3606_v41 = vpop.f32.mrb[211].mxu1 }
 0x425   :  { %v7016_v41 = vld [vmem:[%s12066_s4 + $0xe8] sm:$0xff] }
 0x427   :  { %v11279_v42 = vpop.f32.mrb[212].mxu1 }
 0x428   :  { %v3611_v27 = vpop.f32.mrb[213].mxu1 }
 0x42b   :  { %v11281_v46 = vpop.f32.mrb[214].mxu1 }
 0x42c   :  { %v3616_v31 = vpop.f32.mrb[215].mxu1 }
 0x42f   :  { %v11283_v51 = vpop.f32.mrb[216].mxu1 }
 0x430   :  { %v3621_v26 = vpop.f32.mrb[217].mxu1 }
 0x433   :  { %v11285_v53 = vpop.f32.mrb[218].mxu1 }
 0x434   :  { %v3986_v37 = vpop.f32.mrb[219].mxu1 }
 0x435   :  { %v11319_v37 = vpack.c.bf16 %v7016_v41, %v7015_v44 }
 0x437   :  { %v11287_v55 = vpop.f32.mrb[220].mxu1 }
 0x438   :  { %v3991_v43 = vpop.f32.mrb[221].mxu1 }
 0x43b   :  { %v11289_v58 = vpop.f32.mrb[222].mxu1 }
 0x43c   :  { %v3996_v61 = vpop.f32.mrb[223].mxu1 }
 0x43f   :  { %v11291_v63 = vpop.f32.mrb[224].mxu1 }
 0x440   :  { %v4001_v1 = vpop.f32.mrb[225].mxu1 }
 0x443   :  { %v11293_v4 = vpop.f32.mrb[226].mxu1 }
 0x444   :  { %v4006_v11 = vpop.f32.mrb[227].mxu1 }
 0x447   :  { %v11295_v12 = vpop.f32.mrb[228].mxu1 }
 0x448   :  { %v4011_v20 = vpop.f32.mrb[229].mxu1 }
 0x44b   :  { %v11297_v15 = vpop.f32.mrb[230].mxu1 }
 0x44c   :  { %v4016_v29 = vpop.f32.mrb[231].mxu1 }
 0x44f   :  { %v11299_v21 = vpop.f32.mrb[232].mxu1 }
 0x450   :  { %v4021_v39 = vpop.f32.mrb[233].mxu1 }
 0x453   :  { %v11307_v33 = vpop.f32.mrb[234].mxu1 }
 0x454   :  { %v4026_v35 = vpop.f32.mrb[235].mxu1 }
 0x457   :  { %v11316_v27 = vpop.f32.mrb[236].mxu1 }
 0x458   :  { %v4031_v26 = vpop.f32.mrb[237].mxu1 }
 0x459   :  { %v2664_v25 = vpop.f32.mrb[72].mxu0 }
 0x45a   :  { %v2666_v34 = vpop.f32.mrb[73].mxu0  ;;  %7794 = vmatprep.mubr.msk.f32.mxu0 %vm810_vm1, %v2664_v25 }
 0x45b   :  { %v11321_v61 = vpop.f32.mrb[238].mxu1 }
 0x45c   :  { %v4036_v11 = vpop.f32.mrb[239].mxu1 }
 0x45d   :  { %v2669_v40 = vpop.f32.mrb[74].mxu0 }
 0x45e   :  { %v2671_v31 = vpop.f32.mrb[75].mxu0  ;;  %7795 = vmatmul.mubr.msk.f32.vlgmr.msra.gmra.mrb[56].mxu0 %vm810_vm1, %v2669_v40 }
 0x45f   :  { %8742 = vmatpush3.bf16.msra.mxu0 %v8739_v30  ;;  %v11325_v29 = vpop.f32.mrb[240].mxu1 }
 0x460   :  { %8744 = vmatprep.subr.bf16.mxu0 %v8743_v36  ;;  %v4041_v30 = vpop.f32.mrb[241].mxu1 }
 0x461   :  { %v2674_v43 = vpop.f32.mrb[76].mxu0 }
 0x462   :  { %v2676_v1 = vpop.f32.mrb[77].mxu0  ;;  %7797 = vmatprep.mubr.msk.f32.mxu0 %vm810_vm1, %v2674_v43 }
 0x463   :  { %8746 = vmatpush3.bf16.msra.mxu0 %v8743_v36  ;;  %v11328_v28 = vpop.f32.mrb[242].mxu1 }
 0x464   :  { %8784 = vmatprep.subr.bf16.mxu0 %v11319_v37  ;;  %v4046_v34 = vpop.f32.mrb[243].mxu1 }
 0x465   :  { %v2679_v20 = vpop.f32.mrb[78].mxu0 }
 0x466   :  { %v2681_v39 = vpop.f32.mrb[79].mxu0  ;;  %7798 = vmatmul.mubr.msk.f32.gmra.mrb[58].mxu0 %vm810_vm1, %v2679_v20 }
 0x467   :  { %v11331_v40 = vpop.f32.mrb[244].mxu1 }
 0x468   :  { %v4051_v44 = vpop.f32.mrb[245].mxu1 }
 0x469   :  { %v2684_v25 = vpop.f32.mrb[80].mxu0 }
 0x46a   :  { %v2686_v49 = vpop.f32.mrb[81].mxu0  ;;  %7800 = vmatprep.mubr.msk.f32.mxu0 %vm810_vm1, %v2684_v25 }
 0x46b   :  { %v11334_v31 = vpop.f32.mrb[246].mxu1 }
 0x46c   :  { %v4056_v43 = vpop.f32.mrb[247].mxu1 }
 0x46d   :  { %v2689_v35 = vpop.f32.mrb[82].mxu0 }
 0x46e   :  { %v2691_v36 = vpop.f32.mrb[83].mxu0  ;;  %7801 = vmatmul.mubr.msk.f32.gmra.mrb[60].mxu0 %vm810_vm1, %v2689_v35 }
 0x46f   :  { %v11337_v11 = vpop.f32.mrb[248].mxu1 }
 0x470   :  { %v4061_v39 = vpop.f32.mrb[249].mxu1 }
 0x471   :  { %v2694_v41 = vpop.f32.mrb[84].mxu0 }
 0x472   :  { %v2696_v26 = vpop.f32.mrb[85].mxu0  ;;  %7803 = vmatprep.mubr.msk.f32.mxu0 %vm810_vm1, %v2694_v41 }
 0x475   :  { %v2699_v1 = vpop.f32.mrb[86].mxu0 }
 0x476   :  { %v2701_v20 = vpop.f32.mrb[87].mxu0  ;;  %7804 = vmatmul.mubr.msk.f32.gmra.mrb[62].mxu0 %vm810_vm1, %v2699_v1 }
 0x479   :  { %v2704_v30 = vpop.f32.mrb[88].mxu0 }
 0x47a   :  { %v2706_v25 = vpop.f32.mrb[89].mxu0  ;;  %7806 = vmatprep.mubr.msk.f32.mxu0 %vm810_vm1, %v2704_v30 }
 0x47d   :  { %v2709_v49 = vpop.f32.mrb[90].mxu0 }
 0x47e   :  { %v2711_v34 = vpop.f32.mrb[91].mxu0  ;;  %7807 = vmatmul.mubr.msk.f32.gmra.mrb[64].mxu0 %vm810_vm1, %v2709_v49  ;;  %v7017_v49 = vld [vmem:[%s12066_s4 + $0xf0] sm:$0xff] }
 0x47f   :  { %v7018_v34 = vld [vmem:[%s12066_s4 + $0xf8] sm:$0xff] }
 0x481   :  { %v2714_v35 = vpop.f32.mrb[92].mxu0 }
 0x482   :  { %v2716_v36 = vpop.f32.mrb[93].mxu0  ;;  %7809 = vmatprep.mubr.msk.f32.mxu0 %vm810_vm1, %v2714_v35 }
 0x483   :  { %v8787_v36 = vpack.c.bf16 %v7018_v34, %v7017_v49 }
 0x485   :  { %v2719_v44 = vpop.f32.mrb[94].mxu0 }
 0x486   :  { %v2721_v41 = vpop.f32.mrb[95].mxu0  ;;  %7810 = vmatmul.mubr.msk.f32.gmra.mrb[66].mxu0 %vm810_vm1, %v2719_v44  ;;  %v7083_v44 = vld [vmem:[%s12066_s4 + $0x100] sm:$0xff] }
 0x487   :  { %v7084_v41 = vld [vmem:[%s12066_s4 + $0x108] sm:$0xff] }
 0x489   :  { %v2724_v26 = vpop.f32.mrb[96].mxu0 }
 0x48a   :  { %v2726_v43 = vpop.f32.mrb[97].mxu0  ;;  %7812 = vmatprep.mubr.msk.f32.mxu0 %vm810_vm1, %v2724_v26  ;;  %v8827_v26 = vpack.c.bf16 %v7084_v41, %v7083_v44 }
 0x48d   :  { %v2729_v1 = vpop.f32.mrb[98].mxu0 }
 0x48e   :  { %v2731_v20 = vpop.f32.mrb[99].mxu0  ;;  %7813 = vmatmul.mubr.msk.f32.gmra.mrb[68].mxu0 %vm810_vm1, %v2729_v1 }
 0x491   :  { %v2734_v39 = vpop.f32.mrb[100].mxu0 }
 0x492   :  { %v2736_v30 = vpop.f32.mrb[101].mxu0  ;;  %7815 = vmatprep.mubr.msk.f32.mxu0 %vm810_vm1, %v2734_v39 }
 0x495   :  { %v2739_v25 = vpop.f32.mrb[102].mxu0 }
 0x496   :  { %v2741_v35 = vpop.f32.mrb[103].mxu0  ;;  %7816 = vmatmul.mubr.msk.f32.gmra.mrb[70].mxu0 %vm810_vm1, %v2739_v25 }
 0x497   :  { %7826 = vmatprep.mubr.msk.f32.mxu0 %vm810_vm1, %v11061_v57  ;;  %v7085_v57 = vld [vmem:[%s12066_s4 + $0x110] sm:$0xff] }
 0x49a   :  { %7827 = vmatmul.mubr.msk.f32.vlgmr.msra.gmra.mrb[56].mxu0 %vm810_vm1, %v11077_v56  ;;  %v7086_v56 = vld [vmem:[%s12066_s4 + $0x118] sm:$0xff] }
 0x49b   :  { %7829 = vmatprep.mubr.msk.f32.mxu0 %vm810_vm1, %v11213_v7  ;;  %8786 = vmatpush3.bf16.msra.mxu0 %v11319_v37  ;;  %v8831_v7 = vpack.c.bf16 %v7086_v56, %v7085_v57  ;;  %v4317_v57 = vld [vmem:[%s12068_s6 + $0x8] sm:$0xff] }
 0x49c   :  { %8788 = vmatprep.subr.bf16.mxu0 %v8787_v36  ;;  %v7105_v56 = vld [vmem:[%s12068_s6 + $0x28] sm:$0xff] }
 0x49e   :  { %7830 = vmatmul.mubr.msk.f32.gmra.mrb[58].mxu0 %vm810_vm1, %v11215_v45  ;;  %v4316_v45 = vld [vmem:[%s12068_s6] sm:$0xff] }
 0x49f   :  { %7832 = vmatprep.mubr.msk.f32.mxu0 %vm810_vm1, %v11217_v14  ;;  %8790 = vmatpush3.bf16.msra.mxu0 %v8787_v36  ;;  %v7104_v14 = vld [vmem:[%s12068_s6 + $0x20] sm:$0xff] }
 0x4a0   :  { %8828 = vmatprep.subr.bf16.mxu0 %v8827_v26  ;;  %7984 = vmatprep.mubr.f32.mxu1 %v7104_v14  ;;  %v4319_v14 = vld [vmem:[%s12068_s6 + $0x18] sm:$0xff] }
 0x4a2   :  { %7833 = vmatmul.mubr.msk.f32.gmra.mrb[60].mxu0 %vm810_vm1, %v11219_v48  ;;  %v11472_v48 = vld [vmem:[%s12067_s5] ss:$0 sm:$0xff] }
 0x4a3   :  { %7835 = vmatprep.mubr.msk.f32.mxu0 %vm810_vm1, %v11221_v22 }
 0x4a6   :  { %7836 = vmatmul.mubr.msk.f32.gmra.mrb[62].mxu0 %vm810_vm1, %v11223_v52 }
 0x4a7   :  { %7838 = vmatprep.mubr.msk.f32.mxu0 %vm810_vm1, %v11231_v38 }
 0x4aa   :  { %7839 = vmatmul.mubr.msk.f32.gmra.mrb[64].mxu0 %vm810_vm1, %v11233_v47 }
 0x4ab   :  { %7841 = vmatprep.mubr.msk.f32.mxu0 %vm810_vm1, %v11235_v50 }
 0x4ae   :  { %7842 = vmatmul.mubr.msk.f32.gmra.mrb[66].mxu0 %vm810_vm1, %v11237_v54 }
 0x4af   :  { %7844 = vmatprep.mubr.msk.f32.mxu0 %vm810_vm1, %v11239_v60 }
 0x4b2   :  { %7845 = vmatmul.mubr.msk.f32.gmra.mrb[68].mxu0 %vm810_vm1, %v11241_v0 }
 0x4b3   :  { %7847 = vmatprep.mubr.msk.f32.mxu0 %vm810_vm1, %v11243_v5 }
 0x4b6   :  { %7848 = vmatmul.mubr.msk.f32.gmra.mrb[70].mxu0 %vm810_vm1, %v11245_v8 }
 0x4b7   :  { %7858 = vmatprep.mubr.msk.f32.mxu0 %vm810_vm1, %v11247_v9 }
 0x4ba   :  { %7859 = vmatmul.mubr.msk.f32.vlgmr.msra.gmra.mrb[56].mxu0 %vm810_vm1, %v11249_v13 }
 0x4bb   :  { %7861 = vmatprep.mubr.msk.f32.mxu0 %vm810_vm1, %v11251_v16  ;;  %8830 = vmatpush3.bf16.msra.mxu0 %v8827_v26 }
 0x4bc   :  { %8832 = vmatprep.subr.bf16.mxu0 %v8831_v7 }
 0x4be   :  { %7862 = vmatmul.mubr.msk.f32.gmra.mrb[58].mxu0 %vm810_vm1, %v11253_v19 }
 0x4bf   :  { %7864 = vmatprep.mubr.msk.f32.mxu0 %vm810_vm1, %v11255_v23  ;;  %8834 = vmatpush3.bf16.msra.mxu0 %v8831_v7  ;;  %v4318_v7 = vld [vmem:[%s12068_s6 + $0x10] sm:$0xff] }
 0x4c2   :  { %7865 = vmatmul.mubr.msk.f32.gmra.mrb[60].mxu0 %vm810_vm1, %v11257_v24 }
 0x4c3   :  { %7867 = vmatprep.mubr.msk.f32.mxu0 %vm810_vm1, %v11265_v2 }
 0x4c6   :  { %7868 = vmatmul.mubr.msk.f32.gmra.mrb[62].mxu0 %vm810_vm1, %v11267_v59 }
 0x4c7   :  { %7870 = vmatprep.mubr.msk.f32.mxu0 %vm810_vm1, %v11269_v10 }
 0x4ca   :  { %7871 = vmatmul.mubr.msk.f32.gmra.mrb[64].mxu0 %vm810_vm1, %v11271_v6 }
 0x4cb   :  { %7873 = vmatprep.mubr.msk.f32.mxu0 %vm810_vm1, %v11273_v18 }
 0x4ce   :  { %7874 = vmatmul.mubr.msk.f32.gmra.mrb[66].mxu0 %vm810_vm1, %v11275_v17 }
 0x4cf   :  { %7876 = vmatprep.mubr.msk.f32.mxu0 %vm810_vm1, %v11277_v62 }
 0x4d2   :  { %7877 = vmatmul.mubr.msk.f32.gmra.mrb[68].mxu0 %vm810_vm1, %v11279_v42 }
 0x4d3   :  { %7879 = vmatprep.mubr.msk.f32.mxu0 %vm810_vm1, %v11281_v46 }
 0x4d6   :  { %7880 = vmatmul.mubr.msk.f32.gmra.mrb[70].mxu0 %vm810_vm1, %v11283_v51 }
 0x4d7   :  { %7890 = vmatprep.mubr.msk.f32.mxu0 %vm810_vm1, %v11285_v53 }
 0x4da   :  { %7891 = vmatmul.mubr.msk.f32.vlgmr.msra.gmra.mrb[56].mxu0 %vm810_vm1, %v11287_v55 }
 0x4db   :  { %7893 = vmatprep.mubr.msk.f32.mxu0 %vm810_vm1, %v11289_v58 }
 0x4de   :  { %7894 = vmatmul.mubr.msk.f32.gmra.mrb[58].mxu0 %vm810_vm1, %v11291_v63 }
 0x4df   :  { %7896 = vmatprep.mubr.msk.f32.mxu0 %vm810_vm1, %v11293_v4 }
 0x4e2   :  { %7897 = vmatmul.mubr.msk.f32.gmra.mrb[60].mxu0 %vm810_vm1, %v11295_v12 }
 0x4e3   :  { %7899 = vmatprep.mubr.msk.f32.mxu0 %vm810_vm1, %v11297_v15 }
 0x4e6   :  { %7900 = vmatmul.mubr.msk.f32.gmra.mrb[62].mxu0 %vm810_vm1, %v11299_v21 }
 0x4e7   :  { %7902 = vmatprep.mubr.msk.f32.mxu0 %vm810_vm1, %v11307_v33 }
 0x4ea   :  { %7903 = vmatmul.mubr.msk.f32.gmra.mrb[64].mxu0 %vm810_vm1, %v11316_v27 }
 0x4eb   :  { %7905 = vmatprep.mubr.msk.f32.mxu0 %vm810_vm1, %v11321_v61 }
 0x4ee   :  { %7906 = vmatmul.mubr.msk.f32.gmra.mrb[66].mxu0 %vm810_vm1, %v11325_v29 }
 0x4ef   :  { %7908 = vmatprep.mubr.msk.f32.mxu0 %vm810_vm1, %v11328_v28 }
 0x4f2   :  { %7909 = vmatmul.mubr.msk.f32.gmra.mrb[68].mxu0 %vm810_vm1, %v11331_v40 }
 0x4f3   :  { %7911 = vmatprep.mubr.msk.f32.mxu0 %vm810_vm1, %v11334_v31 }
 0x4f6   :  { %7912 = vmatmul.mubr.msk.f32.gmra.mrb[70].mxu0 %vm810_vm1, %v11337_v11 }
 0x4f7   :  { %7946 = vmatprep.mubr.f32.mxu0 %v4316_v45  ;;  %v7106_v45 = vld [vmem:[%s12068_s6 + $0x30] sm:$0xff] }
 0x5ad   :  { %v7892_v22 = vpop.f32.mrb[56].mxu0 }
 0x5ae   :  { %v4285_v52 = vadd.f32 %v7892_v22, %v11472_v48  ;;  %v4182_v38 = vpop.f32.mrb[57].mxu0  ;;  %v7108_v22 = vld [vmem:[%s12068_s6 + $0x40] sm:$0xff] }
 0x5af   :  { %v4284_v47 = vadd.f32 %v11472_v48, %v4182_v38  ;;  %v7109_v38 = vld [vmem:[%s12068_s6 + $0x48] sm:$0xff] }
 0x5b0   :  { %v4301_v50 = vmax.f32 %v4285_v52, 0.0  ;;  %v7112_v52 = vld [vmem:[%s12068_s6 + $0x60] sm:$0xff] }
 0x5b1   :  { %v4300_v54 = vmax.f32 %v4284_v47, 0.0  ;;  %v7895_v60 = vpop.f32.mrb[58].mxu0  ;;  %v7113_v47 = vld [vmem:[%s12068_s6 + $0x68] sm:$0xff] }
 0x5b2   :  { %v4287_v0 = vadd.f32 %v7895_v60, %v11472_v48  ;;  %v4192_v5 = vpop.f32.mrb[59].mxu0  ;;  %v7111_v60 = vld [vmem:[%s12068_s6 + $0x58] sm:$0xff] }
 0x5b3   :  { %v11477_v8 = vpack.c.bf16 %v4301_v50, %v4300_v54  ;;  %v4286_v9 = vadd.f32 %v11472_v48, %v4192_v5  ;;  %v7110_v50 = vld [vmem:[%s12068_s6 + $0x50] sm:$0xff]  ;;  %v4761_v5 = vld [vmem:[%s12070_s8] sm:$0xff] }
 0x5b4   :  { %v4303_v13 = vmax.f32 %v4287_v0, 0.0  ;;  %v7114_v54 = vld [vmem:[%s12068_s6 + $0x70] sm:$0xff]  ;;  %v7115_v0 = vld [vmem:[%s12068_s6 + $0x78] sm:$0xff] }
 0x5b5   :  { %v4302_v16 = vmax.f32 %v4286_v9, 0.0  ;;  %v7898_v19 = vpop.f32.mrb[60].mxu0  ;;  %8836 = vmatprep.subr.bf16.mxu0 %v11477_v8  ;;  %8868 = vmatprep.subr.bf16.mxu1 %v11477_v8  ;;  %v4763_v9 = vld [vmem:[%s12070_s8 + $0x10] sm:$0xff] }
 0x5b6   :  { %v4289_v23 = vadd.f32 %v7898_v19, %v11472_v48  ;;  %v4202_v24 = vpop.f32.mrb[61].mxu0  ;;  %8838 = vmatpush3.bf16.msra.mxu0 %v11477_v8  ;;  %8870 = vmatpush3.bf16.msra.mxu1 %v11477_v8 }
 0x5b7   :  { %v11485_v2 = vpack.c.bf16 %v4303_v13, %v4302_v16  ;;  %v4288_v59 = vadd.f32 %v11472_v48, %v4202_v24  ;;  %v4764_v16 = vld [vmem:[%s12070_s8 + $0x18] sm:$0xff]  ;;  %v4766_v24 = vld [vmem:[%s12070_s8 + $0x28] sm:$0xff] }
 0x5b8   :  { %v4305_v10 = vmax.f32 %v4289_v23, 0.0  ;;  %v8991_v19 = vpack.c.bf16 %v4764_v16, %v4763_v9  ;;  %v4765_v23 = vld [vmem:[%s12070_s8 + $0x20] sm:$0xff]  ;;  %v7145_v9 = vld [vmem:[%s12070_s8 + $0xd8] sm:$0xff] }
 0x5b9   :  { %v4304_v6 = vmax.f32 %v4288_v59, 0.0  ;;  %v7901_v18 = vpop.f32.mrb[62].mxu0  ;;  %8840 = vmatprep.subr.bf16.mxu0 %v11485_v2  ;;  %8872 = vmatprep.subr.bf16.mxu1 %v11485_v2  ;;  %v4767_v59 = vld [vmem:[%s12070_s8 + $0x30] sm:$0xff] }
 0x5ba   :  { %v4291_v17 = vadd.f32 %v7901_v18, %v11472_v48  ;;  %v4212_v62 = vpop.f32.mrb[63].mxu0  ;;  %8842 = vmatpush3.bf16.msra.mxu0 %v11485_v2  ;;  %8874 = vmatpush3.bf16.msra.mxu1 %v11485_v2 }
 0x5bb   :  { %v11493_v42 = vpack.c.bf16 %v4305_v10, %v4304_v6  ;;  %v4290_v46 = vadd.f32 %v11472_v48, %v4212_v62  ;;  %v4768_v10 = vld [vmem:[%s12070_s8 + $0x38] sm:$0xff] }
 0x5bc   :  { %v4307_v51 = vmax.f32 %v4291_v17, 0.0  ;;  %v8997_v6 = vpack.c.bf16 %v4768_v10, %v4767_v59  ;;  %v7129_v59 = vld [vmem:[%s12069_s7 + $0x10] sm:$0xff] }
 0x5bd   :  { %v4306_v53 = vmax.f32 %v4290_v46, 0.0  ;;  %v7904_v55 = vpop.f32.mrb[64].mxu0  ;;  %8844 = vmatprep.subr.bf16.mxu0 %v11493_v42  ;;  %8876 = vmatprep.subr.bf16.mxu1 %v11493_v42 }
 0x5be   :  { %v4293_v58 = vadd.f32 %v7904_v55, %v11472_v48  ;;  %v4222_v63 = vpop.f32.mrb[65].mxu0  ;;  %8846 = vmatpush3.bf16.msra.mxu0 %v11493_v42  ;;  %8878 = vmatpush3.bf16.msra.mxu1 %v11493_v42 }
 0x5bf   :  { %v11501_v4 = vpack.c.bf16 %v4307_v51, %v4306_v53  ;;  %v4292_v12 = vadd.f32 %v11472_v48, %v4222_v63 }
 0x5c0   :  { %v4309_v15 = vmax.f32 %v4293_v58, 0.0 }
 0x5c1   :  { %v4308_v21 = vmax.f32 %v4292_v12, 0.0  ;;  %v7907_v33 = vpop.f32.mrb[66].mxu0  ;;  %8848 = vmatprep.subr.bf16.mxu0 %v11501_v4  ;;  %8880 = vmatprep.subr.bf16.mxu1 %v11501_v4 }
 0x5c2   :  { %v4295_v27 = vadd.f32 %v7907_v33, %v11472_v48  ;;  %v4232_v37 = vpop.f32.mrb[67].mxu0  ;;  %8850 = vmatpush3.bf16.msra.mxu0 %v11501_v4  ;;  %8882 = vmatpush3.bf16.msra.mxu1 %v11501_v4 }
 0x5c3   :  { %v11509_v61 = vpack.c.bf16 %v4309_v15, %v4308_v21  ;;  %v4294_v29 = vadd.f32 %v11472_v48, %v4232_v37 }
 0x5c4   :  { %v4311_v28 = vmax.f32 %v4295_v27, 0.0 }
 0x5c5   :  { %v4310_v40 = vmax.f32 %v4294_v29, 0.0  ;;  %v7910_v31 = vpop.f32.mrb[68].mxu0  ;;  %8852 = vmatprep.subr.bf16.mxu0 %v11509_v61  ;;  %8884 = vmatprep.subr.bf16.mxu1 %v11509_v61 }
 0x5c6   :  { %v4297_v11 = vadd.f32 %v7910_v31, %v11472_v48  ;;  %v4242_v43 = vpop.f32.mrb[69].mxu0  ;;  %8854 = vmatpush3.bf16.msra.mxu0 %v11509_v61  ;;  %8886 = vmatpush3.bf16.msra.mxu1 %v11509_v61 }
 0x5c7   :  { %v8855_v1 = vpack.c.bf16 %v4311_v28, %v4310_v40  ;;  %v4296_v20 = vadd.f32 %v11472_v48, %v4242_v43 }
 0x5c8   :  { %v4313_v39 = vmax.f32 %v4297_v11, 0.0 }
 0x5c9   :  { %v4312_v30 = vmax.f32 %v4296_v20, 0.0  ;;  %v7913_v25 = vpop.f32.mrb[70].mxu0  ;;  %8856 = vmatprep.subr.bf16.mxu0 %v8855_v1  ;;  %8888 = vmatprep.subr.bf16.mxu1 %v8855_v1 }
 0x5ca   :  { %v4299_v49 = vadd.f32 %v7913_v25, %v11472_v48  ;;  %v4252_v34 = vpop.f32.mrb[71].mxu0  ;;  %8858 = vmatpush3.bf16.msra.mxu0 %v8855_v1  ;;  %8890 = vmatpush3.bf16.msra.mxu1 %v8855_v1 }
 0x5cb   :  { %v8859_v35 = vpack.c.bf16 %v4313_v39, %v4312_v30  ;;  %v4298_v36 = vadd.f32 %v11472_v48, %v4252_v34  ;;  %v7107_v48 = vld [vmem:[%s12068_s6 + $0x38] sm:$0xff]  ;;  %v4687_v34 = vld [vmem:[%s12069_s7] sm:$0xff] }
 0x5cc   :  { %v4315_v44 = vmax.f32 %v4299_v49, 0.0 }
 0x5cd   :  { %v4314_v41 = vmax.f32 %v4298_v36, 0.0  ;;  %8860 = vmatprep.subr.bf16.mxu0 %v8859_v35  ;;  %8892 = vmatprep.subr.bf16.mxu1 %v8859_v35  ;;  %v7120_v36 = vld [vmem:[%s12070_s8 + $0x48] sm:$0xff] }
 0x5ce   :  { %8862 = vmatpush3.bf16.msra.mxu0 %v8859_v35  ;;  %8894 = vmatpush3.bf16.msra.mxu1 %v8859_v35 }
 0x5cf   :  { %v8863_v26 = vpack.c.bf16 %v4315_v44, %v4314_v41  ;;  %v7117_v44 = vld [vmem:[%s12069_s7 + $0x8] sm:$0xff] }
 0x5d1   :  { %8864 = vmatprep.subr.bf16.mxu0 %v8863_v26  ;;  %8896 = vmatprep.subr.bf16.mxu1 %v8863_v26 }
 0x5d2   :  { %8866 = vmatpush3.bf16.msra.mxu0 %v8863_v26  ;;  %8898 = vmatpush3.bf16.msra.mxu1 %v8863_v26 }
 0x5d3   :  { %8900 = vmatprep.subr.bf16.mxu0 %v11477_v8  ;;  %8932 = vmatprep.subr.bf16.mxu1 %v11477_v8 }
 0x5d5   :  { %7947 = vmatmul.mubr.f32.vlgmr.msra.gmra.mrb[104].mxu0 %v4317_v57  ;;  %7985 = vmatmul.mubr.f32.vlgmr.msra.gmra.mrb[250].mxu1 %v7105_v56  ;;  %v7122_v57 = vld [vmem:[%s12070_s8 + $0x58] sm:$0xff] }
 0x5d6   :  { %8902 = vmatpush3.bf16.msra.mxu0 %v11477_v8  ;;  %8934 = vmatpush3.bf16.msra.mxu1 %v11477_v8  ;;  %v4762_v8 = vld [vmem:[%s12070_s8 + $0x8] sm:$0xff] }
 0x5d7   :  { %8904 = vmatprep.subr.bf16.mxu0 %v11485_v2  ;;  %8936 = vmatprep.subr.bf16.mxu1 %v11485_v2  ;;  %v8988_v13 = vpack.c.bf16 %v4762_v8, %v4761_v5  ;;  %v7144_v8 = vld [vmem:[%s12070_s8 + $0xd0] sm:$0xff] }
 0x5d8   :  { %7949 = vmatprep.mubr.f32.mxu0 %v4318_v7  ;;  %7987 = vmatprep.mubr.f32.mxu1 %v7106_v45  ;;  %v7123_v7 = vld [vmem:[%s12070_s8 + $0x60] sm:$0xff]  ;;  %v7124_v45 = vld [vmem:[%s12070_s8 + $0x68] sm:$0xff]  ;;  %v9027_v16 = vpack.c.bf16 %v7145_v9, %v7144_v8 }
 0x5d9   :  { %7950 = vmatmul.mubr.f32.gmra.mrb[106].mxu0 %v4319_v14  ;;  %7988 = vmatmul.mubr.f32.gmra.mrb[252].mxu1 %v7107_v48  ;;  %v8982_v14 = vpack.c.bf16 %v7124_v45, %v7123_v7  ;;  %v7125_v48 = vld [vmem:[%s12070_s8 + $0x70] sm:$0xff]  ;;  %v7156_v7 = vld [vmem:[%s12070_s8 + $0x118] sm:$0xff] }
 0x5da   :  { %8906 = vmatpush3.bf16.msra.mxu0 %v11485_v2  ;;  %8938 = vmatpush3.bf16.msra.mxu1 %v11485_v2  ;;  %v8994_v2 = vpack.c.bf16 %v4766_v24, %v4765_v23  ;;  %v7132_v23 = vld [vmem:[%s12070_s8 + $0x88] sm:$0xff]  ;;  %v7146_v24 = vld [vmem:[%s12070_s8 + $0xe0] sm:$0xff]  ;;  %v7170_v45 = vld [vmem:[%s12070_s8 + $0x170] sm:$0xff] }
 0x5db   :  { %8908 = vmatprep.subr.bf16.mxu0 %v11493_v42  ;;  %8940 = vmatprep.subr.bf16.mxu1 %v11493_v42 }
 0x5dc   :  { %8022 = vmatprep.mubr.f32.mxu0 %v7108_v22  ;;  %8060 = vmatprep.mubr.f32.mxu1 %v7112_v52  ;;  %v7126_v22 = vld [vmem:[%s12070_s8 + $0x78] sm:$0xff] }
 0x5dd   :  { %v8985_v52 = vpack.c.bf16 %v7126_v22, %v7125_v48 }
 0x5de   :  { %8910 = vmatpush3.bf16.msra.mxu0 %v11493_v42  ;;  %8942 = vmatpush3.bf16.msra.mxu1 %v11493_v42 }
 0x5df   :  { %8912 = vmatprep.subr.bf16.mxu0 %v11501_v4  ;;  %8944 = vmatprep.subr.bf16.mxu1 %v11501_v4 }
 0x5e2   :  { %8914 = vmatpush3.bf16.msra.mxu0 %v11501_v4  ;;  %8946 = vmatpush3.bf16.msra.mxu1 %v11501_v4 }
 0x5e3   :  { %8916 = vmatprep.subr.bf16.mxu0 %v11509_v61  ;;  %8948 = vmatprep.subr.bf16.mxu1 %v11509_v61 }
 0x5e6   :  { %8918 = vmatpush3.bf16.msra.mxu0 %v11509_v61  ;;  %8950 = vmatpush3.bf16.msra.mxu1 %v11509_v61 }
 0x5e7   :  { %8920 = vmatprep.subr.bf16.mxu0 %v8855_v1  ;;  %8952 = vmatprep.subr.bf16.mxu1 %v8855_v1 }
 0x5ea   :  { %8922 = vmatpush3.bf16.msra.mxu0 %v8855_v1  ;;  %8954 = vmatpush3.bf16.msra.mxu1 %v8855_v1 }
 0x5eb   :  { %8924 = vmatprep.subr.bf16.mxu0 %v8859_v35  ;;  %8956 = vmatprep.subr.bf16.mxu1 %v8859_v35 }
 0x5ee   :  { %8926 = vmatpush3.bf16.msra.mxu0 %v8859_v35  ;;  %8958 = vmatpush3.bf16.msra.mxu1 %v8859_v35  ;;  %v7119_v35 = vld [vmem:[%s12070_s8 + $0x40] sm:$0xff] }
 0x5ef   :  { %8928 = vmatprep.subr.bf16.mxu0 %v8863_v26  ;;  %8960 = vmatprep.subr.bf16.mxu1 %v8863_v26  ;;  %v8976_v41 = vpack.c.bf16 %v7120_v36, %v7119_v35  ;;  %v7154_v35 = vld [vmem:[%s12070_s8 + $0x108] sm:$0xff]  ;;  %v7168_v36 = vld [vmem:[%s12070_s8 + $0x160] sm:$0xff] }
 0x5f2   :  { %8930 = vmatpush3.bf16.msra.mxu0 %v8863_v26  ;;  %8962 = vmatpush3.bf16.msra.mxu1 %v8863_v26  ;;  %v7121_v26 = vld [vmem:[%s12070_s8 + $0x50] sm:$0xff] }
 0x5f3   :  { %8963 = vmatprep.subr.bf16.mxu0 %v9331_v3  ;;  %8987 = vmatprep.subr.bf16.mxu1 %v9331_v3  ;;  %v8979_v56 = vpack.c.bf16 %v7122_v57, %v7121_v26 }
 0x5f5   :  { %8023 = vmatmul.mubr.f32.vlgmr.msra.gmra.mrb[108].mxu0 %v7109_v38  ;;  %8061 = vmatmul.mubr.f32.vlgmr.msra.gmra.mrb[254].mxu1 %v7113_v47 }
 0x5f6   :  { %8025 = vmatprep.mubr.f32.mxu0 %v7110_v50  ;;  %8063 = vmatprep.mubr.f32.mxu1 %v7114_v54  ;;  %v7142_v50 = vld [vmem:[%s12070_s8 + $0xc0] sm:$0xff]  ;;  %v7143_v54 = vld [vmem:[%s12070_s8 + $0xc8] sm:$0xff] }
 0x5f7   :  { %8989 = vmatpush3.bf16.msra.mxu1 %v8988_v13 }
 0x5f8   :  { %8990 = vmatprep.subr.bf16.mxu1 %v9331_v3 }
 0x5f9   :  { %8026 = vmatmul.mubr.f32.gmra.mrb[110].mxu0 %v7111_v60  ;;  %8064 = vmatmul.mubr.f32.gmra.mrb[0].mxu1 %v7115_v0  ;;  %v7140_v60 = vld [vmem:[%s12069_s7 + $0x18] sm:$0xff]  ;;  %v9024_v0 = vpack.c.bf16 %v7143_v54, %v7142_v50  ;;  %v7159_v50 = vld [vmem:[%s12070_s8 + $0x130] sm:$0xff] }
 0x5fa   :  { %8074 = vmatprep.mubr.msk.f32.mxu0 %vm9333_vm2, %v9332_v32  ;;  %8123 = vmatprep.mubr.msk.f32.mxu1 %vm9333_vm2, %v9332_v32  ;;  %v7160_v54 = vld [vmem:[%s12070_s8 + $0x138] sm:$0xff] }
 0x5fb   :  { %8992 = vmatpush3.bf16.msra.mxu1 %v8991_v19  ;;  %v7131_v19 = vld [vmem:[%s12070_s8 + $0x80] sm:$0xff] }
 0x5fc   :  { %8993 = vmatprep.subr.bf16.mxu1 %v9331_v3  ;;  %v9006_v10 = vpack.c.bf16 %v7132_v23, %v7131_v19 }
 0x5ff   :  { %8995 = vmatpush3.bf16.msra.mxu1 %v8994_v2  ;;  %v7147_v2 = vld [vmem:[%s12070_s8 + $0xe8] sm:$0xff] }
 0x600   :  { %8996 = vmatprep.subr.bf16.mxu1 %v9331_v3 }
 0x603   :  { %8998 = vmatpush3.bf16.msra.mxu1 %v8997_v6  ;;  %v9030_v6 = vpack.c.bf16 %v7147_v2, %v7146_v24  ;;  %v7186_v24 = vld [vmem:[%s12070_s8 + $0x1c0] sm:$0xff]  ;;  %v7187_v2 = vld [vmem:[%s12070_s8 + $0x1c8] sm:$0xff] }
 0x604   :  { %9017 = vmatprep.subr.bf16.mxu1 %v9331_v3 }
 0x6a8   :  { %v7948_v18 = vpop.f32.mrb[104].mxu0  ;;  %v7986_v17 = vpop.f32.mrb[250].mxu1 }
 0x6a9   :  { %v4496_v62 = vmax.f32 %v7948_v18, %v7986_v17  ;;  %v4386_v42 = vpop.f32.mrb[105].mxu0  ;;  %v4476_v46 = vpop.f32.mrb[251].mxu1  ;;  %v7133_v18 = vld [vmem:[%s12070_s8 + $0x90] sm:$0xff]  ;;  %v7134_v17 = vld [vmem:[%s12070_s8 + $0x98] sm:$0xff] }
 0x6aa   :  { %v4495_v51 = vmax.f32 %v4386_v42, %v4476_v46  ;;  %v7149_v42 = vld [vmem:[%s12070_s8 + $0xf8] sm:$0xff]  ;;  %v9009_v46 = vpack.c.bf16 %v7134_v17, %v7133_v18  ;;  %v7188_v18 = vld [vmem:[%s12070_s8 + $0x1d0] sm:$0xff] }
 0x6ab   :  { %v7189_v17 = vld [vmem:[%s12070_s8 + $0x1d8] sm:$0xff] }
 0x6ac   :  { %v7951_v53 = vpop.f32.mrb[106].mxu0  ;;  %v7989_v55 = vpop.f32.mrb[252].mxu1 }
 0x6ad   :  { %v4396_v58 = vpop.f32.mrb[107].mxu0  ;;  %v4498_v63 = vmax.f32 %v7951_v53, %v7989_v55  ;;  %v4486_v4 = vpop.f32.mrb[253].mxu1  ;;  %v7135_v53 = vld [vmem:[%s12070_s8 + $0xa0] sm:$0xff]  ;;  %v7136_v55 = vld [vmem:[%s12070_s8 + $0xa8] sm:$0xff] }
 0x6ae   :  { %v4497_v12 = vmax.f32 %v4396_v58, %v4486_v4  ;;  %v9012_v58 = vpack.c.bf16 %v7136_v55, %v7135_v53  ;;  %v7138_v4 = vld [vmem:[%s12070_s8 + $0xb8] sm:$0xff]  ;;  %v7173_v53 = vld [vmem:[%s12069_s7 + $0x30] sm:$0xff] }
 0x6c8   :  { %v8024_v15 = vpop.f32.mrb[108].mxu0  ;;  %v8062_v21 = vpop.f32.mrb[254].mxu1 }
 0x6c9   :  { %v4590_v33 = vmax.f32 %v4496_v62, %v8024_v15  ;;  %v4570_v27 = vpop.f32.mrb[109].mxu0  ;;  %v4664_v37 = vpop.f32.mrb[255].mxu1  ;;  %v7148_v62 = vld [vmem:[%s12070_s8 + $0xf0] sm:$0xff] }
 0x6ca   :  { %v4589_v61 = vmax.f32 %v4495_v51, %v4570_v27  ;;  %v9033_v51 = vpack.c.bf16 %v7149_v42, %v7148_v62  ;;  %v7175_v42 = vld [vmem:[%s12070_s8 + $0x180] sm:$0xff] }
 0x6cb   :  { %v4684_v29 = vmax.f32 %v4590_v33, %v8062_v21 }
 0x6cc   :  { %v4683_v28 = vmax.f32 %v4589_v61, %v4664_v37  ;;  %v8027_v40 = vpop.f32.mrb[110].mxu0  ;;  %v8065_v31 = vpop.f32.mrb[0].mxu1 }
 0x6cd   :  { %v4592_v11 = vmax.f32 %v4498_v63, %v8027_v40  ;;  %v4580_v43 = vpop.f32.mrb[111].mxu0  ;;  %v4674_v1 = vpop.f32.mrb[1].mxu1  ;;  %v7137_v63 = vld [vmem:[%s12070_s8 + $0xb0] sm:$0xff]  ;;  %v7165_v40 = vld [vmem:[%s12070_s8 + $0x148] sm:$0xff] }
 0x6ce   :  { %v11616_v20 = vpack.c.bf16 %v4684_v29, %v4683_v28  ;;  %v4591_v39 = vmax.f32 %v4497_v12, %v4580_v43  ;;  %v9015_v12 = vpack.c.bf16 %v7138_v4, %v7137_v63  ;;  %v7164_v28 = vld [vmem:[%s12070_s8 + $0x140] sm:$0xff]  ;;  %v7178_v63 = vld [vmem:[%s12070_s8 + $0x198] sm:$0xff] }
 0x6cf   :  { %v4686_v30 = vmax.f32 %v4592_v11, %v8065_v31  ;;  %v7162_v31 = vld [vmem:[%s12069_s7 + $0x28] sm:$0xff]  ;;  %v9060_v11 = vpack.c.bf16 %v7165_v40, %v7164_v28  ;;  %v7192_v40 = vld [vmem:[%s12070_s8 + $0x1f0] sm:$0xff] }
 0x6d0   :  { %v4685_v25 = vmax.f32 %v4591_v39, %v4674_v1  ;;  %8965 = vmatpush3.bf16.msra.mxu0 %v11616_v20  ;;  %v7166_v1 = vld [vmem:[%s12070_s8 + $0x150] sm:$0xff]  ;;  %v7167_v39 = vld [vmem:[%s12070_s8 + $0x158] sm:$0xff] }
 0x6d1   :  { %8966 = vmatprep.subr.bf16.mxu0 %v9331_v3 }
 0x6d2   :  { %v11620_v49 = vpack.c.bf16 %v4686_v30, %v4685_v25  ;;  %v9063_v25 = vpack.c.bf16 %v7167_v39, %v7166_v1 }
 0x6d4   :  { %8968 = vmatpush3.bf16.msra.mxu0 %v11620_v49 }
 0x6d5   :  { %8969 = vmatprep.subr.bf16.mxu0 %v9331_v3 }
 0x6d7   :  { %8075 = vmatmul.mubr.msk.f32.vlgmr.msra.gmra.mrb[112].mxu0 %vm810_vm1, %v4687_v34  ;;  %v7153_v34 = vld [vmem:[%s12070_s8 + $0x100] sm:$0xff] }
 0x6d8   :  { %8971 = vmatpush3.bf16.msra.mxu0 %v11616_v20  ;;  %8085 = vmatprep.mubr.msk.f32.mxu0 %vm9333_vm2, %v9332_v32  ;;  %v9042_v26 = vpack.c.bf16 %v7154_v35, %v7153_v34 }
 0x6d9   :  { %8972 = vmatprep.subr.bf16.mxu0 %v9331_v3 }
 0x6dc   :  { %8974 = vmatpush3.bf16.msra.mxu0 %v11620_v49 }
 0x6dd   :  { %8975 = vmatprep.subr.bf16.mxu0 %v9331_v3 }
 0x6df   :  { %8086 = vmatmul.mubr.msk.f32.vlgmr.msra.gmra.mrb[114].mxu0 %vm810_vm1, %v7117_v44  ;;  %v7169_v44 = vld [vmem:[%s12070_s8 + $0x168] sm:$0xff] }
 0x6e0   :  { %8977 = vmatpush3.bf16.msra.mxu0 %v8976_v41  ;;  %8104 = vmatprep.mubr.msk.f32.mxu0 %vm9333_vm2, %v9332_v32  ;;  %v7151_v41 = vld [vmem:[%s12069_s7 + $0x20] sm:$0xff]  ;;  %v9066_v57 = vpack.c.bf16 %v7169_v44, %v7168_v36 }
 0x6e1   :  { %8978 = vmatprep.subr.bf16.mxu0 %v9331_v3 }
 0x6e4   :  { %8980 = vmatpush3.bf16.msra.mxu0 %v8979_v56  ;;  %v7155_v56 = vld [vmem:[%s12070_s8 + $0x110] sm:$0xff] }
 0x6e5   :  { %8981 = vmatprep.subr.bf16.mxu0 %v9331_v3  ;;  %v9045_v48 = vpack.c.bf16 %v7156_v7, %v7155_v56  ;;  %v7195_v56 = vld [vmem:[%s12069_s7 + $0x40] sm:$0xff]  ;;  %v7199_v7 = vld [vmem:[%s12070_s8 + $0x210] sm:$0xff] }
 0x6e8   :  { %8983 = vmatpush3.bf16.msra.mxu0 %v8982_v14  ;;  %v7171_v14 = vld [vmem:[%s12070_s8 + $0x178] sm:$0xff] }
 0x6e9   :  { %8984 = vmatprep.subr.bf16.mxu0 %v9331_v3  ;;  %v9069_v22 = vpack.c.bf16 %v7171_v14, %v7170_v45  ;;  %v7200_v45 = vld [vmem:[%s12070_s8 + $0x218] sm:$0xff] }
 0x6ea   :  { %v9117_v14 = vpack.c.bf16 %v7200_v45, %v7199_v7 }
 0x6ec   :  { %8986 = vmatpush3.bf16.msra.mxu0 %v8985_v52  ;;  %v7157_v52 = vld [vmem:[%s12070_s8 + $0x120] sm:$0xff] }
 0x6ed   :  { %8999 = vmatprep.subr.bf16.mxu0 %v9331_v3 }
 0x7aa   :  { %v4757_v38 = vpop.f32.mrb[112].mxu0 }
 0x7ab   :  { %8124 = vmatmul.mubr.msk.f32.vlgmr.msra.gmra.mrb[2].mxu1 %vm4853_vm3, %v4757_v38  ;;  %v8076_v47 = vpop.f32.mrb[113].mxu0  ;;  %v7158_v38 = vld [vmem:[%s12070_s8 + $0x128] sm:$0xff] }
 0x7ac   :  { %9019 = vmatpush3.bf16.msra.mxu1 %v11616_v20  ;;  %8164 = vmatprep.mubr.msk.f32.mxu1 %vm9333_vm2, %v9332_v32  ;;  %v9048_v47 = vpack.c.bf16 %v7158_v38, %v7157_v52  ;;  %v7203_v52 = vld [vmem:[%s12070_s8 + $0x230] sm:$0xff]  ;;  %v7204_v38 = vld [vmem:[%s12070_s8 + $0x238] sm:$0xff] }
 0x7ad   :  { %9020 = vmatprep.subr.bf16.mxu1 %v9331_v3 }
 0x7b0   :  { %9022 = vmatpush3.bf16.msra.mxu1 %v11620_v49 }
 0x7b1   :  { %9023 = vmatprep.subr.bf16.mxu1 %v9331_v3 }
 0x7b2   :  { %v4840_v5 = vpop.f32.mrb[114].mxu0 }
 0x7b3   :  { %8165 = vmatmul.mubr.msk.f32.vlgmr.msra.gmra.mrb[4].mxu1 %vm810_vm1, %v7140_v60  ;;  %8105 = vmatmul.mubr.msk.f32.vlgmr.msra.gmra.mrb[116].mxu0 %vm4853_vm3, %v4840_v5  ;;  %v8087_v13 = vpop.f32.mrb[115].mxu0  ;;  %v9051_v60 = vpack.c.bf16 %v7160_v54, %v7159_v50 }
 0x7b4   :  { %9001 = vmatpush3.bf16.msra.mxu0 %v11616_v20  ;;  %8134 = vmatprep.mubr.msk.f32.mxu0 %vm9333_vm2, %v9332_v32 }
 0x7b5   :  { %9002 = vmatprep.subr.bf16.mxu0 %v9331_v3  ;;  %9025 = vmatpush3.bf16.msra.mxu1 %v9024_v0 }
 0x7b6   :  { %9026 = vmatprep.subr.bf16.mxu1 %v9331_v3  ;;  %8183 = vmatprep.mubr.msk.f32.mxu1 %vm9333_vm2, %v9332_v32 }
 0x7b8   :  { %9004 = vmatpush3.bf16.msra.mxu0 %v11620_v49 }
 0x7b9   :  { %9028 = vmatpush3.bf16.msra.mxu1 %v9027_v16  ;;  %9005 = vmatprep.subr.bf16.mxu0 %v9331_v3 }
 0x7ba   :  { %9029 = vmatprep.subr.bf16.mxu1 %v9331_v3 }
 0x7bb   :  { %8135 = vmatmul.mubr.msk.f32.vlgmr.msra.gmra.mrb[118].mxu0 %vm810_vm1, %v7129_v59  ;;  %v7184_v59 = vld [vmem:[%s12069_s7 + $0x38] sm:$0xff] }
 0x7bc   :  { %9007 = vmatpush3.bf16.msra.mxu0 %v9006_v10  ;;  %8153 = vmatprep.mubr.msk.f32.mxu0 %vm9333_vm2, %v9332_v32  ;;  %v9096_v10 = vpack.c.bf16 %v7187_v2, %v7186_v24 }
 0x7bd   :  { %9031 = vmatpush3.bf16.msra.mxu1 %v9030_v6  ;;  %9008 = vmatprep.subr.bf16.mxu0 %v9331_v3 }
 0x7be   :  { %9032 = vmatprep.subr.bf16.mxu1 %v9331_v3 }
 0x7c0   :  { %9010 = vmatpush3.bf16.msra.mxu0 %v9009_v46  ;;  %v7176_v46 = vld [vmem:[%s12070_s8 + $0x188] sm:$0xff] }
 0x7c1   :  { %9034 = vmatpush3.bf16.msra.mxu1 %v9033_v51  ;;  %9011 = vmatprep.subr.bf16.mxu0 %v9331_v3  ;;  %v9099_v51 = vpack.c.bf16 %v7189_v17, %v7188_v18  ;;  %v9078_v55 = vpack.c.bf16 %v7176_v46, %v7175_v42  ;;  %v7208_v18 = vld [vmem:[%s12072_s10 + $0x2] sm:$0x3]  ;;  %v7210_v42 = vld [vmem:[%s12072_s10 + $0x4] sm:$0x3] }
 0x7c2   :  { %9053 = vmatprep.subr.bf16.mxu1 %v9331_v3  ;;  %v6418_v17 = vld [vmem:[%s12073_s11] sm:$0xff] }
 0x7c4   :  { %9013 = vmatpush3.bf16.msra.mxu0 %v9012_v58  ;;  %v7177_v58 = vld [vmem:[%s12070_s8 + $0x190] sm:$0xff] }
 0x7c5   :  { %9014 = vmatprep.subr.bf16.mxu0 %v9331_v3  ;;  %v9081_v4 = vpack.c.bf16 %v7178_v63, %v7177_v58  ;;  %v6422_v58 = vld [vmem:[%s12073_s11 + $0x20] sm:$0xff]  ;;  %v6423_v63 = vld [vmem:[%s12073_s11 + $0x28] sm:$0xff] }
 0x7c8   :  { %9016 = vmatpush3.bf16.msra.mxu0 %v9015_v12  ;;  %v7179_v12 = vld [vmem:[%s12070_s8 + $0x1a0] sm:$0xff] }
 0x7c9   :  { %9035 = vmatprep.subr.bf16.mxu0 %v9331_v3 }
 0x87e   :  { %v4996_v15 = vpop.f32.mrb[2].mxu1 }
 0x87f   :  { %v8125_v21 = vpop.f32.mrb[3].mxu1 }
 0x886   :  { %v5229_v33 = vpop.f32.mrb[4].mxu1  ;;  %v4923_v27 = vpop.f32.mrb[116].mxu0 }
 0x887   :  { %8184 = vmatmul.mubr.msk.f32.vlgmr.msra.gmra.mrb[6].mxu1 %vm4853_vm3, %v5229_v33  ;;  %v11751_v37 = vadd.f32 %v4996_v15, %v4923_v27  ;;  %v8106_v61 = vpop.f32.mrb[117].mxu0  ;;  %v8166_v29 = vpop.f32.mrb[5].mxu1  ;;  %v7180_v15 = vld [vmem:[%s12070_s8 + $0x1a8] sm:$0xff]  ;;  %v7190_v33 = vld [vmem:[%s12070_s8 + $0x1e0] sm:$0xff] }
 0x888   :  { %9055 = vmatpush3.bf16.msra.mxu1 %v11616_v20  ;;  %8224 = vmatprep.mubr.msk.f32.mxu1 %vm9333_vm2, %v9332_v32  ;;  %v9084_v21 = vpack.c.bf16 %v7180_v15, %v7179_v12  ;;  %v7191_v27 = vld [vmem:[%s12070_s8 + $0x1e8] sm:$0xff]  ;;  %v7181_v61 = vld [vmem:[%s12070_s8 + $0x1b0] sm:$0xff]  ;;  %v7182_v29 = vld [vmem:[%s12070_s8 + $0x1b8] sm:$0xff] }
 0x889   :  { %9056 = vmatprep.subr.bf16.mxu1 %v9331_v3  ;;  %v9087_v28 = vpack.c.bf16 %v7182_v29, %v7181_v61  ;;  %v6424_v12 = vld [vmem:[%s12073_s11 + $0x30] sm:$0xff]  ;;  %v6429_v61 = vld [vmem:[%s12073_s11 + $0x58] sm:$0xff] }
 0x88c   :  { %9058 = vmatpush3.bf16.msra.mxu1 %v11620_v49 }
 0x88d   :  { %9059 = vmatprep.subr.bf16.mxu1 %v9331_v3 }
 0x88e   :  { %v5071_v43 = vpop.f32.mrb[118].mxu0 }
 0x88f   :  { %8225 = vmatmul.mubr.msk.f32.vlgmr.msra.gmra.mrb[8].mxu1 %vm810_vm1, %v7162_v31  ;;  %8154 = vmatmul.mubr.msk.f32.vlgmr.msra.gmra.mrb[120].mxu0 %vm4853_vm3, %v5071_v43  ;;  %v8136_v30 = vpop.f32.mrb[119].mxu0  ;;  %v7193_v31 = vld [vmem:[%s12070_s8 + $0x1f8] sm:$0xff] }
 0x890   :  { %9037 = vmatpush3.bf16.msra.mxu0 %v11616_v20  ;;  %8194 = vmatprep.mubr.msk.f32.mxu0 %vm9333_vm2, %v9332_v32 }
 0x891   :  { %9038 = vmatprep.subr.bf16.mxu0 %v9331_v3  ;;  %9061 = vmatpush3.bf16.msra.mxu1 %v9060_v11  ;;  %v9105_v11 = vpack.c.bf16 %v7193_v31, %v7192_v40  ;;  %v6431_v40 = vld [vmem:[%s12073_s11 + $0x68] sm:$0xff] }
 0x892   :  { %9062 = vmatprep.subr.bf16.mxu1 %v9331_v3  ;;  %8243 = vmatprep.mubr.msk.f32.mxu1 %vm9333_vm2, %v9332_v32 }
 0x894   :  { %9040 = vmatpush3.bf16.msra.mxu0 %v11620_v49 }
 0x895   :  { %9064 = vmatpush3.bf16.msra.mxu1 %v9063_v25  ;;  %9041 = vmatprep.subr.bf16.mxu0 %v9331_v3 }
 0x896   :  { %9065 = vmatprep.subr.bf16.mxu1 %v9331_v3 }
 0x897   :  { %8195 = vmatmul.mubr.msk.f32.vlgmr.msra.gmra.mrb[122].mxu0 %vm810_vm1, %v7151_v41 }
 0x898   :  { %9043 = vmatpush3.bf16.msra.mxu0 %v9042_v26  ;;  %8213 = vmatprep.mubr.msk.f32.mxu0 %vm9333_vm2, %v9332_v32  ;;  %v7197_v26 = vld [vmem:[%s12070_s8 + $0x200] sm:$0xff] }
 0x899   :  { %9067 = vmatpush3.bf16.msra.mxu1 %v9066_v57  ;;  %9044 = vmatprep.subr.bf16.mxu0 %v9331_v3  ;;  %v7198_v57 = vld [vmem:[%s12070_s8 + $0x208] sm:$0xff] }
 0x89a   :  { %9068 = vmatprep.subr.bf16.mxu1 %v9331_v3 }
 0x89c   :  { %9046 = vmatpush3.bf16.msra.mxu0 %v9045_v48  ;;  %v7202_v48 = vld [vmem:[%s12070_s8 + $0x228] sm:$0xff] }
 0x89d   :  { %9070 = vmatpush3.bf16.msra.mxu1 %v9069_v22  ;;  %9047 = vmatprep.subr.bf16.mxu0 %v9331_v3 }
 0x89e   :  { %9089 = vmatprep.subr.bf16.mxu1 %v9331_v3 }
 0x8a0   :  { %9049 = vmatpush3.bf16.msra.mxu0 %v9048_v47  ;;  %v9123_v47 = vpack.c.bf16 %v7204_v38, %v7203_v52 }
 0x8a1   :  { %9050 = vmatprep.subr.bf16.mxu0 %v9331_v3 }
 0x8a4   :  { %9052 = vmatpush3.bf16.msra.mxu0 %v9051_v60 }
 0x8a5   :  { %9071 = vmatprep.subr.bf16.mxu0 %v9331_v3 }
 0x95a   :  { %v5311_v0 = vpop.f32.mrb[6].mxu1 }
 0x95b   :  { %v8185_v5 = vpop.f32.mrb[7].mxu1 }
 0x962   :  { %v5545_v8 = vpop.f32.mrb[8].mxu1  ;;  %v5153_v9 = vpop.f32.mrb[120].mxu0 }
 0x963   :  { %v5157_v13 = vadd.f32 %v5153_v9, %v11751_v37  ;;  %8244 = vmatmul.mubr.msk.f32.vlgmr.msra.gmra.mrb[10].mxu1 %vm4853_vm3, %v5545_v8  ;;  %v8155_v16 = vpop.f32.mrb[121].mxu0  ;;  %v8226_v19 = vpop.f32.mrb[9].mxu1  ;;  %v9102_v37 = vpack.c.bf16 %v7191_v27, %v7190_v33  ;;  %v6427_v33 = vld [vmem:[%s12073_s11 + $0x48] sm:$0xff] }
 0x964   :  { %9091 = vmatpush3.bf16.msra.mxu1 %v11616_v20  ;;  %8284 = vmatprep.mubr.msk.f32.mxu1 %vm9333_vm2, %v9332_v32  ;;  %v7206_v19 = vld [vmem:[%s12071_s9] ss:$0 sm:$0xff] }
 0x965   :  { %9092 = vmatprep.subr.bf16.mxu1 %v9331_v3  ;;  %v5315_v23 = vadd.f32 %v5311_v0, %v5157_v13 }
 0x968   :  { %9094 = vmatpush3.bf16.msra.mxu1 %v11620_v49 }
 0x969   :  { %9095 = vmatprep.subr.bf16.mxu1 %v9331_v3 }
 0x96a   :  { %v5387_v6 = vpop.f32.mrb[122].mxu0 }
 0x96b   :  { %8214 = vmatmul.mubr.msk.f32.vlgmr.msra.gmra.mrb[124].mxu0 %vm4853_vm3, %v5387_v6  ;;  %8285 = vmatmul.mubr.msk.f32.vlgmr.msra.gmra.mrb[12].mxu1 %vm810_vm1, %v7184_v59  ;;  %v8196_v62 = vpop.f32.mrb[123].mxu0  ;;  %v7212_v6 = vld [vmem:[%s12072_s10 + $0x6] sm:$0x3] }
 0x96c   :  { %9073 = vmatpush3.bf16.msra.mxu0 %v11616_v20  ;;  %8254 = vmatprep.mubr.msk.f32.mxu0 %vm9333_vm2, %v9332_v32  ;;  %v6419_v62 = vld [vmem:[%s12073_s11 + $0x8] sm:$0xff] }
 0x96d   :  { %9074 = vmatprep.subr.bf16.mxu0 %v9331_v3  ;;  %9097 = vmatpush3.bf16.msra.mxu1 %v9096_v10  ;;  %v6115_v10 = vld [vmem:[%s12072_s10] sm:$0x3]  ;;  %v9126_v46 = vpack.c.bf16 %v6419_v62, %v6418_v17 }
 0x96e   :  { %9098 = vmatprep.subr.bf16.mxu1 %v9331_v3  ;;  %8303 = vmatprep.mubr.msk.f32.mxu1 %vm9333_vm2, %v9332_v32 }
 0x970   :  { %9076 = vmatpush3.bf16.msra.mxu0 %v11620_v49 }
 0x971   :  { %9077 = vmatprep.subr.bf16.mxu0 %v9331_v3  ;;  %9100 = vmatpush3.bf16.msra.mxu1 %v9099_v51  ;;  %v6420_v51 = vld [vmem:[%s12073_s11 + $0x10] sm:$0xff] }
 0x972   :  { %9101 = vmatprep.subr.bf16.mxu1 %v9331_v3 }
 0x973   :  { %8255 = vmatmul.mubr.msk.f32.vlgmr.msra.gmra.mrb[126].mxu0 %vm810_vm1, %v7173_v53  ;;  %v6421_v53 = vld [vmem:[%s12073_s11 + $0x18] sm:$0xff] }
 0x974   :  { %9079 = vmatpush3.bf16.msra.mxu0 %v9078_v55  ;;  %8273 = vmatprep.mubr.msk.f32.mxu0 %vm9333_vm2, %v9332_v32  ;;  %v9129_v55 = vpack.c.bf16 %v6421_v53, %v6420_v51 }
 0x975   :  { %9080 = vmatprep.subr.bf16.mxu0 %v9331_v3  ;;  %9103 = vmatpush3.bf16.msra.mxu1 %v9102_v37  ;;  %v6428_v37 = vld [vmem:[%s12073_s11 + $0x50] sm:$0xff] }
 0x976   :  { %9104 = vmatprep.subr.bf16.mxu1 %v9331_v3  ;;  %v9141_v29 = vpack.c.bf16 %v6429_v61, %v6428_v37 }
 0x978   :  { %9082 = vmatpush3.bf16.msra.mxu0 %v9081_v4  ;;  %v9132_v4 = vpack.c.bf16 %v6423_v63, %v6422_v58 }
 0x979   :  { %9083 = vmatprep.subr.bf16.mxu0 %v9331_v3  ;;  %9106 = vmatpush3.bf16.msra.mxu1 %v9105_v11  ;;  %v6432_v11 = vld [vmem:[%s12073_s11 + $0x70] sm:$0xff] }
 0x97a   :  { %8336 = vmatprep.subr.mxu1 %v9332_v32 }
 0x97c   :  { %9085 = vmatpush3.bf16.msra.mxu0 %v9084_v21  ;;  %v6426_v21 = vld [vmem:[%s12073_s11 + $0x40] sm:$0xff] }
 0x97d   :  { %9086 = vmatprep.subr.bf16.mxu0 %v9331_v3  ;;  %v9138_v27 = vpack.c.bf16 %v6427_v33, %v6426_v21 }
 0x980   :  { %9088 = vmatpush3.bf16.msra.mxu0 %v9087_v28  ;;  %v6430_v28 = vld [vmem:[%s12073_s11 + $0x60] sm:$0xff] }
 0x981   :  { %9107 = vmatprep.subr.bf16.mxu0 %v9331_v3  ;;  %v9144_v31 = vpack.c.bf16 %v6431_v40, %v6430_v28 }
 0xa36   :  { %v5627_v43 = vpop.f32.mrb[10].mxu1 }
 0xa37   :  { %v8245_v1 = vpop.f32.mrb[11].mxu1 }
 0xa3e   :  { %v5469_v39 = vpop.f32.mrb[124].mxu0  ;;  %v5861_v30 = vpop.f32.mrb[12].mxu1 }
 0xa3f   :  { %v5473_v25 = vadd.f32 %v5469_v39, %v5315_v23  ;;  %v8215_v34 = vpop.f32.mrb[125].mxu0  ;;  %8304 = vmatmul.mubr.msk.f32.vlgmr.msra.gmra.mrb[14].mxu1 %vm4853_vm3, %v5861_v30  ;;  %v8286_v35 = vpop.f32.mrb[13].mxu1 }
 0xa40   :  { %8338 = vmatprep.mubr.msk.f32.mxu1 %vm9333_vm2, %v9332_v32 }
 0xa41   :  { %v5631_v36 = vadd.f32 %v5627_v43, %v5473_v25  ;;  %v6433_v43 = vld [vmem:[%s12073_s11 + $0x78] sm:$0xff] }
 0xa42   :  { %v9147_v1 = vpack.c.bf16 %v6433_v43, %v6432_v11 }
 0xa46   :  { %v5703_v44 = vpop.f32.mrb[126].mxu0 }
 0xa47   :  { %8274 = vmatmul.mubr.msk.f32.vlgmr.msra.gmra.mrb[128].mxu0 %vm4853_vm3, %v5703_v44  ;;  %v8256_v41 = vpop.f32.mrb[127].mxu0 }
 0xa48   :  { %9109 = vmatpush3.bf16.msra.mxu0 %v11616_v20  ;;  %8314 = vmatprep.mubr.msk.f32.mxu0 %vm9333_vm2, %v9332_v32  ;;  %v9114_v20 = vpack.c.bf16 %v7198_v57, %v7197_v26 }
 0xa49   :  { %9110 = vmatprep.subr.bf16.mxu0 %v9331_v3 }
 0xa4c   :  { %9112 = vmatpush3.bf16.msra.mxu0 %v11620_v49  ;;  %v7201_v49 = vld [vmem:[%s12070_s8 + $0x220] sm:$0xff] }
 0xa4d   :  { %9113 = vmatprep.subr.bf16.mxu0 %v9331_v3  ;;  %v9120_v22 = vpack.c.bf16 %v7202_v48, %v7201_v49 }
 0xa4f   :  { %8315 = vmatmul.mubr.msk.f32.vlgmr.msra.gmra.mrb[130].mxu0 %vm810_vm1, %v7195_v56  ;;  %v7214_v56 = vld [vmem:[%s12074_s12] ss:$0 sm:$0xff] }
 0xa50   :  { %9115 = vmatpush3.bf16.msra.mxu0 %v9114_v20  ;;  %8333 = vmatprep.mubr.msk.f32.mxu0 %vm9333_vm2, %v9332_v32 }
 0xa51   :  { %9116 = vmatprep.subr.bf16.mxu0 %v9331_v3 }
 0xa54   :  { %9118 = vmatpush3.bf16.msra.mxu0 %v9117_v14 }
 0xa55   :  { %9119 = vmatprep.subr.bf16.mxu0 %v9331_v3 }
 0xa58   :  { %9121 = vmatpush3.bf16.msra.mxu0 %v9120_v22 }
 0xa59   :  { %9122 = vmatprep.subr.bf16.mxu0 %v9331_v3 }
 0xa5c   :  { %9124 = vmatpush3.bf16.msra.mxu0 %v9123_v47 }
 0xa5d   :  { %8351 = vmatprep.subr.mxu0 %v9332_v32 }
 0xb12   :  { %v5943_v50 = vpop.f32.mrb[14].mxu1 }
 0xb13   :  { %v8305_v54 = vpop.f32.mrb[15].mxu1 }
 0xb1a   :  { %v5785_v60 = vpop.f32.mrb[128].mxu0 }
 0xb1b   :  { %v5789_v0 = vadd.f32 %v5785_v60, %v5631_v36  ;;  %v8275_v5 = vpop.f32.mrb[129].mxu0 }
 0xb1d   :  { %v5947_v8 = vadd.f32 %v5943_v50, %v5789_v0 }
 0xb22   :  { %v6019_v9 = vpop.f32.mrb[130].mxu0 }
 0xb23   :  { %8334 = vmatmul.mubr.msk.f32.vlgmr.msra.gmra.mrb[132].mxu0 %vm4853_vm3, %v6019_v9  ;;  %v8316_v13 = vpop.f32.mrb[131].mxu0 }
 0xb24   :  { %8353 = vmatprep.mubr.msk.f32.mxu0 %vm9333_vm2, %v9332_v32 }
 0xbf6   :  { %v6101_v16 = vpop.f32.mrb[132].mxu0 }
 0xbf7   :  { %v6105_v23 = vadd.f32 %v6101_v16, %v5947_v8  ;;  %v8335_v24 = vpop.f32.mrb[133].mxu0 }
 0xbf9   :  { %v6113_v2 = vadd.f32 %v7206_v19, %v6105_v23 }
 0xbfb   :  { %v6114_v59 = vmax.f32 %v6113_v2, 0.0 }
 0xbfd   :  { %8337 = vmatpush3.msra.mxu1 %v6114_v59  ;;  %8352 = vmatpush3.msra.mxu0 %v6114_v59 }
 0xbfe   :  { %8339 = vmatmul.mubr.msk.f32.vlgmr.msra.gmra.mrb[16].mxu1 %vm6116_vm4, %v6115_v10  ;;  %8341 = vmatprep.subr.mxu1 %v9332_v32 }
 0xbff   :  { %8342 = vmatpush3.msra.mxu1 %v6114_v59  ;;  %8343 = vmatprep.mubr.msk.f32.mxu1 %vm9333_vm2, %v9332_v32 }
 0xc00   :  { %8346 = vmatprep.subr.mxu1 %v9332_v32  ;;  %8354 = vmatmul.mubr.msk.f32.vlgmr.msra.gmra.mrb[134].mxu0 %vm6116_vm4, %v7212_v6 }
 0xc02   :  { %8344 = vmatmul.mubr.msk.f32.vlgmr.msra.gmra.mrb[18].mxu1 %vm6116_vm4, %v7208_v18 }
 0xc03   :  { %8347 = vmatpush3.msra.mxu1 %v6114_v59  ;;  %8348 = vmatprep.mubr.msk.f32.mxu1 %vm9333_vm2, %v9332_v32 }
 0xc04   :  { %9125 = vmatprep.subr.bf16.mxu1 %v9331_v3 }
 0xc06   :  { %8349 = vmatmul.mubr.msk.f32.vlgmr.msra.gmra.mrb[20].mxu1 %vm6116_vm4, %v7210_v42 }
 0xc07   :  { %9127 = vmatpush3.bf16.msra.mxu1 %v9126_v46  ;;  %8388 = vmatprep.mubr.msk.f32.mxu1 %vm9333_vm2, %v9332_v32  ;;  %v6425_v32 = vld [vmem:[%s12073_s11 + $0x38] sm:$0xff]  ;;  %s6518_s11 = sshll.u32 %s9334_s15, 4  ;;  %s6519_s11 = int_to_ptr.vmem [resolvable:$true] %s6518_s11 }
 0xc08   :  { %9128 = vmatprep.subr.bf16.mxu1 %v9331_v3  ;;  %v9135_v15 = vpack.c.bf16 %v6425_v32, %v6424_v12  ;;  %s9307_s16 = scalar_lea.vmem %s6519_s11, 32  ;;  %p9312_p1 = scmp.lt.s32.totalorder %s6519_s11, %s6519_s11 }
 0xc09   :  { %p9308_p0 = scmp.ne.s32.totalorder %s6519_s11, %s9307_s16  ;;  %p9313_p2 = scmp.lt.s32.totalorder %s9307_s16, %s9307_s16 }
 0xc0b   :  { %9130 = vmatpush3.bf16.msra.mxu1 %v9129_v55  ;;  %p9314_p3 = por %p9313_p2, %p9312_p1 }
 0xc0c   :  { %9131 = vmatprep.subr.bf16.mxu1 %v9331_v3 }
 0xc0d   :  { %p9315_p4 = pnand %p9314_p3, %p9308_p0 }
 0xc0f   :  { %9133 = vmatpush3.bf16.msra.mxu1 %v9132_v4 }
 0xc10   :  { %9134 = vmatprep.subr.bf16.mxu1 %v9331_v3 }
 0xc13   :  { %9136 = vmatpush3.bf16.msra.mxu1 %v9135_v15 }
 0xc14   :  { %9137 = vmatprep.subr.bf16.mxu1 %v9331_v3 }
 0xc17   :  { %9139 = vmatpush3.bf16.msra.mxu1 %v9138_v27 }
 0xc18   :  { %9140 = vmatprep.subr.bf16.mxu1 %v9331_v3 }
 0xc1b   :  { %9142 = vmatpush3.bf16.msra.mxu1 %v9141_v29 }
 0xc1c   :  { %9143 = vmatprep.subr.bf16.mxu1 %v9331_v3 }
 0xc1f   :  { %9145 = vmatpush3.bf16.msra.mxu1 %v9144_v31 }
 0xc20   :  { %9146 = vmatprep.subr.bf16.mxu1 %v9331_v3 }
 0xc23   :  { %9148 = vmatpush3.bf16.msra.mxu1 %v9147_v1 }
 0xcd1   :  { %v6186_v39 = vpop.f32.mrb[16].mxu1 }
 0xcd2   :  { %v8340_v30 = vpop.f32.mrb[17].mxu1 }
 0xcd3   :  { %v6413_v25 = vpop.f32.mrb[134].mxu0 }
 0xcd4   :  { %v8355_v34 = vpop.f32.mrb[135].mxu0 }
 0xcd5   :  { %v6261_v35 = vpop.f32.mrb[18].mxu1 }
 0xcd6   :  { %v6265_v36 = vmax.f32 %v6186_v39, %v6261_v35  ;;  %v8345_v44 = vpop.f32.mrb[19].mxu1 }
 0xcd9   :  { %v6337_v41 = vpop.f32.mrb[20].mxu1 }
 0xcda   :  { %v6341_v26 = vmax.f32 %v6265_v36, %v6337_v41  ;;  %v8350_v3 = vpop.f32.mrb[21].mxu1 }
 0xcdc   :  { %v6417_v57 = vmax.f32 %v6341_v26, %v6413_v25 }
 0xcde   :  { %8389 = vmatmul.mubr.f32.vlgmr.msra.gmra.mrb[22].mxu1 %v6417_v57 }
 0xdb1   :  { %v6507_v20 = vpop.f32.mrb[22].mxu1 }
 0xdb2   :  { %v6508_v7 = vadd.f32 %v7214_v56, %v6507_v20  ;;  %v8390_v45 = vpop.f32.mrb[23].mxu1 }
 0xdb4   :  { %6511 = vst [vmem:[#allocation2] sm:$0x3] %v6508_v7 }
 0xdb5   :  { %9318 = shalt.err (!%p9315_p4)
}
 0xdb6   :  { %s9319_s7 = scalar_lea.hbm %s12075_s13, 32 }
 0xdb7   :  { %p9320_p5 = scmp.ne.s32.totalorder %s12075_s13, %s9319_s7  ;;  %p9323_p6 = scmp.lt.u32.totalorder %s9319_s7, %s12075_s13 }
 0xdb9   :  { %p9325_p7 = pnand %p9323_p6, %p9320_p5 }
 0xdbb   :  { %9328 = shalt.err (!%p9325_p7)
}
 0xdbc   :  { %6521 = dma.vmem_to_hbm [thread:$0]  %s6519_s11, 32, %s12075_s13, [#allocation3]  }
 0xdbd   :  { %9329 = dma.done.wait [#allocation3], 32  }
 0xdbe   :  { %9330 = vsyncadd [#allocation3], 4294967264 }
 0xdbf   :  { %6525 = vsyncpa [#allocation3], 1 }

</bundles_post_ra>
